<compile_context>
chip_gen: v7x
topology: tpu7x:2x2x1
jax: 0.10.0
libtpu: 0.0.40
codegen_flags: <defaults>
</compile_context>

<pallas_src>
import jax
import jax.numpy as jnp
from jax.experimental import pallas as pl
from jax.experimental.pallas import tpu as pltpu


_EPS = 1e-5
_LANE = 128               # one lane group
_N_CLS_PAD = 128          # classifier columns padded to a full 128-lane register
_VMEM_LIMIT = 32 * 1024 * 1024


def _full_spec(shape):
    """BlockSpec covering the whole array, independent of the grid index."""
    nd = len(shape)
    return pl.BlockSpec(shape, lambda b, _nd=nd: (0,) * _nd)


# ----------------------------------------------------------------------------
# Fused Pallas kernel: conv + ReLU + patch-embed + pos-emb + transformer block
# + mean-pool + classification head.  One grid step per batch element.
# ----------------------------------------------------------------------------
def _trcnn_kernel(patches_ref, wconv_ref, convb_ref, pew_ref, pos_ref,
                  ln1g_ref, ln1b_ref, wqkv_ref, bqkv_ref, bo_ref,
                  ln2g_ref, ln2b_ref, w1_ref, b1_ref, w2_ref, b2_ref,
                  hw_ref, hb_ref, o_ref):
    """patches_ref: (1, N, 9*C)  bf16 im2col patches (N = H*W tokens)
       wconv_ref:   (9*C, Cm)    bf16 flattened conv weight
       convb_ref:   (1, Cm)      f32 conv bias
       pew_ref:     (Cm, D)      bf16 patch-embed weight
       pos_ref:     (N, D)       f32 positional embedding (+ patch-embed bias)
       wqkv_ref:    (D, 384)     bf16 fused QKV, 128-lane-group padded;
                                 Q scaled by 1/sqrt(D), V pre-multiplied by W_o
       bqkv_ref:    (1, 384)     f32 fused QKV bias (same folding)
       bo_ref:      (1, D)       f32 attention output bias
       w1/w2, b1/b2:             MLP weights (bf16) / biases (f32)
       hw_ref/hb_ref: (D,128)/(1,128)  classifier, padded to 128 lanes
       o_ref:       (1, 8, 128)  f32 logits written to sublane 0 only
    """
    d = pos_ref.shape[-1]

    # ---- stem: 3x3 conv (single im2col matmul) + bias + ReLU + patch embed ----
    patches = patches_ref[0]                                          # (N, 36) bf16
    feat = jnp.dot(patches, wconv_ref[...],
                   preferred_element_type=jnp.float32)                # (N, Cm)
    feat = jnp.maximum(feat + convb_ref[...], 0.0)
    x = jnp.dot(feat.astype(jnp.bfloat16), pew_ref[...],
                preferred_element_type=jnp.float32) + pos_ref[...]    # (N, D) f32

    def layernorm(h, g_ref, b_ref):
        mu = jnp.mean(h, axis=-1, keepdims=True)
        var = jnp.mean(jnp.square(h - mu), axis=-1, keepdims=True)
        return (h - mu) * jax.lax.rsqrt(var + _EPS) * g_ref[...] + b_ref[...]

    # ---- attention sub-block (pre-LN, single head, fused + folded QKV) ----
    h = layernorm(x, ln1g_ref, ln1b_ref)
    qkv = jnp.dot(h.astype(jnp.bfloat16), wqkv_ref[...],
                  preferred_element_type=jnp.float32) + bqkv_ref[...]  # (N, 384)
    # lane-group-aligned slices (offsets 0 / 128 / 256): no cross-lane shuffles
    q = qkv[:, 0:_LANE].astype(jnp.bfloat16)                 # zero-padded lanes
    k = qkv[:, _LANE:2 * _LANE].astype(jnp.bfloat16)         # zero-padded lanes
    v = qkv[:, 2 * _LANE:2 * _LANE + d].astype(jnp.bfloat16)  # V @ W_o already folded

    scores = jax.lax.dot_general(                             # q @ k^T, scale folded into W_q
        q, k, (((1,), (1,)), ((), ())),
        preferred_element_type=jnp.float32)                   # (N, N) f32
    m = jnp.max(scores, axis=-1, keepdims=True)
    p = jnp.exp(scores - m)                                   # unnormalized probs (f32)
    r = pl.reciprocal(jnp.sum(p, axis=-1, keepdims=True), approx=True)   # (N, 1)
    pv = jnp.dot(p.astype(jnp.bfloat16), v,
                 preferred_element_type=jnp.float32)          # (N, D)
    x = x + pv * r + bo_ref[...]                              # normalize AFTER p@v / W_o

    # ---- MLP sub-block ----
    h2 = layernorm(x, ln2g_ref, ln2b_ref)
    h2 = jnp.dot(h2.astype(jnp.bfloat16), w1_ref[...],
                 preferred_element_type=jnp.float32) + b1_ref[...]     # (N, D_hidden)
    h2 = jax.nn.gelu(h2)  # TODO(synk): tanh approx; PyTorch nn.GELU default is exact erf.
    h2 = jnp.dot(h2.astype(jnp.bfloat16), w2_ref[...],
                 preferred_element_type=jnp.float32) + b2_ref[...]     # (N, D)
    x = x + h2

    # ---- mean-pool over tokens + classification head (padded to 128 lanes) ----
    pooled = jnp.mean(x, axis=0, keepdims=True)                        # (1, D)
    logits = jnp.dot(pooled.astype(jnp.bfloat16), hw_ref[...],
                     preferred_element_type=jnp.float32) + hb_ref[...]  # (1, 128)
    o_ref[0, :1, :] = logits.astype(o_ref.dtype)   # remaining sublanes stay garbage; wrapper slices row 0


def trcnn_fused_pallas(patches, *consts):
    B, N, P = patches.shape
    in_specs = [pl.BlockSpec((1, N, P), lambda b: (b, 0, 0))]
    in_specs += [_full_spec(c.shape) for c in consts]
    return pl.pallas_call(
        _trcnn_kernel,
        out_shape=jax.ShapeDtypeStruct((B, 8, _N_CLS_PAD), jnp.float32),
        grid=(B,),
        in_specs=in_specs,
        out_specs=pl.BlockSpec((1, 8, _N_CLS_PAD), lambda b: (b, 0, 0)),
        compiler_params=pltpu.CompilerParams(
            dimension_semantics=("parallel",),
            vmem_limit_bytes=_VMEM_LIMIT),
    )(patches, *consts)


# ----------------------------------------------------------------------------
# Parameter construction (deterministic) and forward pass
# ----------------------------------------------------------------------------
def init_params(key, c_in=4, c_mid=8, d_model=32, d_hidden=128,
                n_tokens=256, n_classes=10):
    ks = jax.random.split(key, 12)
    f = lambda k, shape, scale: (scale * jax.random.normal(k, shape)).astype(jnp.float32)
    p = {}
    p["conv_w"] = f(ks[0], (3, 3, c_in, c_mid), 0.1)       # (kh, kw, C_in, C_out)
    p["conv_b"] = jnp.zeros((1, c_mid), jnp.float32)
    p["pe_w"] = f(ks[1], (c_mid, d_model), 0.1)
    p["pe_b"] = jnp.zeros((1, d_model), jnp.float32)
    p["pos"] = f(ks[2], (1, n_tokens, d_model), 0.02)
    p["ln1_g"] = jnp.ones((1, d_model), jnp.float32)
    p["ln1_b"] = jnp.zeros((1, d_model), jnp.float32)
    p["wq"] = f(ks[3], (d_model, d_model), 0.1)
    p["bq"] = jnp.zeros((1, d_model), jnp.float32)
    p["wk"] = f(ks[4], (d_model, d_model), 0.1)
    p["bk"] = jnp.zeros((1, d_model), jnp.float32)
    p["wv"] = f(ks[5], (d_model, d_model), 0.1)
    p["bv"] = jnp.zeros((1, d_model), jnp.float32)
    p["wo"] = f(ks[6], (d_model, d_model), 0.1)
    p["bo"] = jnp.zeros((1, d_model), jnp.float32)
    p["ln2_g"] = jnp.ones((1, d_model), jnp.float32)
    p["ln2_b"] = jnp.zeros((1, d_model), jnp.float32)
    p["w1"] = f(ks[7], (d_model, d_hidden), 0.1)
    p["b1"] = jnp.zeros((1, d_hidden), jnp.float32)
    p["w2"] = f(ks[8], (d_hidden, d_model), 0.1)
    p["b2"] = jnp.zeros((1, d_model), jnp.float32)
    p["head_w"] = f(ks[9], (d_model, n_classes), 0.1)
    p["head_b"] = jnp.zeros((1, n_classes), jnp.float32)
    return p


def trcnn_forward(params, x_nchw):
    """x_nchw: (B, C_in, H, W) float32 -> (B, n_classes) float32."""
    B, C, H, W = x_nchw.shape
    D = params["pe_w"].shape[-1]
    n_cls = params["head_w"].shape[-1]
    scale = float(D) ** -0.5

    # ---- weight-side preprocessing (tiny, done once; no activation traffic) ----
    w_conv = params["conv_w"].reshape(9 * C, -1).astype(jnp.bfloat16)   # (9C, Cm)
    b_conv = params["conv_b"]                                           # (1, Cm)
    pe_w = params["pe_w"].astype(jnp.bfloat16)                          # (Cm, D)
    pos = params["pos"].reshape(H * W, D) + params["pe_b"]              # pe_b folded in

    # Fused QKV, each slot in its own 128-lane group (zero-padded):
    #   Q slot scaled by 1/sqrt(D); V slot pre-multiplied by W_o (exact, single head).
    wvo = params["wv"] @ params["wo"]
    bvo = params["bv"] @ params["wo"]
    wqkv = jnp.zeros((D, 3 * _LANE), jnp.float32)
    wqkv = wqkv.at[:, :D].set(params["wq"] * scale)
    wqkv = wqkv.at[:, _LANE:_LANE + D].set(params["wk"])
    wqkv = wqkv.at[:, 2 * _LANE:2 * _LANE + D].set(wvo)
    wqkv = wqkv.astype(jnp.bfloat16)
    bqkv = jnp.zeros((1, 3 * _LANE), jnp.float32)
    bqkv = bqkv.at[:, :D].set(params["bq"] * scale)
    bqkv = bqkv.at[:, _LANE:_LANE + D].set(params["bk"])
    bqkv = bqkv.at[:, 2 * _LANE:2 * _LANE + D].set(bvo)

    head_w = jnp.zeros((D, _N_CLS_PAD), jnp.float32
                       ).at[:, :n_cls].set(params["head_w"]).astype(jnp.bfloat16)
    head_b = jnp.zeros((1, _N_CLS_PAD), jnp.float32
                       ).at[:, :n_cls].set(params["head_b"])

    # ---- im2col patches (host/XLA side, tiny): (B, H*W, 9*C), bf16 DMA ----
    x_nhwc = jnp.transpose(x_nchw, (0, 2, 3, 1))
    xpad = jnp.pad(x_nhwc, ((0, 0), (1, 1), (1, 1), (0, 0)))
    patches = jnp.concatenate(
        [xpad[:, di:di + H, dj:dj + W, :] for di in range(3) for dj in range(3)],
        axis=-1).reshape(B, H * W, 9 * C).astype(jnp.bfloat16)

    # ---- single fused kernel: stem + transformer block + pool + head ----
    logits_pad = trcnn_fused_pallas(
        patches, w_conv, b_conv, pe_w, pos,
        params["ln1_g"], params["ln1_b"], wqkv, bqkv, params["bo"],
        params["ln2_g"], params["ln2_b"],
        params["w1"].astype(jnp.bfloat16), params["b1"],
        params["w2"].astype(jnp.bfloat16), params["b2"],
        head_w, head_b)                                                 # (B, 8, 128)
    return logits_pad[:, 0, :n_cls]


if __name__ == "__main__":
    key = jax.random.PRNGKey(0)
    k_param, k_input = jax.random.split(key)

    B, C_in, H, W = 2, 4, 16, 16
    params = init_params(k_param, c_in=C_in, n_tokens=H * W)
    x = jax.random.normal(k_input, (B, C_in, H, W), dtype=jnp.float32)

    logits = jax.jit(trcnn_forward)(params, x)
    jax.block_until_ready(logits)
    assert logits.shape == (B, 10) and logits.dtype == jnp.float32
    print("KERNEL_OK")
</pallas_src>

<mosaic_0001>
module attributes {stable_mosaic.version = 11 : i64} {
  func.func @_trcnn_kernel(%arg0: i32, %arg1: memref<1x256x36xbf16, #tpu.memory_space<vmem>>, %arg2: memref<36x8xbf16, #tpu.memory_space<vmem>>, %arg3: memref<1x8xf32, #tpu.memory_space<vmem>>, %arg4: memref<8x32xbf16, #tpu.memory_space<vmem>>, %arg5: memref<256x32xf32, #tpu.memory_space<vmem>>, %arg6: memref<1x32xf32, #tpu.memory_space<vmem>>, %arg7: memref<1x32xf32, #tpu.memory_space<vmem>>, %arg8: memref<32x384xbf16, #tpu.memory_space<vmem>>, %arg9: memref<1x384xf32, #tpu.memory_space<vmem>>, %arg10: memref<1x32xf32, #tpu.memory_space<vmem>>, %arg11: memref<1x32xf32, #tpu.memory_space<vmem>>, %arg12: memref<1x32xf32, #tpu.memory_space<vmem>>, %arg13: memref<32x128xbf16, #tpu.memory_space<vmem>>, %arg14: memref<1x128xf32, #tpu.memory_space<vmem>>, %arg15: memref<128x32xbf16, #tpu.memory_space<vmem>>, %arg16: memref<1x32xf32, #tpu.memory_space<vmem>>, %arg17: memref<32x128xbf16, #tpu.memory_space<vmem>>, %arg18: memref<1x128xf32, #tpu.memory_space<vmem>>, %arg19: memref<1x8x128xf32, #tpu.memory_space<vmem>>) attributes {dimension_semantics = [#tpu.dimension_semantics<parallel>], iteration_bounds = array<i64: 2>, scalar_prefetch = 0 : i64, scratch_operands = 0 : i64, tpu.core_type = #tpu.core_type<tc>, window_params = [{transform_indices = @transform_0, window_bounds = array<i64: 1, 256, 36>}, {pipeline_mode = #tpu.pipeline_mode<synchronous>, transform_indices = @transform_1, window_bounds = array<i64: 36, 8>}, {pipeline_mode = #tpu.pipeline_mode<synchronous>, transform_indices = @transform_2, window_bounds = array<i64: 1, 8>}, {pipeline_mode = #tpu.pipeline_mode<synchronous>, transform_indices = @transform_3, window_bounds = array<i64: 8, 32>}, {pipeline_mode = #tpu.pipeline_mode<synchronous>, transform_indices = @transform_4, window_bounds = array<i64: 256, 32>}, {pipeline_mode = #tpu.pipeline_mode<synchronous>, transform_indices = @transform_5, window_bounds = array<i64: 1, 32>}, {pipeline_mode = #tpu.pipeline_mode<synchronous>, transform_indices = @transform_6, window_bounds = array<i64: 1, 32>}, {pipeline_mode = #tpu.pipeline_mode<synchronous>, transform_indices = @transform_7, window_bounds = array<i64: 32, 384>}, {pipeline_mode = #tpu.pipeline_mode<synchronous>, transform_indices = @transform_8, window_bounds = array<i64: 1, 384>}, {pipeline_mode = #tpu.pipeline_mode<synchronous>, transform_indices = @transform_9, window_bounds = array<i64: 1, 32>}, {pipeline_mode = #tpu.pipeline_mode<synchronous>, transform_indices = @transform_10, window_bounds = array<i64: 1, 32>}, {pipeline_mode = #tpu.pipeline_mode<synchronous>, transform_indices = @transform_11, window_bounds = array<i64: 1, 32>}, {pipeline_mode = #tpu.pipeline_mode<synchronous>, transform_indices = @transform_12, window_bounds = array<i64: 32, 128>}, {pipeline_mode = #tpu.pipeline_mode<synchronous>, transform_indices = @transform_13, window_bounds = array<i64: 1, 128>}, {pipeline_mode = #tpu.pipeline_mode<synchronous>, transform_indices = @transform_14, window_bounds = array<i64: 128, 32>}, {pipeline_mode = #tpu.pipeline_mode<synchronous>, transform_indices = @transform_15, window_bounds = array<i64: 1, 32>}, {pipeline_mode = #tpu.pipeline_mode<synchronous>, transform_indices = @transform_16, window_bounds = array<i64: 32, 128>}, {pipeline_mode = #tpu.pipeline_mode<synchronous>, transform_indices = @transform_17, window_bounds = array<i64: 1, 128>}, {transform_indices = @transform_18, window_bounds = array<i64: 1, 8, 128>}]} {
    %c0 = arith.constant 0 : index
    %c0_0 = arith.constant 0 : index
    %c0_1 = arith.constant 0 : index
    %0 = vector.load %arg1[%c0, %c0_0, %c0_1] : memref<1x256x36xbf16, #tpu.memory_space<vmem>>, vector<1x256x36xbf16>
    %1 = vector.shape_cast %0 : vector<1x256x36xbf16> to vector<256x36xbf16>
    %c0_2 = arith.constant 0 : index
    %c0_3 = arith.constant 0 : index
    %2 = vector.load %arg2[%c0_2, %c0_3] : memref<36x8xbf16, #tpu.memory_space<vmem>>, vector<36x8xbf16>
    %cst = arith.constant dense<0.000000e+00> : vector<256x8xf32>
    %3 = tpu.matmul %1, %2, %cst {dimension_numbers = #tpu.dot_dimension_numbers<[1], [0], [0], [1], [0, 0, 1, 1], [], []>} : vector<256x36xbf16>, vector<36x8xbf16>, vector<256x8xf32> -> vector<256x8xf32>
    %c0_4 = arith.constant 0 : index
    %c0_5 = arith.constant 0 : index
    %4 = vector.load %arg3[%c0_4, %c0_5] : memref<1x8xf32, #tpu.memory_space<vmem>>, vector<1x8xf32>
    %5 = vector.broadcast %4 : vector<1x8xf32> to vector<256x8xf32>
    %6 = arith.addf %3, %5 : vector<256x8xf32>
    %cst_6 = arith.constant 0.000000e+00 : f32
    %7 = vector.broadcast %cst_6 : f32 to vector<256x8xf32>
    %8 = arith.maximumf %6, %7 : vector<256x8xf32>
    %9 = arith.truncf %8 : vector<256x8xf32> to vector<256x8xbf16>
    %c0_7 = arith.constant 0 : index
    %c0_8 = arith.constant 0 : index
    %10 = vector.load %arg4[%c0_7, %c0_8] : memref<8x32xbf16, #tpu.memory_space<vmem>>, vector<8x32xbf16>
    %cst_9 = arith.constant dense<0.000000e+00> : vector<256x32xf32>
    %11 = tpu.matmul %9, %10, %cst_9 {dimension_numbers = #tpu.dot_dimension_numbers<[1], [0], [0], [1], [0, 0, 1, 1], [], []>} : vector<256x8xbf16>, vector<8x32xbf16>, vector<256x32xf32> -> vector<256x32xf32>
    %c0_10 = arith.constant 0 : index
    %c0_11 = arith.constant 0 : index
    %12 = vector.load %arg5[%c0_10, %c0_11] : memref<256x32xf32, #tpu.memory_space<vmem>>, vector<256x32xf32>
    %13 = arith.addf %11, %12 : vector<256x32xf32>
    %cst_12 = arith.constant dense<0.000000e+00> : vector<256xf32>
    %14 = vector.multi_reduction <add>, %13, %cst_12 [1] : vector<256x32xf32> to vector<256xf32>
    %15 = vector.shape_cast %14 : vector<256xf32> to vector<256x1xf32>
    %cst_13 = arith.constant 3.200000e+01 : f32
    %16 = vector.broadcast %cst_13 : f32 to vector<256x1xf32>
    %17 = arith.divf %15, %16 : vector<256x1xf32>
    %18 = vector.broadcast %17 : vector<256x1xf32> to vector<256x32xf32>
    %19 = arith.subf %13, %18 : vector<256x32xf32>
    %20 = arith.mulf %19, %19 : vector<256x32xf32>
    %cst_14 = arith.constant dense<0.000000e+00> : vector<256xf32>
    %21 = vector.multi_reduction <add>, %20, %cst_14 [1] : vector<256x32xf32> to vector<256xf32>
    %22 = vector.shape_cast %21 : vector<256xf32> to vector<256x1xf32>
    %cst_15 = arith.constant 3.200000e+01 : f32
    %23 = vector.broadcast %cst_15 : f32 to vector<256x1xf32>
    %24 = arith.divf %22, %23 : vector<256x1xf32>
    %25 = vector.broadcast %17 : vector<256x1xf32> to vector<256x32xf32>
    %26 = arith.subf %13, %25 : vector<256x32xf32>
    %cst_16 = arith.constant 9.99999974E-6 : f32
    %27 = vector.broadcast %cst_16 : f32 to vector<256x1xf32>
    %28 = arith.addf %24, %27 : vector<256x1xf32>
    %29 = math.rsqrt %28 : vector<256x1xf32>
    %30 = vector.broadcast %29 : vector<256x1xf32> to vector<256x32xf32>
    %31 = arith.mulf %26, %30 : vector<256x32xf32>
    %c0_17 = arith.constant 0 : index
    %c0_18 = arith.constant 0 : index
    %32 = vector.load %arg6[%c0_17, %c0_18] : memref<1x32xf32, #tpu.memory_space<vmem>>, vector<1x32xf32>
    %33 = vector.broadcast %32 : vector<1x32xf32> to vector<256x32xf32>
    %34 = arith.mulf %31, %33 : vector<256x32xf32>
    %c0_19 = arith.constant 0 : index
    %c0_20 = arith.constant 0 : index
    %35 = vector.load %arg7[%c0_19, %c0_20] : memref<1x32xf32, #tpu.memory_space<vmem>>, vector<1x32xf32>
    %36 = vector.broadcast %35 : vector<1x32xf32> to vector<256x32xf32>
    %37 = arith.addf %34, %36 : vector<256x32xf32>
    %38 = arith.truncf %37 : vector<256x32xf32> to vector<256x32xbf16>
    %c0_21 = arith.constant 0 : index
    %c0_22 = arith.constant 0 : index
    %39 = vector.load %arg8[%c0_21, %c0_22] : memref<32x384xbf16, #tpu.memory_space<vmem>>, vector<32x384xbf16>
    %cst_23 = arith.constant dense<0.000000e+00> : vector<256x384xf32>
    %40 = tpu.matmul %38, %39, %cst_23 {dimension_numbers = #tpu.dot_dimension_numbers<[1], [0], [0], [1], [0, 0, 1, 1], [], []>} : vector<256x32xbf16>, vector<32x384xbf16>, vector<256x384xf32> -> vector<256x384xf32>
    %c0_24 = arith.constant 0 : index
    %c0_25 = arith.constant 0 : index
    %41 = vector.load %arg9[%c0_24, %c0_25] : memref<1x384xf32, #tpu.memory_space<vmem>>, vector<1x384xf32>
    %42 = vector.broadcast %41 : vector<1x384xf32> to vector<256x384xf32>
    %43 = arith.addf %40, %42 : vector<256x384xf32>
    %44 = vector.extract_strided_slice %43 {offsets = [0, 0], sizes = [256, 128], strides = [1, 1]} : vector<256x384xf32> to vector<256x128xf32>
    %45 = arith.truncf %44 : vector<256x128xf32> to vector<256x128xbf16>
    %46 = vector.extract_strided_slice %43 {offsets = [0, 128], sizes = [256, 128], strides = [1, 1]} : vector<256x384xf32> to vector<256x128xf32>
    %47 = arith.truncf %46 : vector<256x128xf32> to vector<256x128xbf16>
    %48 = vector.extract_strided_slice %43 {offsets = [0, 256], sizes = [256, 32], strides = [1, 1]} : vector<256x384xf32> to vector<256x32xf32>
    %49 = arith.truncf %48 : vector<256x32xf32> to vector<256x32xbf16>
    %cst_26 = arith.constant dense<0.000000e+00> : vector<256x256xf32>
    %50 = tpu.matmul %45, %47, %cst_26 {dimension_numbers = #tpu.dot_dimension_numbers<[1], [1], [0], [0], [0, 0, 1, 0], [], []>} : vector<256x128xbf16>, vector<256x128xbf16>, vector<256x256xf32> -> vector<256x256xf32>
    %cst_27 = arith.constant dense<0xFF800000> : vector<256xf32>
    %51 = vector.multi_reduction <maximumf>, %50, %cst_27 [1] : vector<256x256xf32> to vector<256xf32>
    %52 = vector.shape_cast %51 : vector<256xf32> to vector<256x1xf32>
    %53 = vector.broadcast %52 : vector<256x1xf32> to vector<256x256xf32>
    %54 = arith.subf %50, %53 : vector<256x256xf32>
    %55 = math.exp %54 : vector<256x256xf32>
    %cst_28 = arith.constant dense<0.000000e+00> : vector<256xf32>
    %56 = vector.multi_reduction <add>, %55, %cst_28 [1] : vector<256x256xf32> to vector<256xf32>
    %57 = vector.shape_cast %56 : vector<256xf32> to vector<256x1xf32>
    %58 = tpu.reciprocal %57 {approx = true} : vector<256x1xf32> -> vector<256x1xf32>
    %59 = arith.truncf %55 : vector<256x256xf32> to vector<256x256xbf16>
    %cst_29 = arith.constant dense<0.000000e+00> : vector<256x32xf32>
    %60 = tpu.matmul %59, %49, %cst_29 {dimension_numbers = #tpu.dot_dimension_numbers<[1], [0], [0], [1], [0, 0, 1, 1], [], []>} : vector<256x256xbf16>, vector<256x32xbf16>, vector<256x32xf32> -> vector<256x32xf32>
    %61 = vector.broadcast %58 : vector<256x1xf32> to vector<256x32xf32>
    %62 = arith.mulf %60, %61 : vector<256x32xf32>
    %63 = arith.addf %13, %62 : vector<256x32xf32>
    %c0_30 = arith.constant 0 : index
    %c0_31 = arith.constant 0 : index
    %64 = vector.load %arg10[%c0_30, %c0_31] : memref<1x32xf32, #tpu.memory_space<vmem>>, vector<1x32xf32>
    %65 = vector.broadcast %64 : vector<1x32xf32> to vector<256x32xf32>
    %66 = arith.addf %63, %65 : vector<256x32xf32>
    %cst_32 = arith.constant dense<0.000000e+00> : vector<256xf32>
    %67 = vector.multi_reduction <add>, %66, %cst_32 [1] : vector<256x32xf32> to vector<256xf32>
    %68 = vector.shape_cast %67 : vector<256xf32> to vector<256x1xf32>
    %cst_33 = arith.constant 3.200000e+01 : f32
    %69 = vector.broadcast %cst_33 : f32 to vector<256x1xf32>
    %70 = arith.divf %68, %69 : vector<256x1xf32>
    %71 = vector.broadcast %70 : vector<256x1xf32> to vector<256x32xf32>
    %72 = arith.subf %66, %71 : vector<256x32xf32>
    %73 = arith.mulf %72, %72 : vector<256x32xf32>
    %cst_34 = arith.constant dense<0.000000e+00> : vector<256xf32>
    %74 = vector.multi_reduction <add>, %73, %cst_34 [1] : vector<256x32xf32> to vector<256xf32>
    %75 = vector.shape_cast %74 : vector<256xf32> to vector<256x1xf32>
    %cst_35 = arith.constant 3.200000e+01 : f32
    %76 = vector.broadcast %cst_35 : f32 to vector<256x1xf32>
    %77 = arith.divf %75, %76 : vector<256x1xf32>
    %78 = vector.broadcast %70 : vector<256x1xf32> to vector<256x32xf32>
    %79 = arith.subf %66, %78 : vector<256x32xf32>
    %cst_36 = arith.constant 9.99999974E-6 : f32
    %80 = vector.broadcast %cst_36 : f32 to vector<256x1xf32>
    %81 = arith.addf %77, %80 : vector<256x1xf32>
    %82 = math.rsqrt %81 : vector<256x1xf32>
    %83 = vector.broadcast %82 : vector<256x1xf32> to vector<256x32xf32>
    %84 = arith.mulf %79, %83 : vector<256x32xf32>
    %c0_37 = arith.constant 0 : index
    %c0_38 = arith.constant 0 : index
    %85 = vector.load %arg11[%c0_37, %c0_38] : memref<1x32xf32, #tpu.memory_space<vmem>>, vector<1x32xf32>
    %86 = vector.broadcast %85 : vector<1x32xf32> to vector<256x32xf32>
    %87 = arith.mulf %84, %86 : vector<256x32xf32>
    %c0_39 = arith.constant 0 : index
    %c0_40 = arith.constant 0 : index
    %88 = vector.load %arg12[%c0_39, %c0_40] : memref<1x32xf32, #tpu.memory_space<vmem>>, vector<1x32xf32>
    %89 = vector.broadcast %88 : vector<1x32xf32> to vector<256x32xf32>
    %90 = arith.addf %87, %89 : vector<256x32xf32>
    %91 = arith.truncf %90 : vector<256x32xf32> to vector<256x32xbf16>
    %c0_41 = arith.constant 0 : index
    %c0_42 = arith.constant 0 : index
    %92 = vector.load %arg13[%c0_41, %c0_42] : memref<32x128xbf16, #tpu.memory_space<vmem>>, vector<32x128xbf16>
    %cst_43 = arith.constant dense<0.000000e+00> : vector<256x128xf32>
    %93 = tpu.matmul %91, %92, %cst_43 {dimension_numbers = #tpu.dot_dimension_numbers<[1], [0], [0], [1], [0, 0, 1, 1], [], []>} : vector<256x32xbf16>, vector<32x128xbf16>, vector<256x128xf32> -> vector<256x128xf32>
    %c0_44 = arith.constant 0 : index
    %c0_45 = arith.constant 0 : index
    %94 = vector.load %arg14[%c0_44, %c0_45] : memref<1x128xf32, #tpu.memory_space<vmem>>, vector<1x128xf32>
    %95 = vector.broadcast %94 : vector<1x128xf32> to vector<256x128xf32>
    %96 = arith.addf %93, %95 : vector<256x128xf32>
    %97 = arith.mulf %96, %96 : vector<256x128xf32>
    %98 = arith.mulf %96, %97 : vector<256x128xf32>
    %cst_46 = arith.constant 4.471500e-02 : f32
    %99 = vector.broadcast %cst_46 : f32 to vector<256x128xf32>
    %100 = arith.mulf %99, %98 : vector<256x128xf32>
    %101 = arith.addf %96, %100 : vector<256x128xf32>
    %cst_47 = arith.constant 0.797884583 : f32
    %102 = vector.broadcast %cst_47 : f32 to vector<256x128xf32>
    %103 = arith.mulf %102, %101 : vector<256x128xf32>
    %104 = math.tanh %103 : vector<256x128xf32>
    %cst_48 = arith.constant 1.000000e+00 : f32
    %105 = vector.broadcast %cst_48 : f32 to vector<256x128xf32>
    %106 = arith.addf %105, %104 : vector<256x128xf32>
    %cst_49 = arith.constant 5.000000e-01 : f32
    %107 = vector.broadcast %cst_49 : f32 to vector<256x128xf32>
    %108 = arith.mulf %107, %106 : vector<256x128xf32>
    %109 = arith.mulf %96, %108 : vector<256x128xf32>
    %110 = arith.truncf %109 : vector<256x128xf32> to vector<256x128xbf16>
    %c0_50 = arith.constant 0 : index
    %c0_51 = arith.constant 0 : index
    %111 = vector.load %arg15[%c0_50, %c0_51] : memref<128x32xbf16, #tpu.memory_space<vmem>>, vector<128x32xbf16>
    %cst_52 = arith.constant dense<0.000000e+00> : vector<256x32xf32>
    %112 = tpu.matmul %110, %111, %cst_52 {dimension_numbers = #tpu.dot_dimension_numbers<[1], [0], [0], [1], [0, 0, 1, 1], [], []>} : vector<256x128xbf16>, vector<128x32xbf16>, vector<256x32xf32> -> vector<256x32xf32>
    %c0_53 = arith.constant 0 : index
    %c0_54 = arith.constant 0 : index
    %113 = vector.load %arg16[%c0_53, %c0_54] : memref<1x32xf32, #tpu.memory_space<vmem>>, vector<1x32xf32>
    %114 = vector.broadcast %113 : vector<1x32xf32> to vector<256x32xf32>
    %115 = arith.addf %112, %114 : vector<256x32xf32>
    %116 = arith.addf %66, %115 : vector<256x32xf32>
    %cst_55 = arith.constant dense<0.000000e+00> : vector<32xf32>
    %117 = vector.multi_reduction <add>, %116, %cst_55 [0] : vector<256x32xf32> to vector<32xf32>
    %118 = vector.shape_cast %117 : vector<32xf32> to vector<1x32xf32>
    %cst_56 = arith.constant 2.560000e+02 : f32
    %119 = vector.broadcast %cst_56 : f32 to vector<1x32xf32>
    %120 = arith.divf %118, %119 : vector<1x32xf32>
    %121 = arith.truncf %120 : vector<1x32xf32> to vector<1x32xbf16>
    %c0_57 = arith.constant 0 : index
    %c0_58 = arith.constant 0 : index
    %122 = vector.load %arg17[%c0_57, %c0_58] : memref<32x128xbf16, #tpu.memory_space<vmem>>, vector<32x128xbf16>
    %cst_59 = arith.constant dense<0.000000e+00> : vector<1x128xf32>
    %123 = tpu.matmul %121, %122, %cst_59 {dimension_numbers = #tpu.dot_dimension_numbers<[1], [0], [0], [1], [0, 0, 1, 1], [], []>} : vector<1x32xbf16>, vector<32x128xbf16>, vector<1x128xf32> -> vector<1x128xf32>
    %c0_60 = arith.constant 0 : index
    %c0_61 = arith.constant 0 : index
    %124 = vector.load %arg18[%c0_60, %c0_61] : memref<1x128xf32, #tpu.memory_space<vmem>>, vector<1x128xf32>
    %125 = arith.addf %123, %124 : vector<1x128xf32>
    %c0_62 = arith.constant 0 : index
    %c0_63 = arith.constant 0 : index
    %c0_64 = arith.constant 0 : index
    %126 = vector.load %arg19[%c0_62, %c0_63, %c0_64] : memref<1x8x128xf32, #tpu.memory_space<vmem>>, vector<1x1x128xf32>
    %127 = vector.shape_cast %126 : vector<1x1x128xf32> to vector<1x128xf32>
    %128 = vector.shape_cast %125 : vector<1x128xf32> to vector<1x1x128xf32>
    tpu.vector_store %arg19[%c0_62, %c0_63, %c0_64], %128 {strides = array<i32>} : memref<1x8x128xf32, #tpu.memory_space<vmem>>, vector<1x1x128xf32>,
    return
  }
  func.func @transform_0(%arg0: i32) -> (i32, i32, i32) {
    %c0_i32 = arith.constant 0 : i32
    %c0_i32_0 = arith.constant 0 : i32
    %c0_i32_1 = arith.constant 0 : i32
    return %arg0, %c0_i32, %c0_i32_0 : i32, i32, i32
  }
  func.func @transform_1(%arg0: i32) -> (i32, i32) {
    %c0_i32 = arith.constant 0 : i32
    %c0_i32_0 = arith.constant 0 : i32
    %c0_i32_1 = arith.constant 0 : i32
    return %c0_i32, %c0_i32_0 : i32, i32
  }
  func.func @transform_2(%arg0: i32) -> (i32, i32) {
    %c0_i32 = arith.constant 0 : i32
    %c0_i32_0 = arith.constant 0 : i32
    %c0_i32_1 = arith.constant 0 : i32
    return %c0_i32, %c0_i32_0 : i32, i32
  }
  func.func @transform_3(%arg0: i32) -> (i32, i32) {
    %c0_i32 = arith.constant 0 : i32
    %c0_i32_0 = arith.constant 0 : i32
    %c0_i32_1 = arith.constant 0 : i32
    return %c0_i32, %c0_i32_0 : i32, i32
  }
  func.func @transform_4(%arg0: i32) -> (i32, i32) {
    %c0_i32 = arith.constant 0 : i32
    %c0_i32_0 = arith.constant 0 : i32
    %c0_i32_1 = arith.constant 0 : i32
    return %c0_i32, %c0_i32_0 : i32, i32
  }
  func.func @transform_5(%arg0: i32) -> (i32, i32) {
    %c0_i32 = arith.constant 0 : i32
    %c0_i32_0 = arith.constant 0 : i32
    %c0_i32_1 = arith.constant 0 : i32
    return %c0_i32, %c0_i32_0 : i32, i32
  }
  func.func @transform_6(%arg0: i32) -> (i32, i32) {
    %c0_i32 = arith.constant 0 : i32
    %c0_i32_0 = arith.constant 0 : i32
    %c0_i32_1 = arith.constant 0 : i32
    return %c0_i32, %c0_i32_0 : i32, i32
  }
  func.func @transform_7(%arg0: i32) -> (i32, i32) {
    %c0_i32 = arith.constant 0 : i32
    %c0_i32_0 = arith.constant 0 : i32
    %c0_i32_1 = arith.constant 0 : i32
    return %c0_i32, %c0_i32_0 : i32, i32
  }
  func.func @transform_8(%arg0: i32) -> (i32, i32) {
    %c0_i32 = arith.constant 0 : i32
    %c0_i32_0 = arith.constant 0 : i32
    %c0_i32_1 = arith.constant 0 : i32
    return %c0_i32, %c0_i32_0 : i32, i32
  }
  func.func @transform_9(%arg0: i32) -> (i32, i32) {
    %c0_i32 = arith.constant 0 : i32
    %c0_i32_0 = arith.constant 0 : i32
    %c0_i32_1 = arith.constant 0 : i32
    return %c0_i32, %c0_i32_0 : i32, i32
  }
  func.func @transform_10(%arg0: i32) -> (i32, i32) {
    %c0_i32 = arith.constant 0 : i32
    %c0_i32_0 = arith.constant 0 : i32
    %c0_i32_1 = arith.constant 0 : i32
    return %c0_i32, %c0_i32_0 : i32, i32
  }
  func.func @transform_11(%arg0: i32) -> (i32, i32) {
    %c0_i32 = arith.constant 0 : i32
    %c0_i32_0 = arith.constant 0 : i32
    %c0_i32_1 = arith.constant 0 : i32
    return %c0_i32, %c0_i32_0 : i32, i32
  }
  func.func @transform_12(%arg0: i32) -> (i32, i32) {
    %c0_i32 = arith.constant 0 : i32
    %c0_i32_0 = arith.constant 0 : i32
    %c0_i32_1 = arith.constant 0 : i32
    return %c0_i32, %c0_i32_0 : i32, i32
  }
  func.func @transform_13(%arg0: i32) -> (i32, i32) {
    %c0_i32 = arith.constant 0 : i32
    %c0_i32_0 = arith.constant 0 : i32
    %c0_i32_1 = arith.constant 0 : i32
    return %c0_i32, %c0_i32_0 : i32, i32
  }
  func.func @transform_14(%arg0: i32) -> (i32, i32) {
    %c0_i32 = arith.constant 0 : i32
    %c0_i32_0 = arith.constant 0 : i32
    %c0_i32_1 = arith.constant 0 : i32
    return %c0_i32, %c0_i32_0 : i32, i32
  }
  func.func @transform_15(%arg0: i32) -> (i32, i32) {
    %c0_i32 = arith.constant 0 : i32
    %c0_i32_0 = arith.constant 0 : i32
    %c0_i32_1 = arith.constant 0 : i32
    return %c0_i32, %c0_i32_0 : i32, i32
  }
  func.func @transform_16(%arg0: i32) -> (i32, i32) {
    %c0_i32 = arith.constant 0 : i32
    %c0_i32_0 = arith.constant 0 : i32
    %c0_i32_1 = arith.constant 0 : i32
    return %c0_i32, %c0_i32_0 : i32, i32
  }
  func.func @transform_17(%arg0: i32) -> (i32, i32) {
    %c0_i32 = arith.constant 0 : i32
    %c0_i32_0 = arith.constant 0 : i32
    %c0_i32_1 = arith.constant 0 : i32
    return %c0_i32, %c0_i32_0 : i32, i32
  }
  func.func @transform_18(%arg0: i32) -> (i32, i32, i32) {
    %c0_i32 = arith.constant 0 : i32
    %c0_i32_0 = arith.constant 0 : i32
    %c0_i32_1 = arith.constant 0 : i32
    return %arg0, %c0_i32, %c0_i32_0 : i32, i32, i32
  }
}

</mosaic_0001>

<bundles_post_ra>
// kernel: trcnn_forward.1
= control target key start
LH: loop header
LB: loop body
LE: loop exit
PB: predicated region body
PF: predicated region fallthrough
CT: control target
= control target key end

     0   :  { %s5784_s27 = smov 0   ;;  %s7986_s0 = inlined_call_operand.vmem [shape: bf16[2,256,36], index: 0, kind: input, shape index: {}]   ;;  %s7987_s1 = inlined_call_operand.vmem [shape: bf16[36,8], index: 1, kind: input, shape index: {}]   ;;  %s7988_s2 = inlined_call_operand.vmem [shape: f32[1,8], index: 2, kind: input, shape index: {}]   ;;  %s7989_s3 = inlined_call_operand.vmem [shape: bf16[8,32], index: 3, kind: input, shape index: {}]   ;;  %s7990_s4 = inlined_call_operand.vmem [shape: f32[256,32], index: 4, kind: input, shape index: {}]   ;;  %s7991_s5 = inlined_call_operand.vmem [shape: f32[1,32], index: 5, kind: input, shape index: {}]   ;;  %s7992_s6 = inlined_call_operand.vmem [shape: f32[1,32], index: 6, kind: input, shape index: {}]   ;;  %s7993_s7 = inlined_call_operand.vmem [shape: bf16[32,384], index: 7, kind: input, shape index: {}]   ;;  %s7994_s8 = inlined_call_operand.vmem [shape: f32[1,384], index: 8, kind: input, shape index: {}]   ;;  %s7995_s9 = inlined_call_operand.vmem [shape: f32[1,32], index: 9, kind: input, shape index: {}]   ;;  %s7996_s10 = inlined_call_operand.vmem [shape: f32[1,32], index: 10, kind: input, shape index: {}]   ;;  %s7997_s11 = inlined_call_operand.vmem [shape: f32[1,32], index: 11, kind: input, shape index: {}]   ;;  %s7998_s12 = inlined_call_operand.vmem [shape: bf16[32,128], index: 12, kind: input, shape index: {}]   ;;  %s7999_s13 = inlined_call_operand.vmem [shape: f32[1,128], index: 13, kind: input, shape index: {}]   ;;  %s8000_s14 = inlined_call_operand.vmem [shape: bf16[128,32], index: 14, kind: input, shape index: {}]   ;;  %s8001_s15 = inlined_call_operand.vmem [shape: f32[1,32], index: 15, kind: input, shape index: {}]   ;;  %s8002_s16 = inlined_call_operand.vmem [shape: bf16[32,128], index: 16, kind: input, shape index: {}]   ;;  %s8003_s17 = inlined_call_operand.vmem [shape: f32[1,128], index: 17, kind: input, shape index: {}]   ;;  %s8004_s18 = inlined_call_operand.vmem [shape: f32[2,8,128], index: 18, kind: output, shape index: {}]  }
   0x1   :  { %8070 = sst [smem:[#allocation47_spill]] %s7986_s0 }
   0x2   :  { %8071 = sst [smem:[#allocation48_spill]] %s7987_s1 }
   0x3   :  { %8072 = sst [smem:[#allocation49_spill]] %s7988_s2 }
   0x4 LB: > { %s4643_s28 = sadd.s32 4294967295, %s5684_s27   ;;  %p4647_p0 = scmp.ge.s32.totalorder %s5684_s27, 1  ;;  %s5684_s27 = sphi %s5784_s27, %s28_s27  }
   0x5   : > { %p512_p1 = scmp.lt.s32.totalorder %s5684_s27, 3 }
   0x7   : > { %p513_p2 = pnand %p4647_p0, %p512_p1 }
   0x9   : > { %516 = sbr.rel (%p513_p2) target bundleno = 2952 (0xb88), region = 92 }
  0x10   : > { %s8073_s0 = sld [smem:[#allocation48_spill]]  ;;  %p565_p3 = scmp.lt.s32.totalorder %s4643_s28, 1  ;;  %v976_v3 = vld [vmem:[%s7989_s3] sm:$0xf]  ;;  %vm1058_vm0 = vcmask 1043456   ;;  %vm763_vm1 = vcmask 1041408  }
  0x11   : > { %v1060_v4 = vsel %vm1058_vm0, %v976_v3, 0  ;;  %5243 = vmatprep.subr.msk.bf16.mxu1 %vm1058_vm0, %v976_v3  ;;  %vm714_vm2 = vcmask 293888   ;;  %s8074_s26 = sld [smem:[#allocation47_spill]]  ;;  %s8075_s1 = sld [smem:[#allocation49_spill]]  ;;  %vm1009_vm3 = vcmask 64512   ;;  %vm1223_vm4 = vcmask 261120  }
  0x12   : > { %s8218_s28 = smov (!%p565_p3, %s4643_s28), 1  ;;  %5240 = vmatpush3.bf16.msra.mxu1 %v1060_v4  ;;  %vm5688_vm5 = vmmov 0  }
  0x13   : > { %s4779_s23 = sshll.u32 %s8218_s28, 7 }
  0x16   : > { %v5255_v0 = vld [vmem:[%s8073_s0] sm:$0xff]   ;;  %v5256_v1 = vld [vmem:[%s8073_s0 + $0x8] sm:$0xff]   ;;  %v5257_v2 = vld [vmem:[%s8073_s0 + $0x10] ss:$0 sps:$4 sm:$0x33]  }
  0x17   : > { %5039 = vmatprep.subr.bf16.mxu0 %v5255_v0  ;;  %s5812_s29 = scalar_lea.vmem %s8074_s26, %s4779_s23  ;;  %v765_v6 = vsel %vm763_vm1, %v5257_v2, 0  ;;  %v5850_v22 = vld [vmem:[%s8075_s1] ss:$0 sm:$0xff] }
  0x18   : > { %5040 = vmatpush3.bf16.msra.mxu0 %v5255_v0  ;;  %v5258_v5 = vld [vmem:[%s5812_s29] sm:$0xff]   ;;  %v5259_v7 = vld [vmem:[%s5812_s29 + $0x8] sm:$0xff]   ;;  %v5260_v8 = vld [vmem:[%s5812_s29 + $0x10] sm:$0xff]  }
  0x19   : > { %5041 = vmatprep.subr.bf16.mxu0 %v5256_v1  ;;  %5045 = vmatprep.mubr.msk.bf16.mxu0 %vm714_vm2, %v5258_v5  ;;  %v5261_v9 = vld [vmem:[%s5812_s29 + $0x18] sm:$0xff]   ;;  %v5262_v10 = vld [vmem:[%s5812_s29 + $0x20] sm:$0xff]   ;;  %v5263_v11 = vld [vmem:[%s5812_s29 + $0x28] sm:$0xff]  }
  0x1a   : > { %v5264_v12 = vld [vmem:[%s5812_s29 + $0x30] sm:$0xff]   ;;  %v5265_v13 = vld [vmem:[%s5812_s29 + $0x38] sm:$0xff]   ;;  %v5266_v14 = vld [vmem:[%s5812_s29 + $0x40] sm:$0xff]  }
  0x1b   : > { %v5267_v15 = vld [vmem:[%s5812_s29 + $0x48] sm:$0xff]   ;;  %v5268_v16 = vld [vmem:[%s5812_s29 + $0x50] sm:$0xff]   ;;  %v5269_v17 = vld [vmem:[%s5812_s29 + $0x58] sm:$0xff]  }
  0x1c   : > { %5042 = vmatpush3.bf16.msra.mxu0 %v5256_v1  ;;  %v5270_v18 = vld [vmem:[%s5812_s29 + $0x60] sm:$0xff]   ;;  %v5271_v19 = vld [vmem:[%s5812_s29 + $0x68] sm:$0xff]   ;;  %v5272_v20 = vld [vmem:[%s5812_s29 + $0x70] sm:$0xff]  }
  0x1d   : > { %5241 = vmatprep.subr.msk.bf16.mxu0 %vm763_vm1, %v5257_v2  ;;  %v5273_v21 = vld [vmem:[%s5812_s29 + $0x78] sm:$0xff]   ;;  %s4650_s29 = sshll.u32 %s8218_s28, 3 }
  0x1e   : > { %s573_s21 = scalar_lea.vmem %s8004_s18, %s4650_s29 }
  0x20   : > { %5044 = vmatpush3.bf16.msra.mxu0 %v765_v6 }
  0x21   : > { %5242 = vmatprep.subr.msk.bf16.mxu0 %vm1058_vm0, %v976_v3 }
  0x23   : > { %5046 = vmatmul.mubr.msk.bf16.vlgmr.msra.gmra.mrb[0].mxu0 %vm714_vm2, %v5259_v7 }
  0x24   : > { %5049 = vmatprep.mubr.msk.bf16.mxu0 %vm714_vm2, %v5260_v8  ;;  %5078 = vmatpush3.bf16.msra.mxu0 %v1060_v4 }
  0x2b   : > { %5050 = vmatmul.mubr.msk.bf16.gmra.mrb[4].mxu0 %vm714_vm2, %v5261_v9 }
  0x2c   : > { %5053 = vmatprep.mubr.msk.bf16.mxu0 %vm714_vm2, %v5262_v10 }
  0x33   : > { %5054 = vmatmul.mubr.msk.bf16.gmra.mrb[8].mxu0 %vm714_vm2, %v5263_v11 }
  0x34   : > { %5057 = vmatprep.mubr.msk.bf16.mxu0 %vm714_vm2, %v5264_v12 }
  0x3b   : > { %5058 = vmatmul.mubr.msk.bf16.gmra.mrb[12].mxu0 %vm714_vm2, %v5265_v13 }
  0x3c   : > { %5061 = vmatprep.mubr.msk.bf16.mxu0 %vm714_vm2, %v5266_v14 }
  0x43   : > { %5062 = vmatmul.mubr.msk.bf16.gmra.mrb[16].mxu0 %vm714_vm2, %v5267_v15 }
  0x44   : > { %5065 = vmatprep.mubr.msk.bf16.mxu0 %vm714_vm2, %v5268_v16 }
  0x4b   : > { %5066 = vmatmul.mubr.msk.bf16.gmra.mrb[20].mxu0 %vm714_vm2, %v5269_v17 }
  0x4c   : > { %5069 = vmatprep.mubr.msk.bf16.mxu0 %vm714_vm2, %v5270_v18 }
  0x53   : > { %5070 = vmatmul.mubr.msk.bf16.gmra.mrb[24].mxu0 %vm714_vm2, %v5271_v19 }
  0x54   : > { %5073 = vmatprep.mubr.msk.bf16.mxu0 %vm714_vm2, %v5272_v20 }
  0x5b   : > { %5074 = vmatmul.mubr.msk.bf16.gmra.mrb[28].mxu0 %vm714_vm2, %v5273_v21 }
  0xf6   : > { %v5047_v23 = vpop.f32.mrb[0].mxu0 }
  0xf7   : > { %v810_v24 = vadd.f32 %v5047_v23, %v5850_v22  ;;  %v801_v25 = vpop.f32.mrb[1].mxu0 }
  0xf8   : > { %v802_v26 = vadd.f32 %v5850_v22, %v801_v25  ;;  %v5048_v27 = vpop.f32.mrb[2].mxu0 }
  0xf9   : > { %v813_v28 = vadd.f32 %v5048_v27, %v5850_v22  ;;  %v804_v29 = vpop.f32.mrb[3].mxu0  ;;  %v930_v31 = vmax.f32 %v810_v24, 0.0 }
  0xfa   : > { %v805_v30 = vadd.f32 %v5850_v22, %v804_v29  ;;  %v928_v33 = vmax.f32 %v802_v26, 0.0 }
  0xfb   : > { %v931_v32 = vmax.f32 %v813_v28, 0.0 }
  0xfc   : > { %v929_v34 = vmax.f32 %v805_v30, 0.0 }
  0xfd   : > { %v961_v35 = vpack.c.bf16 %v931_v32, %v930_v31 }
  0xfe   : > { %v960_v36 = vpack.c.bf16 %v929_v34, %v928_v33  ;;  %v5051_v37 = vpop.f32.mrb[4].mxu0 }
  0xff   : > { %v826_v38 = vadd.f32 %v5051_v37, %v5850_v22  ;;  %v817_v39 = vpop.f32.mrb[5].mxu0 }
 0x100   : > { %v818_v40 = vadd.f32 %v5850_v22, %v817_v39  ;;  %v5052_v41 = vpop.f32.mrb[6].mxu0  ;;  %5079 = vmatprep.mubr.msk.bf16.mxu0 %vm1009_vm3, %v960_v36 }
 0x101   : > { %v934_v42 = vmax.f32 %v826_v38, 0.0  ;;  %v829_v43 = vadd.f32 %v5052_v41, %v5850_v22  ;;  %v820_v44 = vpop.f32.mrb[7].mxu0  ;;  %5080 = vmatmul.mubr.msk.bf16.vlgmr.msra.gmra.mrb[32].mxu0 %vm1009_vm3, %v961_v35 }
 0x102   : > { %v932_v45 = vmax.f32 %v818_v40, 0.0  ;;  %v821_v46 = vadd.f32 %v5850_v22, %v820_v44 }
 0x103   : > { %v935_v47 = vmax.f32 %v829_v43, 0.0 }
 0x104   : > { %v933_v48 = vmax.f32 %v821_v46, 0.0 }
 0x105   : > { %v963_v49 = vpack.c.bf16 %v935_v47, %v934_v42 }
 0x106   : > { %v962_v50 = vpack.c.bf16 %v933_v48, %v932_v45  ;;  %v5055_v51 = vpop.f32.mrb[8].mxu0 }
 0x107   : > { %v842_v52 = vadd.f32 %v5055_v51, %v5850_v22  ;;  %v833_v53 = vpop.f32.mrb[9].mxu0 }
 0x108   : > { %v834_v54 = vadd.f32 %v5850_v22, %v833_v53  ;;  %v5056_v55 = vpop.f32.mrb[10].mxu0  ;;  %5083 = vmatprep.mubr.msk.bf16.mxu0 %vm1009_vm3, %v962_v50 }
 0x109   : > { %v938_v56 = vmax.f32 %v842_v52, 0.0  ;;  %v845_v57 = vadd.f32 %v5056_v55, %v5850_v22  ;;  %v836_v58 = vpop.f32.mrb[11].mxu0  ;;  %5084 = vmatmul.mubr.msk.bf16.gmra.mrb[36].mxu0 %vm1009_vm3, %v963_v49 }
 0x10a   : > { %v936_v59 = vmax.f32 %v834_v54, 0.0  ;;  %v837_v60 = vadd.f32 %v5850_v22, %v836_v58 }
 0x10b   : > { %v939_v61 = vmax.f32 %v845_v57, 0.0 }
 0x10c   : > { %v937_v62 = vmax.f32 %v837_v60, 0.0 }
 0x10d   : > { %v965_v63 = vpack.c.bf16 %v939_v61, %v938_v56 }
 0x10e   : > { %v964_v0 = vpack.c.bf16 %v937_v62, %v936_v59  ;;  %v5059_v1 = vpop.f32.mrb[12].mxu0 }
 0x10f   : > { %v858_v2 = vadd.f32 %v5059_v1, %v5850_v22  ;;  %v849_v3 = vpop.f32.mrb[13].mxu0 }
 0x110   : > { %v850_v4 = vadd.f32 %v5850_v22, %v849_v3  ;;  %v5060_v5 = vpop.f32.mrb[14].mxu0  ;;  %5087 = vmatprep.mubr.msk.bf16.mxu0 %vm1009_vm3, %v964_v0 }
 0x111   : > { %v942_v6 = vmax.f32 %v858_v2, 0.0  ;;  %v861_v7 = vadd.f32 %v5060_v5, %v5850_v22  ;;  %v852_v8 = vpop.f32.mrb[15].mxu0  ;;  %5088 = vmatmul.mubr.msk.bf16.gmra.mrb[40].mxu0 %vm1009_vm3, %v965_v63 }
 0x112   : > { %v940_v9 = vmax.f32 %v850_v4, 0.0  ;;  %v853_v10 = vadd.f32 %v5850_v22, %v852_v8  ;;  %v979_v8 = vld [vmem:[%s7990_s4 + $0x10] sm:$0xff] }
 0x113   : > { %v943_v11 = vmax.f32 %v861_v7, 0.0 }
 0x114   : > { %v941_v12 = vmax.f32 %v853_v10, 0.0 }
 0x115   : > { %v967_v13 = vpack.c.bf16 %v943_v11, %v942_v6 }
 0x116   : > { %v5063_v14 = vpop.f32.mrb[16].mxu0  ;;  %v966_v15 = vpack.c.bf16 %v941_v12, %v940_v9  ;;  %v977_v9 = vld [vmem:[%s7990_s4] sm:$0xff] }
 0x117   : > { %v874_v16 = vadd.f32 %v5063_v14, %v5850_v22  ;;  %v865_v17 = vpop.f32.mrb[17].mxu0 }
 0x118   : > { %v866_v18 = vadd.f32 %v5850_v22, %v865_v17  ;;  %v5064_v19 = vpop.f32.mrb[18].mxu0  ;;  %5091 = vmatprep.mubr.msk.bf16.mxu1 %vm1009_vm3, %v966_v15 }
 0x119   : > { %v946_v20 = vmax.f32 %v874_v16, 0.0  ;;  %v877_v21 = vadd.f32 %v5064_v19, %v5850_v22  ;;  %v868_v23 = vpop.f32.mrb[19].mxu0  ;;  %5092 = vmatmul.mubr.msk.bf16.vlgmr.msra.gmra.mrb[0].mxu1 %vm1009_vm3, %v967_v13  ;;  %v978_v13 = vld [vmem:[%s7990_s4 + $0x8] sm:$0xff] }
 0x11a   : > { %v944_v24 = vmax.f32 %v866_v18, 0.0  ;;  %v869_v25 = vadd.f32 %v5850_v22, %v868_v23  ;;  %v983_v23 = vld [vmem:[%s7990_s4 + $0x30] sm:$0xff] }
 0x11b   : > { %v947_v26 = vmax.f32 %v877_v21, 0.0 }
 0x11c   : > { %v945_v27 = vmax.f32 %v869_v25, 0.0 }
 0x11d   : > { %v969_v28 = vpack.c.bf16 %v947_v26, %v946_v20 }
 0x11e   : > { %v968_v29 = vpack.c.bf16 %v945_v27, %v944_v24  ;;  %v5067_v30 = vpop.f32.mrb[20].mxu0  ;;  %v981_v24 = vld [vmem:[%s7990_s4 + $0x20] sm:$0xff] }
 0x11f   : > { %v890_v31 = vadd.f32 %v5067_v30, %v5850_v22  ;;  %v881_v32 = vpop.f32.mrb[21].mxu0 }
 0x120   : > { %5095 = vmatprep.mubr.msk.bf16.mxu1 %vm1009_vm3, %v968_v29  ;;  %v882_v33 = vadd.f32 %v5850_v22, %v881_v32  ;;  %v5068_v34 = vpop.f32.mrb[22].mxu0  ;;  %v982_v29 = vld [vmem:[%s7990_s4 + $0x28] sm:$0xff] }
 0x121   : > { %5096 = vmatmul.mubr.msk.bf16.gmra.mrb[4].mxu1 %vm1009_vm3, %v969_v28  ;;  %v950_v35 = vmax.f32 %v890_v31, 0.0  ;;  %v893_v36 = vadd.f32 %v5068_v34, %v5850_v22  ;;  %v884_v37 = vpop.f32.mrb[23].mxu0  ;;  %v984_v28 = vld [vmem:[%s7990_s4 + $0x38] sm:$0xff] }
 0x122   : > { %v948_v38 = vmax.f32 %v882_v33, 0.0  ;;  %v885_v39 = vadd.f32 %v5850_v22, %v884_v37 }
 0x123   : > { %v951_v40 = vmax.f32 %v893_v36, 0.0 }
 0x124   : > { %v949_v41 = vmax.f32 %v885_v39, 0.0  ;;  %v987_v39 = vld [vmem:[%s7990_s4 + $0x50] sm:$0xff] }
 0x125   : > { %v971_v42 = vpack.c.bf16 %v951_v40, %v950_v35  ;;  %v985_v40 = vld [vmem:[%s7990_s4 + $0x40] sm:$0xff] }
 0x126   : > { %v970_v43 = vpack.c.bf16 %v949_v41, %v948_v38  ;;  %v5071_v44 = vpop.f32.mrb[24].mxu0 }
 0x127   : > { %v906_v45 = vadd.f32 %v5071_v44, %v5850_v22  ;;  %v897_v46 = vpop.f32.mrb[25].mxu0  ;;  %v988_v44 = vld [vmem:[%s7990_s4 + $0x58] sm:$0xff] }
 0x128   : > { %5099 = vmatprep.mubr.msk.bf16.mxu1 %vm1009_vm3, %v970_v43  ;;  %v898_v47 = vadd.f32 %v5850_v22, %v897_v46  ;;  %v5072_v48 = vpop.f32.mrb[26].mxu0 }
 0x129   : > { %5100 = vmatmul.mubr.msk.bf16.gmra.mrb[8].mxu1 %vm1009_vm3, %v971_v42  ;;  %v954_v49 = vmax.f32 %v906_v45, 0.0  ;;  %v909_v50 = vadd.f32 %v5072_v48, %v5850_v22  ;;  %v900_v51 = vpop.f32.mrb[27].mxu0  ;;  %v986_v45 = vld [vmem:[%s7990_s4 + $0x48] sm:$0xff] }
 0x12a   : > { %v952_v52 = vmax.f32 %v898_v47, 0.0  ;;  %v901_v53 = vadd.f32 %v5850_v22, %v900_v51 }
 0x12b   : > { %v955_v54 = vmax.f32 %v909_v50, 0.0 }
 0x12c   : > { %v953_v55 = vmax.f32 %v901_v53, 0.0 }
 0x12d   : > { %v973_v56 = vpack.c.bf16 %v955_v54, %v954_v49 }
 0x12e   : > { %v972_v57 = vpack.c.bf16 %v953_v55, %v952_v52  ;;  %v5075_v58 = vpop.f32.mrb[28].mxu0  ;;  %v991_v55 = vld [vmem:[%s7990_s4 + $0x70] sm:$0xff] }
 0x12f   : > { %v922_v59 = vadd.f32 %v5075_v58, %v5850_v22  ;;  %v913_v60 = vpop.f32.mrb[29].mxu0 }
 0x130   : > { %5103 = vmatprep.mubr.msk.bf16.mxu1 %vm1009_vm3, %v972_v57  ;;  %v914_v61 = vadd.f32 %v5850_v22, %v913_v60  ;;  %v5076_v62 = vpop.f32.mrb[30].mxu0  ;;  %v992_v60 = vld [vmem:[%s7990_s4 + $0x78] sm:$0xff] }
 0x131   : > { %5104 = vmatmul.mubr.msk.bf16.gmra.mrb[12].mxu1 %vm1009_vm3, %v973_v56  ;;  %v958_v63 = vmax.f32 %v922_v59, 0.0  ;;  %v925_v0 = vadd.f32 %v5076_v62, %v5850_v22  ;;  %v916_v1 = vpop.f32.mrb[31].mxu0  ;;  %v989_v56 = vld [vmem:[%s7990_s4 + $0x60] sm:$0xff] }
 0x132   : > { %v956_v2 = vmax.f32 %v914_v61, 0.0  ;;  %v917_v3 = vadd.f32 %v5850_v22, %v916_v1  ;;  %v980_v22 = vld [vmem:[%s7990_s4 + $0x18] sm:$0xff]  ;;  %v990_v61 = vld [vmem:[%s7990_s4 + $0x68] sm:$0xff] }
 0x133   : > { %v959_v4 = vmax.f32 %v925_v0, 0.0 }
 0x134   : > { %v957_v5 = vmax.f32 %v917_v3, 0.0 }
 0x135   : > { %v975_v6 = vpack.c.bf16 %v959_v4, %v958_v63 }
 0x136   : > { %v974_v7 = vpack.c.bf16 %v957_v5, %v956_v2 }
 0x138   : > { %5107 = vmatprep.mubr.msk.bf16.mxu1 %vm1009_vm3, %v974_v7  ;;  %v995_v7 = vld [vmem:[%s7990_s4 + $0x90] sm:$0xff] }
 0x139   : > { %5108 = vmatmul.mubr.msk.bf16.gmra.mrb[16].mxu1 %vm1009_vm3, %v975_v6 }
 0x1d4   : > { %v5081_v10 = vpop.f32.mrb[32].mxu0 }
 0x1d5   : > { %v5909_v11 = vadd.f32 %v5081_v10, %v979_v8  ;;  %v1096_v12 = vpop.f32.mrb[33].mxu0  ;;  %v993_v8 = vld [vmem:[%s7990_s4 + $0x80] sm:$0xff] }
 0x1d6   : > { %v5914_v14 = vadd.f32 %v1096_v12, %v977_v9  ;;  %v5082_v15 = vpop.f32.mrb[34].mxu0  ;;  %v996_v12 = vld [vmem:[%s7990_s4 + $0x98] sm:$0xff] }
 0x1d7   : > { %8076 = vst [vmem:[#allocation2_spill] sm:$0xff] %v5909_v11  ;;  %v5916_v16 = vadd.f32 %v5082_v15, %v980_v22  ;;  %v1099_v17 = vpop.f32.mrb[35].mxu0  ;;  %v1230_v18 = vsel %vm1223_vm4, %v5909_v11, 0.0 }
 0x1d8   : > { %8077 = vst [vmem:[#allocation3_spill] sm:$0xff] %v5914_v14  ;;  %v5920_v19 = vadd.f32 %v1099_v17, %v978_v13  ;;  %1231 = vadd.xlane.f32.xlu1 %v1230_v18  ;;  %v1224_v20 = vsel %vm1223_vm4, %v5914_v14, 0.0  ;;  %v994_v13 = vld [vmem:[%s7990_s4 + $0x88] sm:$0xff] }
 0x1d9   : > { %8078 = vst [vmem:[#allocation4_spill] sm:$0xff] %v5916_v16  ;;  %1225 = vadd.xlane.f32.xlu0 %v1224_v20  ;;  %v1233_v21 = vsel %vm1223_vm4, %v5916_v16, 0.0 }
 0x1da   : > { %8079 = vst [vmem:[#allocation5_spill] sm:$0xff] %v5920_v19  ;;  %v1227_v26 = vsel %vm1223_vm4, %v5920_v19, 0.0 }
 0x1dc   : > { %1234 = vadd.xlane.f32.xlu1 %v1233_v21  ;;  %v5085_v25 = vpop.f32.mrb[36].mxu0 }
 0x1dd   : > { %v1112_v27 = vpop.f32.mrb[37].mxu0  ;;  %1228 = vadd.xlane.f32.xlu0 %v1227_v26  ;;  %v5940_v30 = vadd.f32 %v5085_v25, %v983_v23 }
 0x1de   : > { %v5942_v31 = vadd.f32 %v1112_v27, %v981_v24  ;;  %v5086_v32 = vpop.f32.mrb[38].mxu0 }
 0x1df   : > { %8080 = vst [vmem:[#allocation6_spill] sm:$0xff] %v5940_v30  ;;  %v1115_v33 = vpop.f32.mrb[39].mxu0  ;;  %v5944_v34 = vadd.f32 %v5086_v32, %v984_v28  ;;  %v1242_v38 = vsel %vm1223_vm4, %v5940_v30, 0.0 }
 0x1e0   : > { %8081 = vst [vmem:[#allocation7_spill] sm:$0xff] %v5942_v31  ;;  %v5946_v35 = vadd.f32 %v1115_v33, %v982_v29  ;;  %v1236_v36 = vsel %vm1223_vm4, %v5942_v31, 0.0 }
 0x1e1   : > { %8082 = vst [vmem:[#allocation8_spill] sm:$0xff] %v5944_v34  ;;  %1237 = vadd.xlane.f32.xlu0 %v1236_v36  ;;  %v1245_v42 = vsel %vm1223_vm4, %v5944_v34, 0.0 }
 0x1e2   : > { %8083 = vst [vmem:[#allocation9_spill] sm:$0xff] %v5946_v35  ;;  %v1239_v37 = vsel %vm1223_vm4, %v5946_v35, 0.0 }
 0x1e3   : > { %1240 = vadd.xlane.f32.xlu1 %v1239_v37 }
 0x1e4   : > { %v5089_v41 = vpop.f32.mrb[40].mxu0 }
 0x1e5   : > { %v1128_v43 = vpop.f32.mrb[41].mxu0  ;;  %1243 = vadd.xlane.f32.xlu0 %v1242_v38  ;;  %v5968_v46 = vadd.f32 %v5089_v41, %v987_v39 }
 0x1e6   : > { %v5970_v47 = vadd.f32 %v1128_v43, %v985_v40  ;;  %v5090_v48 = vpop.f32.mrb[42].mxu0 }
 0x1e7   : > { %8084 = vst [vmem:[#allocation10_spill] sm:$0xff] %v5968_v46  ;;  %v1131_v49 = vpop.f32.mrb[43].mxu0  ;;  %1246 = vadd.xlane.f32.xlu1 %v1245_v42  ;;  %v5972_v50 = vadd.f32 %v5090_v48, %v988_v44  ;;  %v1254_v54 = vsel %vm1223_vm4, %v5968_v46, 0.0 }
 0x1e8   : > { %8085 = vst [vmem:[#allocation11_spill] sm:$0xff] %v5970_v47  ;;  %v5974_v51 = vadd.f32 %v1131_v49, %v986_v45  ;;  %v1248_v52 = vsel %vm1223_vm4, %v5970_v47, 0.0 }
 0x1e9   : > { %8086 = vst [vmem:[#allocation12_spill] sm:$0xff] %v5972_v50  ;;  %1249 = vadd.xlane.f32.xlu0 %v1248_v52  ;;  %v1257_v58 = vsel %vm1223_vm4, %v5972_v50, 0.0 }
 0x1ea   : > { %8087 = vst [vmem:[#allocation13_spill] sm:$0xff] %v5974_v51  ;;  %v1251_v53 = vsel %vm1223_vm4, %v5974_v51, 0.0 }
 0x1eb   : > { %1252 = vadd.xlane.f32.xlu1 %v1251_v53  ;;  %v997_v53 = vld [vmem:[%s7990_s4 + $0xa0] sm:$0xff] }
 0x1ec   : > { %v5093_v57 = vpop.f32.mrb[0].mxu1 }
 0x1ed   : > { %v1144_v59 = vpop.f32.mrb[1].mxu1  ;;  %1255 = vadd.xlane.f32.xlu0 %v1254_v54  ;;  %v5996_v62 = vadd.f32 %v5093_v57, %v991_v55 }
 0x1ee   : > { %v5998_v63 = vadd.f32 %v1144_v59, %v989_v56  ;;  %v5094_v0 = vpop.f32.mrb[2].mxu1 }
 0x1ef   : > { %8088 = vst [vmem:[#allocation14_spill] sm:$0xff] %v5996_v62  ;;  %v1147_v1 = vpop.f32.mrb[3].mxu1  ;;  %1258 = vadd.xlane.f32.xlu1 %v1257_v58  ;;  %v6000_v2 = vadd.f32 %v5094_v0, %v992_v60  ;;  %v1266_v6 = vsel %vm1223_vm4, %v5996_v62, 0.0  ;;  %v998_v0 = vld [vmem:[%s7990_s4 + $0xa8] sm:$0xff] }
 0x1f0   : > { %8089 = vst [vmem:[#allocation15_spill] sm:$0xff] %v5998_v63  ;;  %v6002_v3 = vadd.f32 %v1147_v1, %v990_v61  ;;  %v1260_v4 = vsel %vm1223_vm4, %v5998_v63, 0.0 }
 0x1f1   : > { %8090 = vst [vmem:[#allocation16_spill] sm:$0xff] %v6000_v2  ;;  %1261 = vadd.xlane.f32.xlu0 %v1260_v4  ;;  %v1269_v10 = vsel %vm1223_vm4, %v6000_v2, 0.0 }
 0x1f2   : > { %8091 = vst [vmem:[#allocation17_spill] sm:$0xff] %v6002_v3  ;;  %v1263_v5 = vsel %vm1223_vm4, %v6002_v3, 0.0 }
 0x1f3   : > { %1264 = vadd.xlane.f32.xlu1 %v1263_v5 }
 0x1f4   : > { %v5097_v9 = vpop.f32.mrb[4].mxu1 }
 0x1f5   : > { %v1160_v22 = vpop.f32.mrb[5].mxu1  ;;  %1267 = vadd.xlane.f32.xlu0 %v1266_v6  ;;  %v6024_v15 = vadd.f32 %v5097_v9, %v995_v7 }
 0x1f6   : > { %v6026_v17 = vadd.f32 %v1160_v22, %v993_v8  ;;  %v5098_v18 = vpop.f32.mrb[6].mxu1  ;;  %v999_v8 = vld [vmem:[%s7990_s4 + $0xb0] sm:$0xff] }
 0x1f7   : > { %8092 = vst [vmem:[#allocation18_spill] sm:$0xff] %v6024_v15  ;;  %v1163_v20 = vpop.f32.mrb[7].mxu1  ;;  %1270 = vadd.xlane.f32.xlu1 %v1269_v10  ;;  %v6028_v21 = vadd.f32 %v5098_v18, %v996_v12  ;;  %v1278_v26 = vsel %vm1223_vm4, %v6024_v15, 0.0 }
 0x1f8   : > { %8093 = vst [vmem:[#allocation19_spill] sm:$0xff] %v6026_v17  ;;  %v6030_v23 = vadd.f32 %v1163_v20, %v994_v13  ;;  %v1272_v24 = vsel %vm1223_vm4, %v6026_v17, 0.0 }
 0x1f9   : > { %8094 = vst [vmem:[#allocation20_spill] sm:$0xff] %v6028_v21  ;;  %1273 = vadd.xlane.f32.xlu0 %v1272_v24  ;;  %v1281_v27 = vsel %vm1223_vm4, %v6028_v21, 0.0  ;;  %v1000_v24 = vld [vmem:[%s7990_s4 + $0xb8] sm:$0xff] }
 0x1fa   : > { %8095 = vst [vmem:[#allocation21_spill] sm:$0xff] %v6030_v23  ;;  %v1275_v25 = vsel %vm1223_vm4, %v6030_v23, 0.0 }
 0x1fb   : > { %1276 = vadd.xlane.f32.xlu1 %v1275_v25 }
 0x1fc   : > { %v5101_v28 = vpop.f32.mrb[8].mxu1 }
 0x1fd   : > { %1279 = vadd.xlane.f32.xlu0 %v1278_v26  ;;  %v1176_v29 = vpop.f32.mrb[9].mxu1  ;;  %v6089_v18 = vadd.f32 %v5101_v28, %v999_v8 }
 0x1fe   : > { %v5102_v32 = vpop.f32.mrb[10].mxu1  ;;  %v6062_v58 = vadd.f32 %v1176_v29, %v997_v53 }
 0x1ff   : > { %1282 = vadd.xlane.f32.xlu1 %v1281_v27  ;;  %v1179_v33 = vpop.f32.mrb[11].mxu1  ;;  %8098 = vst [vmem:[#allocation24_spill] sm:$0xff] %v6089_v18  ;;  %v6102_v28 = vadd.f32 %v5102_v32, %v1000_v24 }
 0x200   : > { %8096 = vst [vmem:[#allocation22_spill] sm:$0xff] %v6062_v58  ;;  %v6076_v6 = vadd.f32 %v1179_v33, %v998_v0  ;;  %v1284_v7 = vsel %vm1223_vm4, %v6062_v58, 0.0 }
 0x201   : > { %8099 = vst [vmem:[#allocation25_spill] sm:$0xff] %v6102_v28 }
 0x202   : > { %8097 = vst [vmem:[#allocation23_spill] sm:$0xff] %v6076_v6  ;;  %v1287_v20 = vsel %vm1223_vm4, %v6076_v6, 0.0 }
 0x204   : > { %v6040_v36 = vpop.f32.mrb[12].mxu1 }
 0x205   : > { %v1192_v37 = vpop.f32.mrb[13].mxu1 }
 0x206   : > { %v6042_v38 = vpop.f32.mrb[14].mxu1 }
 0x207   : > { %v6044_v39 = vpop.f32.mrb[15].mxu1 }
 0x20c   : > { %v6046_v40 = vpop.f32.mrb[16].mxu1 }
 0x20d   : > { %v6048_v41 = vpop.f32.mrb[17].mxu1 }
 0x20e   : > { %v6050_v42 = vpop.f32.mrb[18].mxu1 }
 0x20f   : > { %v6052_v43 = vpop.f32.mrb[19].mxu1 }
 0x265   : > { %v1232_v44 = vpop.xlane.xlu1 %1231 }
 0x266   : > { %v1226_v45 = vpop.xlane.xlu0 %1225  ;;  %v1323_v49 = vmul.f32 0.03125, %v1232_v44  ;;  %v1290_v44 = vsel %vm1223_vm4, %v6089_v18, 0.0 }
 0x267   : > { %v1321_v48 = vmul.f32 0.03125, %v1226_v45 }
 0x268   : > { %v6065_v59 = vsub.f32 %v5909_v11, %v1323_v49  ;;  %v1001_v49 = vld [vmem:[%s7990_s4 + $0xc0] sm:$0xff] }
 0x269   : > { %v6055_v52 = vsub.f32 %v5914_v14, %v1321_v48  ;;  %v1235_v54 = vpop.xlane.xlu1 %1234 }
 0x26a   : > { %v1229_v55 = vpop.xlane.xlu0 %1228  ;;  %v1324_v60 = vmul.f32 0.03125, %v1235_v54  ;;  %v1387_v12 = vmul.f32 %v6065_v59, %v6065_v59 }
 0x26b   : > { %v1322_v56 = vmul.f32 0.03125, %v1229_v55  ;;  %v1385_v57 = vmul.f32 %v6055_v52, %v6055_v52 }
 0x26c   : > { %v6084_v9 = vsub.f32 %v5916_v16, %v1324_v60  ;;  %v1423_v27 = vsel %vm1223_vm4, %v1387_v12, 0.0  ;;  %v1003_v12 = vld [vmem:[%s7990_s4 + $0xd0] sm:$0xff] }
 0x26d   : > { %v6068_v61 = vsub.f32 %v5920_v19, %v1322_v56  ;;  %v1417_v1 = vsel %vm1223_vm4, %v1385_v57, 0.0  ;;  %v6115_v56 = vadd.f32 %v1192_v37, %v1001_v49  ;;  %v1293_v57 = vsel %vm1223_vm4, %v6102_v28, 0.0 }
 0x26e   : > { %1418 = vadd.xlane.f32.xlu0 %v1417_v1  ;;  %v1238_v4 = vpop.xlane.xlu0 %1237  ;;  %v1388_v29 = vmul.f32 %v6084_v9, %v6084_v9  ;;  %v1002_v1 = vld [vmem:[%s7990_s4 + $0xc8] sm:$0xff] }
 0x26f   : > { %v1386_v5 = vmul.f32 %v6068_v61, %v6068_v61  ;;  %v1325_v10 = vmul.f32 0.03125, %v1238_v4  ;;  %8100 = vst [vmem:[#allocation26_spill] sm:$0xff] %v6115_v56  ;;  %v1296_v8 = vsel %vm1223_vm4, %v6115_v56, 0.0 }
 0x270   : > { %v1241_v13 = vpop.xlane.xlu1 %1240  ;;  %v1426_v53 = vsel %vm1223_vm4, %v1388_v29, 0.0 }
 0x271   : > { %v1420_v22 = vsel %vm1223_vm4, %v1386_v5, 0.0  ;;  %v6097_v25 = vsub.f32 %v5942_v31, %v1325_v10  ;;  %v1326_v26 = vmul.f32 0.03125, %v1241_v13 }
 0x272   : > { %1285 = vadd.xlane.f32.xlu0 %v1284_v7  ;;  %1421 = vadd.xlane.f32.xlu1 %v1420_v22  ;;  %v1244_v33 = vpop.xlane.xlu0 %1243  ;;  %v6129_v7 = vadd.f32 %v6044_v39, %v1002_v1  ;;  %v6143_v39 = vadd.f32 %v6040_v36, %v1003_v12 }
 0x273   : > { %v6107_v45 = vsub.f32 %v5946_v35, %v1326_v26  ;;  %v1327_v48 = vmul.f32 0.03125, %v1244_v33  ;;  %v1389_v54 = vmul.f32 %v6097_v25, %v6097_v25  ;;  %v1004_v33 = vld [vmem:[%s7990_s4 + $0xd8] sm:$0xff] }
 0x274   : > { %v1247_v55 = vpop.xlane.xlu1 %1246  ;;  %8101 = vst [vmem:[#allocation27_spill] sm:$0xff] %v6129_v7  ;;  %8102 = vst [vmem:[#allocation28_spill] sm:$0xff] %v6143_v39  ;;  %v1299_v26 = vsel %vm1223_vm4, %v6129_v7, 0.0  ;;  %v6157_v36 = vadd.f32 %v6042_v38, %v1004_v33 }
 0x275   : > { %v6120_v60 = vsub.f32 %v5940_v30, %v1327_v48  ;;  %v1328_v0 = vmul.f32 0.03125, %v1247_v55  ;;  %v1429_v4 = vsel %vm1223_vm4, %v1389_v54, 0.0  ;;  %v1390_v5 = vmul.f32 %v6107_v45, %v6107_v45 }
 0x276   : > { %1424 = vadd.xlane.f32.xlu0 %v1423_v27  ;;  %1288 = vadd.xlane.f32.xlu1 %v1287_v20  ;;  %v1250_v32 = vpop.xlane.xlu0 %1249  ;;  %8103 = vst [vmem:[#allocation29_spill] sm:$0xff] %v6157_v36  ;;  %v1302_v54 = vsel %vm1223_vm4, %v6143_v39, 0.0 }
 0x277   : > { %v6134_v10 = vsub.f32 %v5944_v34, %v1328_v0  ;;  %v1329_v22 = vmul.f32 0.03125, %v1250_v32  ;;  %v1432_v13 = vsel %vm1223_vm4, %v1390_v5, 0.0  ;;  %v1391_v20 = vmul.f32 %v6120_v60, %v6120_v60 }
 0x278   : > { %v1253_v37 = vpop.xlane.xlu1 %1252  ;;  %v1305_v5 = vsel %vm1223_vm4, %v6157_v36, 0.0 }
 0x279   : > { %v6148_v27 = vsub.f32 %v5970_v47, %v1329_v22  ;;  %v1330_v29 = vmul.f32 0.03125, %v1253_v37  ;;  %v1392_v48 = vmul.f32 %v6134_v10, %v6134_v10  ;;  %v1006_v22 = vld [vmem:[%s7990_s4 + $0xe8] sm:$0xff] }
 0x27a   : > { %1291 = vadd.xlane.f32.xlu0 %v1290_v44  ;;  %1427 = vadd.xlane.f32.xlu1 %v1426_v53  ;;  %v1256_v24 = vpop.xlane.xlu0 %1255  ;;  %v1435_v44 = vsel %vm1223_vm4, %v1391_v20, 0.0 }
 0x27b   : > { %v6162_v55 = vsub.f32 %v5974_v51, %v1330_v29  ;;  %v1331_v32 = vmul.f32 0.03125, %v1256_v24  ;;  %v1438_v0 = vsel %vm1223_vm4, %v1392_v48, 0.0  ;;  %v1393_v1 = vmul.f32 %v6148_v27, %v6148_v27  ;;  %v5274_v24 = vld [vmem:[%s7993_s7] ss:$12 sps:$4 sm:$0xff]   ;;  %v1007_v48 = vld [vmem:[%s7990_s4 + $0xf0] sm:$0xff] }
 0x27c   : > { %v1259_v49 = vpop.xlane.xlu1 %1258 }
 0x27d   : > { %v6176_v37 = vsub.f32 %v5968_v46, %v1331_v32  ;;  %v1441_v12 = vsel %vm1223_vm4, %v1393_v1, 0.0 }
 0x27e   : > { %1294 = vadd.xlane.f32.xlu1 %v1293_v57  ;;  %1430 = vadd.xlane.f32.xlu0 %v1429_v4  ;;  %v1262_v53 = vpop.xlane.xlu0 %1261  ;;  %v1005_v57 = vld [vmem:[%s7990_s4 + $0xe0] sm:$0xff] }
 0x27f   : > { %v6171_v4 = vadd.f32 %v6048_v41, %v1005_v57  ;;  %v5276_v41 = vld [vmem:[%s7993_s7 + $0x4] ss:$12 sps:$4 sm:$0xff]  }
 0x280   : > { %v1265_v38 = vpop.xlane.xlu1 %1264  ;;  %1840 = vmatprep.subr.bf16.mxu1 %v5276_v41  ;;  %v8006_v41 = vmov 0  }
 0x281   : > { %8104 = vst [vmem:[#allocation30_spill] sm:$0xff] %v6171_v4  ;;  %v1308_v29 = vsel %vm1223_vm4, %v6171_v4, 0.0  ;;  %1841 = vmatpush1.bf16.msra.mxu1 %v5274_v24  ;;  %v1334_v57 = vmul.f32 0.03125, %v1265_v38  ;;  %1872 = vmatprep.mubr.bf16.mxu1 %v8006_v41 }
 0x282   : > { %1433 = vadd.xlane.f32.xlu1 %v1432_v13  ;;  %1297 = vadd.xlane.f32.xlu0 %v1296_v8  ;;  %v1332_v8 = vmul.f32 0.03125, %v1259_v49  ;;  %v1394_v13 = vmul.f32 %v6162_v55, %v6162_v55  ;;  %v1268_v20 = vpop.xlane.xlu0 %1267 }
 0x284   : > { %v6196_v33 = vsub.f32 %v5972_v50, %v1332_v8  ;;  %v1444_v49 = vsel %vm1223_vm4, %v1394_v13, 0.0  ;;  %v1271_v32 = vpop.xlane.xlu1 %1270 }
 0x286   : > { %1300 = vadd.xlane.f32.xlu1 %v1299_v26  ;;  %1436 = vadd.xlane.f32.xlu0 %v1435_v44  ;;  %v6191_v26 = vadd.f32 %v6052_v43, %v1006_v22  ;;  %v1333_v44 = vmul.f32 0.03125, %v1262_v53  ;;  %v5279_v43 = vld [vmem:[%s7993_s7 + $0x1c] ss:$12 sps:$4 sm:$0xff]   ;;  %v5277_v53 = vld [vmem:[%s7993_s7 + $0x18] ss:$12 sps:$4 sm:$0xff]   ;;  %v1274_v1 = vpop.xlane.xlu0 %1273  ;;  %v1396_v38 = vmul.f32 %v6196_v33, %v6196_v33 }
 0x287   : > { %1842 = vmatprep.subr.bf16.mxu1 %v5279_v43 }
 0x288   : > { %8105 = vst [vmem:[#allocation31_spill] sm:$0xff] %v6191_v26  ;;  %v1311_v8 = vsel %vm1223_vm4, %v6191_v26, 0.0  ;;  %1843 = vmatpush1.bf16.msra.mxu1 %v5277_v53  ;;  %v6216_v22 = vsub.f32 %v5998_v63, %v1333_v44  ;;  %v1277_v44 = vpop.xlane.xlu1 %1276 }
 0x28a   : > { %1439 = vadd.xlane.f32.xlu1 %v1438_v0  ;;  %1303 = vadd.xlane.f32.xlu0 %v1302_v54  ;;  %v1395_v54 = vmul.f32 %v6176_v37, %v6176_v37  ;;  %v1335_v0 = vmul.f32 0.03125, %v1268_v20  ;;  %v6229_v20 = vsub.f32 %v6002_v3, %v1334_v57  ;;  %v1397_v53 = vmul.f32 %v6216_v22, %v6216_v22  ;;  %v1280_v57 = vpop.xlane.xlu0 %1279 }
 0x28c   : > { %v1447_v13 = vsel %vm1223_vm4, %v1395_v54, 0.0  ;;  %v6232_v24 = vsub.f32 %v5996_v62, %v1335_v0  ;;  %v1450_v54 = vsel %vm1223_vm4, %v1396_v38, 0.0  ;;  %v1339_v38 = vmul.f32 0.03125, %v1280_v57 }
 0x28e   : > { %1306 = vadd.xlane.f32.xlu1 %v1305_v5  ;;  %1442 = vadd.xlane.f32.xlu0 %v1441_v12  ;;  %v6211_v5 = vadd.f32 %v6046_v40, %v1007_v48  ;;  %v1008_v12 = vld [vmem:[%s7990_s4 + $0xf8] sm:$0xff]  ;;  %v5280_v40 = vld [vmem:[%s7993_s7 + $0x8] ss:$12 sps:$4 sm:$0xff]  }
 0x28f   : > { %5111 = vmatprep.subr.bf16.mxu0 %v5280_v40  ;;  %v6235_v48 = vadd.f32 %v6050_v42, %v1008_v12 }
 0x290   : > { %8106 = vst [vmem:[#allocation32_spill] sm:$0xff] %v6211_v5  ;;  %5112 = vmatpush3.bf16.msra.mxu0 %v5280_v40  ;;  %v1314_v43 = vsel %vm1223_vm4, %v6211_v5, 0.0  ;;  %v1453_v40 = vsel %vm1223_vm4, %v1397_v53, 0.0 }
 0x291   : > { %8107 = vst [vmem:[#allocation33_spill] sm:$0xff] %v6235_v48  ;;  %v1317_v0 = vsel %vm1223_vm4, %v6235_v48, 0.0 }
 0x292   : > { %1445 = vadd.xlane.f32.xlu1 %v1444_v49  ;;  %1309 = vadd.xlane.f32.xlu0 %v1308_v29  ;;  %v1336_v29 = vmul.f32 0.03125, %v1271_v32  ;;  %v1337_v49 = vmul.f32 0.03125, %v1274_v1  ;;  %v5281_v32 = vld [vmem:[%s7993_s7 + $0x20] ss:$12 sps:$4 sm:$0xff]   ;;  %v1398_v1 = vmul.f32 %v6229_v20, %v6229_v20 }
 0x293   : > { %5113 = vmatprep.subr.bf16.mxu0 %v5281_v32 }
 0x294   : > { %v6246_v42 = vsub.f32 %v6000_v2, %v1336_v29  ;;  %v6255_v12 = vsub.f32 %v6026_v17, %v1337_v49  ;;  %5114 = vmatpush3.bf16.msra.mxu0 %v5281_v32  ;;  %v1283_v29 = vpop.xlane.xlu1 %1282  ;;  %v6266_v49 = vsub.f32 %v6024_v15, %v1339_v38 }
 0x296   : > { %1312 = vadd.xlane.f32.xlu1 %v1311_v8  ;;  %1448 = vadd.xlane.f32.xlu0 %v1447_v13  ;;  %v1399_v8 = vmul.f32 %v6232_v24, %v6232_v24  ;;  %v1338_v13 = vmul.f32 0.03125, %v1277_v44  ;;  %v1400_v41 = vmul.f32 %v6246_v42, %v6246_v42  ;;  %v1340_v44 = vmul.f32 0.03125, %v1283_v29 }
 0x297   : > { %v1401_v53 = vmul.f32 %v6255_v12, %v6255_v12 }
 0x298   : > { %v6263_v2 = vsub.f32 %v6030_v23, %v1338_v13  ;;  %v1462_v57 = vsel %vm1223_vm4, %v1400_v41, 0.0  ;;  %v6272_v32 = vsub.f32 %v6028_v21, %v1340_v44 }
 0x29a   : > { %1451 = vadd.xlane.f32.xlu1 %v1450_v54  ;;  %1315 = vadd.xlane.f32.xlu0 %v1314_v43  ;;  %v1456_v54 = vsel %vm1223_vm4, %v1398_v1, 0.0  ;;  %v1459_v43 = vsel %vm1223_vm4, %v1399_v8, 0.0  ;;  %v1402_v1 = vmul.f32 %v6263_v2, %v6263_v2  ;;  %v1403_v8 = vmul.f32 %v6266_v49, %v6266_v49 }
 0x29b   : > { %v1404_v41 = vmul.f32 %v6272_v32, %v6272_v32 }
 0x29c   : > { %v1468_v13 = vsel %vm1223_vm4, %v1402_v1, 0.0  ;;  %v1471_v38 = vsel %vm1223_vm4, %v1403_v8, 0.0 }
 0x29e   : > { %1318 = vadd.xlane.f32.xlu1 %v1317_v0  ;;  %1454 = vadd.xlane.f32.xlu0 %v1453_v40  ;;  %v1465_v0 = vsel %vm1223_vm4, %v1401_v53, 0.0  ;;  %v1474_v40 = vsel %vm1223_vm4, %v1404_v41, 0.0 }
 0x2a2   : > { %1457 = vadd.xlane.f32.xlu1 %v1456_v54  ;;  %1460 = vadd.xlane.f32.xlu0 %v1459_v43 }
 0x2a6   : > { %1463 = vadd.xlane.f32.xlu1 %v1462_v57  ;;  %1466 = vadd.xlane.f32.xlu0 %v1465_v0 }
 0x2aa   : > { %1469 = vadd.xlane.f32.xlu1 %v1468_v13  ;;  %1472 = vadd.xlane.f32.xlu0 %v1471_v38 }
 0x2ae   : > { %1475 = vadd.xlane.f32.xlu1 %v1474_v40 }
 0x2fb   : > { %v1419_v29 = vpop.xlane.xlu0 %1418 }
 0x2fc   : > { %v1513_v54 = vmul.f32 0.03125, %v1419_v29 }
 0x2fe   : > { %v1545_v43 = vadd.f32 1e-05, %v1513_v54 }
 0x2ff   : > { %v1422_v44 = vpop.xlane.xlu1 %1421  ;;  %v1286_v53 = vpop.xlane.xlu0 %1285 }
 0x300   : > { %5294 = vrsqrt.f32 %v1545_v43  ;;  %v1514_v57 = vmul.f32 0.03125, %v1422_v44  ;;  %v1341_v0 = vmul.f32 0.03125, %v1286_v53 }
 0x302   : > { %v1546_v21 = vadd.f32 1e-05, %v1514_v57  ;;  %v6285_v1 = vsub.f32 %v6062_v58, %v1341_v0 }
 0x303   : > { %v1289_v8 = vpop.xlane.xlu1 %1288  ;;  %v1425_v15 = vpop.xlane.xlu0 %1424 }
 0x304   : > { %5296 = vrsqrt.f32 %v1546_v21  ;;  %v1342_v13 = vmul.f32 0.03125, %v1289_v8  ;;  %v1515_v38 = vmul.f32 0.03125, %v1425_v15  ;;  %v1405_v41 = vmul.f32 %v6285_v1, %v6285_v1 }
 0x306   : > { %v6290_v40 = vsub.f32 %v6076_v6, %v1342_v13  ;;  %v1547_v29 = vadd.f32 1e-05, %v1515_v38  ;;  %v1477_v54 = vsel %vm1223_vm4, %v1405_v41, 0.0 }
 0x307   : > { %v1428_v43 = vpop.xlane.xlu1 %1427  ;;  %1478 = vadd.xlane.f32.xlu0 %v1477_v54  ;;  %v1292_v44 = vpop.xlane.xlu0 %1291 }
 0x308   : > { %5298 = vrsqrt.f32 %v1547_v29  ;;  %v1516_v53 = vmul.f32 0.03125, %v1428_v43  ;;  %v1343_v57 = vmul.f32 0.03125, %v1292_v44  ;;  %v1406_v21 = vmul.f32 %v6290_v40, %v6290_v40  ;;  %v6303_v29 = vld [vmem:[%s7991_s5] ss:$0 sm:$0xff] }
 0x30a   : > { %v5295_v0 = vpop.eup %5294  ;;  %v1548_v15 = vadd.f32 1e-05, %v1516_v53  ;;  %v6296_v8 = vsub.f32 %v6089_v18, %v1343_v57  ;;  %v1480_v13 = vsel %vm1223_vm4, %v1406_v21, 0.0 }
 0x30b   : > { %v1609_v38 = vmul.f32 %v5295_v0, %v6055_v52  ;;  %1481 = vadd.xlane.f32.xlu1 %v1480_v13  ;;  %v1295_v41 = vpop.xlane.xlu1 %1294  ;;  %v1431_v6 = vpop.xlane.xlu0 %1430 }
 0x30c   : > { %5300 = vrsqrt.f32 %v1548_v15  ;;  %v1344_v54 = vmul.f32 0.03125, %v1295_v41  ;;  %v1517_v43 = vmul.f32 0.03125, %v1431_v6  ;;  %v1407_v44 = vmul.f32 %v6296_v8, %v6296_v8  ;;  %v6316_v6 = vld [vmem:[%s7992_s6] ss:$0 sm:$0xff] }
 0x30d   : > { %v1648_v0 = vmul.f32 %v6303_v29, %v1609_v38 }
 0x30e   : > { %v5297_v53 = vpop.eup %5296  ;;  %v6308_v57 = vsub.f32 %v6102_v28, %v1344_v54  ;;  %v1549_v21 = vadd.f32 1e-05, %v1517_v43  ;;  %v1483_v52 = vsel %vm1223_vm4, %v1407_v44, 0.0 }
 0x30f   : > { %v1610_v13 = vmul.f32 %v5297_v53, %v6068_v61  ;;  %v1434_v18 = vpop.xlane.xlu1 %1433  ;;  %1484 = vadd.xlane.f32.xlu0 %v1483_v52  ;;  %v1298_v58 = vpop.xlane.xlu0 %1297  ;;  %v1687_v52 = vadd.f32 %v6316_v6, %v1648_v0 }
 0x310   : > { %5302 = vrsqrt.f32 %v1549_v21  ;;  %v1518_v15 = vmul.f32 0.03125, %v1434_v18  ;;  %v1345_v41 = vmul.f32 0.03125, %v1298_v58  ;;  %v1408_v54 = vmul.f32 %v6308_v57, %v6308_v57 }
 0x311   : > { %v1649_v43 = vmul.f32 %v6303_v29, %v1610_v13 }
 0x312   : > { %v5299_v44 = vpop.eup %5298  ;;  %v1550_v38 = vadd.f32 1e-05, %v1518_v15  ;;  %v6322_v61 = vsub.f32 %v6115_v56, %v1345_v41  ;;  %v1486_v53 = vsel %vm1223_vm4, %v1408_v54, 0.0 }
 0x313   : > { %v1688_v28 = vadd.f32 %v6316_v6, %v1649_v43  ;;  %1487 = vadd.xlane.f32.xlu1 %v1486_v53  ;;  %v1301_v21 = vpop.xlane.xlu1 %1300  ;;  %v1437_v18 = vpop.xlane.xlu0 %1436  ;;  %v1611_v58 = vmul.f32 %v5299_v44, %v6065_v59 }
 0x314   : > { %5304 = vrsqrt.f32 %v1550_v38  ;;  %v1346_v23 = vmul.f32 0.03125, %v1301_v21  ;;  %v1519_v17 = vmul.f32 0.03125, %v1437_v18  ;;  %v1409_v13 = vmul.f32 %v6322_v61, %v6322_v61 }
 0x315   : > { %v1719_v15 = vpack.c.bf16 %v1688_v28, %v1687_v52  ;;  %v1650_v38 = vmul.f32 %v6303_v29, %v1611_v58 }
 0x316   : > { %v5301_v41 = vpop.eup %5300  ;;  %v6331_v56 = vsub.f32 %v6129_v7, %v1346_v23  ;;  %v1551_v54 = vadd.f32 1e-05, %v1519_v17  ;;  %v1489_v0 = vsel %vm1223_vm4, %v1409_v13, 0.0  ;;  %v8108_v17 = vmov 0  }
 0x317   : > { %v1440_v43 = vpop.xlane.xlu1 %1439  ;;  %4711 = vmatmul.mubr.msk.bf16.vlgmr.msra.gmra.mrb[20].mxu1 %vm1223_vm4, %v1719_v15  ;;  %5115 = vmatprep.mubr.msk.bf16.mxu0 %vm1223_vm4, %v1719_v15  ;;  %v1304_v59 = vpop.xlane.xlu0 %1303  ;;  %v1612_v44 = vmul.f32 %v5301_v41, %v6084_v9  ;;  %v1689_v41 = vadd.f32 %v6316_v6, %v1650_v38 }
 0x318   : > { %5306 = vrsqrt.f32 %v1551_v54  ;;  %v1520_v53 = vmul.f32 0.03125, %v1440_v43  ;;  %1490 = vadd.xlane.f32.xlu0 %v1489_v0  ;;  %v1347_v28 = vmul.f32 0.03125, %v1304_v59  ;;  %v1410_v23 = vmul.f32 %v6331_v56, %v6331_v56  ;;  %1882 = vmatprep.mubr.bf16.mxu1 %v8108_v17 }
 0x319   : > { %v1651_v52 = vmul.f32 %v6303_v29, %v1612_v44 }
 0x31a   : > { %v5303_v21 = vpop.eup %5302  ;;  %v1552_v18 = vadd.f32 1e-05, %v1520_v53  ;;  %v6343_v13 = vsub.f32 %v6143_v39, %v1347_v28  ;;  %v1492_v9 = vsel %vm1223_vm4, %v1410_v23, 0.0 }
 0x31b   : > { %1493 = vadd.xlane.f32.xlu1 %v1492_v9  ;;  %v1307_v58 = vpop.xlane.xlu1 %1306  ;;  %v1443_v15 = vpop.xlane.xlu0 %1442  ;;  %v1690_v54 = vadd.f32 %v6316_v6, %v1651_v52  ;;  %v1613_v0 = vmul.f32 %v5303_v21, %v6097_v25 }
 0x31c   : > { %5308 = vrsqrt.f32 %v1552_v18  ;;  %v1348_v43 = vmul.f32 0.03125, %v1307_v58  ;;  %v1521_v59 = vmul.f32 0.03125, %v1443_v15  ;;  %v1411_v44 = vmul.f32 %v6343_v13, %v6343_v13 }
 0x31d   : > { %v1720_v53 = vpack.c.bf16 %v1690_v54, %v1689_v41  ;;  %v1652_v52 = vmul.f32 %v6303_v29, %v1613_v0 }
 0x31e   : > { %v5305_v28 = vpop.eup %5304  ;;  %v6352_v39 = vsub.f32 %v6157_v36, %v1348_v43  ;;  %v1553_v23 = vadd.f32 1e-05, %v1521_v59  ;;  %v1495_v9 = vsel %vm1223_vm4, %v1411_v44, 0.0 }
 0x31f   : > { %v1446_v7 = vpop.xlane.xlu1 %1445  ;;  %4712 = vmatmul.mubr.msk.bf16.gmra.mrb[24].mxu1 %vm1223_vm4, %v1720_v53  ;;  %5116 = vmatmul.mubr.msk.bf16.vlgmr.msra.gmra.mrb[44].mxu0 %vm1223_vm4, %v1720_v53  ;;  %v1310_v25 = vpop.xlane.xlu0 %1309  ;;  %v1614_v38 = vmul.f32 %v5305_v28, %v6107_v45 }
 0x320   : > { %5310 = vrsqrt.f32 %v1553_v23  ;;  %v1522_v21 = vmul.f32 0.03125, %v1446_v7  ;;  %1496 = vadd.xlane.f32.xlu0 %v1495_v9  ;;  %v1349_v18 = vmul.f32 0.03125, %v1310_v25  ;;  %v1412_v58 = vmul.f32 %v6352_v39, %v6352_v39  ;;  %1892 = vmatprep.mubr.bf16.mxu1 %v8108_v17 }
 0x321   : > { %v1653_v15 = vmul.f32 %v6303_v29, %v1614_v38  ;;  %v1691_v7 = vadd.f32 %v6316_v6, %v1652_v52 }
 0x322   : > { %v5307_v41 = vpop.eup %5306  ;;  %v1554_v54 = vadd.f32 1e-05, %v1522_v21  ;;  %v6364_v43 = vsub.f32 %v6171_v4, %v1349_v18  ;;  %v1498_v45 = vsel %vm1223_vm4, %v1412_v58, 0.0 }
 0x323   : > { %1499 = vadd.xlane.f32.xlu1 %v1498_v45  ;;  %v1313_v0 = vpop.xlane.xlu1 %1312  ;;  %v1449_v59 = vpop.xlane.xlu0 %1448  ;;  %v1692_v44 = vadd.f32 %v6316_v6, %v1653_v15  ;;  %v1615_v53 = vmul.f32 %v5307_v41, %v6120_v60 }
 0x324   : > { %5312 = vrsqrt.f32 %v1554_v54  ;;  %v1350_v28 = vmul.f32 0.03125, %v1313_v0  ;;  %v1523_v23 = vmul.f32 0.03125, %v1449_v59  ;;  %v1413_v9 = vmul.f32 %v6364_v43, %v6364_v43 }
 0x325   : > { %v1721_v25 = vpack.c.bf16 %v1692_v44, %v1691_v7  ;;  %v1654_v15 = vmul.f32 %v6303_v29, %v1615_v53 }
 0x326   : > { %v5309_v38 = vpop.eup %5308  ;;  %v6373_v21 = vsub.f32 %v6191_v26, %v1350_v28  ;;  %v1555_v18 = vadd.f32 1e-05, %v1523_v23  ;;  %v1501_v58 = vsel %vm1223_vm4, %v1413_v9, 0.0 }
 0x327   : > { %v1452_v45 = vpop.xlane.xlu1 %1451  ;;  %4713 = vmatmul.mubr.msk.bf16.gmra.mrb[28].mxu1 %vm1223_vm4, %v1721_v25  ;;  %5119 = vmatprep.mubr.msk.bf16.mxu0 %vm1223_vm4, %v1721_v25  ;;  %v1316_v60 = vpop.xlane.xlu0 %1315  ;;  %v1616_v52 = vmul.f32 %v5309_v38, %v6134_v10  ;;  %v1693_v9 = vadd.f32 %v6316_v6, %v1654_v15 }
 0x328   : > { %5314 = vrsqrt.f32 %v1555_v18  ;;  %v1524_v41 = vmul.f32 0.03125, %v1452_v45  ;;  %1502 = vadd.xlane.f32.xlu0 %v1501_v58  ;;  %v1351_v54 = vmul.f32 0.03125, %v1316_v60  ;;  %v1414_v0 = vmul.f32 %v6373_v21, %v6373_v21  ;;  %1902 = vmatprep.mubr.bf16.mxu1 %v8108_v17 }
 0x329   : > { %v1655_v59 = vmul.f32 %v6303_v29, %v1616_v52 }
 0x32a   : > { %v5311_v7 = vpop.eup %5310  ;;  %v1556_v44 = vadd.f32 1e-05, %v1524_v41  ;;  %v6385_v28 = vsub.f32 %v6211_v5, %v1351_v54  ;;  %v1504_v10 = vsel %vm1223_vm4, %v1414_v0, 0.0 }
 0x32b   : > { %1505 = vadd.xlane.f32.xlu1 %v1504_v10  ;;  %v1319_v53 = vpop.xlane.xlu1 %1318  ;;  %v1455_v23 = vpop.xlane.xlu0 %1454  ;;  %v1694_v25 = vadd.f32 %v6316_v6, %v1655_v59  ;;  %v1617_v38 = vmul.f32 %v5311_v7, %v6148_v27 }
 0x32c   : > { %5316 = vrsqrt.f32 %v1556_v44  ;;  %v1352_v18 = vmul.f32 0.03125, %v1319_v53  ;;  %v1525_v58 = vmul.f32 0.03125, %v1455_v23  ;;  %v1415_v45 = vmul.f32 %v6385_v28, %v6385_v28 }
 0x32d   : > { %v1722_v60 = vpack.c.bf16 %v1694_v25, %v1693_v9  ;;  %v1656_v59 = vmul.f32 %v6303_v29, %v1617_v38 }
 0x32e   : > { %v5313_v52 = vpop.eup %5312  ;;  %v6394_v41 = vsub.f32 %v6235_v48, %v1352_v18  ;;  %v1557_v54 = vadd.f32 1e-05, %v1525_v58  ;;  %v1507_v0 = vsel %vm1223_vm4, %v1415_v45, 0.0 }
 0x32f   : > { %v1458_v10 = vpop.xlane.xlu1 %1457  ;;  %4714 = vmatmul.mubr.msk.bf16.gmra.mrb[32].mxu1 %vm1223_vm4, %v1722_v60  ;;  %5120 = vmatmul.mubr.msk.bf16.gmra.mrb[48].mxu0 %vm1223_vm4, %v1722_v60  ;;  %v1461_v27 = vpop.xlane.xlu0 %1460  ;;  %v1618_v15 = vmul.f32 %v5313_v52, %v6162_v55  ;;  %v1695_v38 = vadd.f32 %v6316_v6, %v1656_v59 }
 0x330   : > { %5318 = vrsqrt.f32 %v1557_v54  ;;  %v1526_v7 = vmul.f32 0.03125, %v1458_v10  ;;  %1508 = vadd.xlane.f32.xlu0 %v1507_v0  ;;  %v1527_v44 = vmul.f32 0.03125, %v1461_v27  ;;  %v1416_v53 = vmul.f32 %v6394_v41, %v6394_v41  ;;  %1912 = vmatprep.mubr.bf16.mxu1 %v8108_v17 }
 0x331   : > { %v1657_v23 = vmul.f32 %v6303_v29, %v1618_v15 }
 0x332   : > { %v5315_v9 = vpop.eup %5314  ;;  %v1558_v25 = vadd.f32 1e-05, %v1526_v7  ;;  %v1559_v18 = vadd.f32 1e-05, %v1527_v44  ;;  %v1510_v58 = vsel %vm1223_vm4, %v1416_v53, 0.0 }
 0x333   : > { %1511 = vadd.xlane.f32.xlu1 %v1510_v58  ;;  %v1464_v55 = vpop.xlane.xlu1 %1463  ;;  %v1467_v45 = vpop.xlane.xlu0 %1466  ;;  %v1696_v60 = vadd.f32 %v6316_v6, %v1657_v23  ;;  %v1619_v52 = vmul.f32 %v5315_v9, %v6176_v37 }
 0x334   : > { %5320 = vrsqrt.f32 %v1558_v25  ;;  %v1528_v54 = vmul.f32 0.03125, %v1464_v55  ;;  %v1529_v0 = vmul.f32 0.03125, %v1467_v45 }
 0x335   : > { %5322 = vrsqrt.f32 %v1559_v18  ;;  %v1723_v10 = vpack.c.bf16 %v1696_v60, %v1695_v38  ;;  %v1658_v23 = vmul.f32 %v6303_v29, %v1619_v52 }
 0x336   : > { %v5317_v27 = vpop.eup %5316  ;;  %v1560_v15 = vadd.f32 1e-05, %v1528_v54  ;;  %v1561_v7 = vadd.f32 1e-05, %v1529_v0 }
 0x337   : > { %v1470_v44 = vpop.xlane.xlu1 %1469  ;;  %4715 = vmatmul.mubr.msk.bf16.gmra.mrb[36].mxu1 %vm1223_vm4, %v1723_v10  ;;  %5123 = vmatprep.mubr.msk.bf16.mxu0 %vm1223_vm4, %v1723_v10  ;;  %v1473_v53 = vpop.xlane.xlu0 %1472  ;;  %v1620_v59 = vmul.f32 %v5317_v27, %v6196_v33  ;;  %v1697_v38 = vadd.f32 %v6316_v6, %v1658_v23 }
 0x338   : > { %5324 = vrsqrt.f32 %v1560_v15  ;;  %v1530_v37 = vmul.f32 0.03125, %v1470_v44  ;;  %v1531_v9 = vmul.f32 0.03125, %v1473_v53  ;;  %1922 = vmatprep.mubr.bf16.mxu1 %v8108_v17 }
 0x339   : > { %5326 = vrsqrt.f32 %v1561_v7  ;;  %v1659_v25 = vmul.f32 %v6303_v29, %v1620_v59 }
 0x33a   : > { %v5319_v18 = vpop.eup %5318  ;;  %v1562_v58 = vadd.f32 1e-05, %v1530_v37  ;;  %v1563_v55 = vadd.f32 1e-05, %v1531_v9 }
 0x33b   : > { %v1476_v45 = vpop.xlane.xlu1 %1475  ;;  %v1698_v60 = vadd.f32 %v6316_v6, %v1659_v25  ;;  %v1621_v33 = vmul.f32 %v5319_v18, %v6216_v22 }
 0x33c   : > { %5328 = vrsqrt.f32 %v1562_v58  ;;  %v1532_v52 = vmul.f32 0.03125, %v1476_v45 }
 0x33d   : > { %5330 = vrsqrt.f32 %v1563_v55  ;;  %v1724_v54 = vpack.c.bf16 %v1698_v60, %v1697_v38  ;;  %v1660_v7 = vmul.f32 %v6303_v29, %v1621_v33 }
 0x33e   : > { %v5321_v0 = vpop.eup %5320  ;;  %v1564_v10 = vadd.f32 1e-05, %v1532_v52 }
 0x33f   : > { %v5323_v27 = vpop.eup %5322  ;;  %4716 = vmatmul.mubr.msk.bf16.gmra.mrb[40].mxu1 %vm1223_vm4, %v1724_v54  ;;  %5124 = vmatmul.mubr.msk.bf16.gmra.mrb[52].mxu0 %vm1223_vm4, %v1724_v54  ;;  %v1622_v15 = vmul.f32 %v5321_v0, %v6229_v20  ;;  %v1699_v37 = vadd.f32 %v6316_v6, %v1660_v7 }
 0x340   : > { %5332 = vrsqrt.f32 %v1564_v10  ;;  %1932 = vmatprep.mubr.bf16.mxu1 %v8108_v17  ;;  %v1623_v22 = vmul.f32 %v5323_v27, %v6232_v24 }
 0x341   : > { %v1661_v44 = vmul.f32 %v6303_v29, %v1622_v15 }
 0x342   : > { %v5325_v53 = vpop.eup %5324  ;;  %v1662_v59 = vmul.f32 %v6303_v29, %v1623_v22 }
 0x343   : > { %v5327_v23 = vpop.eup %5326  ;;  %v1700_v9 = vadd.f32 %v6316_v6, %v1661_v44  ;;  %v1624_v25 = vmul.f32 %v5325_v53, %v6246_v42 }
 0x344   : > { %v1625_v20 = vmul.f32 %v5327_v23, %v6255_v12  ;;  %v1701_v24 = vadd.f32 %v6316_v6, %v1662_v59  ;;  %v6461_v59 = vld [vmem:[%s7994_s8] sm:$0x7] }
 0x345   : > { %v1725_v18 = vpack.c.bf16 %v1700_v9, %v1699_v37  ;;  %v1663_v58 = vmul.f32 %v6303_v29, %v1624_v25 }
 0x346   : > { %v5329_v55 = vpop.eup %5328  ;;  %v1664_v33 = vmul.f32 %v6303_v29, %v1625_v20 }
 0x347   : > { %v5331_v45 = vpop.eup %5330  ;;  %4717 = vmatmul.mubr.msk.bf16.gmra.mrb[44].mxu1 %vm1223_vm4, %v1725_v18  ;;  %5127 = vmatprep.mubr.msk.bf16.mxu0 %vm1223_vm4, %v1725_v18  ;;  %v1702_v38 = vadd.f32 %v6316_v6, %v1663_v58  ;;  %v1626_v60 = vmul.f32 %v5329_v55, %v6263_v2 }
 0x348   : > { %1942 = vmatprep.mubr.bf16.mxu1 %v8108_v17  ;;  %v1627_v42 = vmul.f32 %v5331_v45, %v6266_v49  ;;  %v1703_v0 = vadd.f32 %v6316_v6, %v1664_v33 }
 0x349   : > { %v1726_v12 = vpack.c.bf16 %v1702_v38, %v1701_v24  ;;  %v1665_v52 = vmul.f32 %v6303_v29, %v1626_v60 }
 0x34a   : > { %v5333_v54 = vpop.eup %5332  ;;  %v1666_v2 = vmul.f32 %v6303_v29, %v1627_v42 }
 0x34b   : > { %5128 = vmatmul.mubr.msk.bf16.gmra.mrb[56].mxu0 %vm1223_vm4, %v1726_v12  ;;  %v1704_v10 = vadd.f32 %v6316_v6, %v1665_v52  ;;  %v1628_v27 = vmul.f32 %v5333_v54, %v6272_v32  ;;  %v1745_v32 = vlaneseq }
 0x34c   : > { %v1705_v49 = vadd.f32 %v6316_v6, %v1666_v2 }
 0x34d   : > { %v1727_v15 = vpack.c.bf16 %v1704_v10, %v1703_v0  ;;  %v1667_v7 = vmul.f32 %v6303_v29, %v1628_v27  ;;  %v6456_v53 = vshrl.u32 %v1745_v32, 7 }
 0x34f   : > { %4718 = vmatmul.mubr.msk.bf16.gmra.mrb[48].mxu1 %vm1223_vm4, %v1726_v12  ;;  %5131 = vmatprep.mubr.msk.bf16.mxu0 %vm1223_vm4, %v1727_v15  ;;  %v1706_v22 = vadd.f32 %v6316_v6, %v1667_v7  ;;  %v1751_v23 = vsub.s32 1, %v6456_v53 }
 0x350   : > { %1952 = vmatprep.mubr.bf16.mxu1 %v8108_v17 }
 0x351   : > { %v1728_v44 = vpack.c.bf16 %v1706_v22, %v1705_v49  ;;  %v6465_v37 = vrot.slane %v6461_v59, %v1751_v23 }
 0x353   : > { %5132 = vmatmul.mubr.msk.bf16.gmra.mrb[60].mxu0 %vm1223_vm4, %v1728_v44 }
 0x357   : > { %4719 = vmatmul.mubr.msk.bf16.gmra.mrb[52].mxu1 %vm1223_vm4, %v1727_v15 }
 0x358   : > { %1962 = vmatprep.mubr.bf16.mxu1 %v8108_v17 }
 0x35f   : > { %4720 = vmatmul.mubr.msk.bf16.gmra.mrb[56].mxu1 %vm1223_vm4, %v1728_v44 }
 0x360   : > { %1972 = vmatprep.mubr.bf16.mxu1 %v8108_v17 }
 0x394   : > { %v1479_v9 = vpop.xlane.xlu0 %1478 }
 0x395   : > { %v1533_v25 = vmul.f32 0.03125, %v1479_v9 }
 0x397   : > { %v1565_v20 = vadd.f32 1e-05, %v1533_v25 }
 0x398   : > { %v1482_v18 = vpop.xlane.xlu1 %1481 }
 0x399   : > { %5334 = vrsqrt.f32 %v1565_v20  ;;  %v1534_v58 = vmul.f32 0.03125, %v1482_v18 }
 0x39b   : > { %v1566_v55 = vadd.f32 1e-05, %v1534_v58 }
 0x39c   : > { %v1485_v24 = vpop.xlane.xlu0 %1484 }
 0x39d   : > { %5336 = vrsqrt.f32 %v1566_v55  ;;  %v1535_v45 = vmul.f32 0.03125, %v1485_v24 }
 0x39f   : > { %v1567_v38 = vadd.f32 1e-05, %v1535_v45 }
 0x3a0   : > { %v1488_v60 = vpop.xlane.xlu1 %1487 }
 0x3a1   : > { %5338 = vrsqrt.f32 %v1567_v38  ;;  %v1536_v33 = vmul.f32 0.03125, %v1488_v60 }
 0x3a3   : > { %v5335_v42 = vpop.eup %5334  ;;  %v1568_v12 = vadd.f32 1e-05, %v1536_v33 }
 0x3a4   : > { %v1629_v52 = vmul.f32 %v5335_v42, %v6285_v1 }
 0x3a5   : > { %5340 = vrsqrt.f32 %v1568_v12  ;;  %v1491_v54 = vpop.xlane.xlu0 %1490 }
 0x3a6   : > { %v1537_v0 = vmul.f32 0.03125, %v1491_v54  ;;  %v1668_v7 = vmul.f32 %v6303_v29, %v1629_v52 }
 0x3a7   : > { %v5337_v10 = vpop.eup %5336 }
 0x3a8   : > { %v1569_v27 = vadd.f32 1e-05, %v1537_v0  ;;  %v1494_v2 = vpop.xlane.xlu1 %1493  ;;  %v1630_v15 = vmul.f32 %v5337_v10, %v6290_v40  ;;  %v1707_v23 = vadd.f32 %v6316_v6, %v1668_v7 }
 0x3a9   : > { %v1538_v49 = vmul.f32 0.03125, %v1494_v2 }
 0x3aa   : > { %5342 = vrsqrt.f32 %v1569_v27  ;;  %v1669_v22 = vmul.f32 %v6303_v29, %v1630_v15 }
 0x3ab   : > { %v5339_v44 = vpop.eup %5338  ;;  %v1570_v32 = vadd.f32 1e-05, %v1538_v49 }
 0x3ac   : > { %v1708_v1 = vadd.f32 %v6316_v6, %v1669_v22  ;;  %v1631_v9 = vmul.f32 %v5339_v44, %v6296_v8 }
 0x3ad   : > { %5344 = vrsqrt.f32 %v1570_v32  ;;  %v1497_v25 = vpop.xlane.xlu0 %1496 }
 0x3ae   : > { %v1539_v20 = vmul.f32 0.03125, %v1497_v25  ;;  %v1729_v18 = vpack.c.bf16 %v1708_v1, %v1707_v23  ;;  %v1670_v45 = vmul.f32 %v6303_v29, %v1631_v9 }
 0x3af   : > { %v5341_v58 = vpop.eup %5340 }
 0x3b0   : > { %v1571_v40 = vadd.f32 1e-05, %v1539_v20  ;;  %v1500_v55 = vpop.xlane.xlu1 %1499  ;;  %4721 = vmatmul.mubr.msk.bf16.gmra.mrb[60].mxu1 %vm1223_vm4, %v1729_v18  ;;  %5135 = vmatprep.mubr.msk.bf16.mxu0 %vm1223_vm4, %v1729_v18  ;;  %v1632_v24 = vmul.f32 %v5341_v58, %v6308_v57  ;;  %v1709_v42 = vadd.f32 %v6316_v6, %v1670_v45 }
 0x3b1   : > { %v1540_v38 = vmul.f32 0.03125, %v1500_v55  ;;  %1982 = vmatprep.mubr.bf16.mxu1 %v8108_v17 }
 0x3b2   : > { %5346 = vrsqrt.f32 %v1571_v40  ;;  %v1671_v8 = vmul.f32 %v6303_v29, %v1632_v24 }
 0x3b3   : > { %v1572_v60 = vadd.f32 1e-05, %v1540_v38 }
 0x3b4   : > { %v5343_v33 = vpop.eup %5342  ;;  %v1710_v12 = vadd.f32 %v6316_v6, %v1671_v8 }
 0x3b5   : > { %5348 = vrsqrt.f32 %v1572_v60  ;;  %v1503_v52 = vpop.xlane.xlu0 %1502  ;;  %v1633_v54 = vmul.f32 %v5343_v33, %v6322_v61 }
 0x3b6   : > { %v1541_v0 = vmul.f32 0.03125, %v1503_v52  ;;  %v1730_v57 = vpack.c.bf16 %v1710_v12, %v1709_v42 }
 0x3b7   : > { %v5345_v10 = vpop.eup %5344  ;;  %v1672_v7 = vmul.f32 %v6303_v29, %v1633_v54 }
 0x3b8   : > { %v1573_v27 = vadd.f32 1e-05, %v1541_v0  ;;  %v1506_v2 = vpop.xlane.xlu1 %1505  ;;  %4722 = vmatmul.mubr.msk.bf16.gmra.mrb[64].mxu1 %vm1223_vm4, %v1730_v57  ;;  %5136 = vmatmul.mubr.msk.bf16.gmra.mrb[64].mxu0 %vm1223_vm4, %v1730_v57  ;;  %v1634_v15 = vmul.f32 %v5345_v10, %v6331_v56 }
 0x3b9   : > { %v1542_v49 = vmul.f32 0.03125, %v1506_v2  ;;  %1992 = vmatprep.mubr.bf16.mxu1 %v8108_v17  ;;  %v1711_v32 = vadd.f32 %v6316_v6, %v1672_v7 }
 0x3ba   : > { %5350 = vrsqrt.f32 %v1573_v27  ;;  %v1673_v22 = vmul.f32 %v6303_v29, %v1634_v15 }
 0x3bb   : > { %v1574_v61 = vadd.f32 1e-05, %v1542_v49 }
 0x3bc   : > { %v5347_v44 = vpop.eup %5346  ;;  %v1712_v23 = vadd.f32 %v6316_v6, %v1673_v22 }
 0x3bd   : > { %5352 = vrsqrt.f32 %v1574_v61  ;;  %v1509_v1 = vpop.xlane.xlu0 %1508  ;;  %v1635_v9 = vmul.f32 %v5347_v44, %v6343_v13 }
 0x3be   : > { %v1543_v25 = vmul.f32 0.03125, %v1509_v1  ;;  %v1731_v56 = vpack.c.bf16 %v1712_v23, %v1711_v32 }
 0x3bf   : > { %v5349_v20 = vpop.eup %5348  ;;  %v1674_v55 = vmul.f32 %v6303_v29, %v1635_v9 }
 0x3c0   : > { %v1575_v18 = vadd.f32 1e-05, %v1543_v25  ;;  %v1512_v58 = vpop.xlane.xlu1 %1511  ;;  %4723 = vmatmul.mubr.msk.bf16.gmra.mrb[68].mxu1 %vm1223_vm4, %v1731_v56  ;;  %5139 = vmatprep.mubr.msk.bf16.mxu0 %vm1223_vm4, %v1731_v56  ;;  %v1636_v40 = vmul.f32 %v5349_v20, %v6352_v39 }
 0x3c1   : > { %v1544_v24 = vmul.f32 0.03125, %v1512_v58  ;;  %2002 = vmatprep.mubr.bf16.mxu1 %v8108_v17  ;;  %v1713_v8 = vadd.f32 %v6316_v6, %v1674_v55 }
 0x3c2   : > { %5354 = vrsqrt.f32 %v1575_v18  ;;  %v1675_v45 = vmul.f32 %v6303_v29, %v1636_v40 }
 0x3c3   : > { %v1576_v13 = vadd.f32 1e-05, %v1544_v24 }
 0x3c4   : > { %v5351_v38 = vpop.eup %5350  ;;  %v1714_v60 = vadd.f32 %v6316_v6, %v1675_v45 }
 0x3c5   : > { %5356 = vrsqrt.f32 %v1576_v13  ;;  %v1637_v33 = vmul.f32 %v5351_v38, %v6364_v43 }
 0x3c6   : > { %v1732_v42 = vpack.c.bf16 %v1714_v60, %v1713_v8 }
 0x3c7   : > { %v5353_v12 = vpop.eup %5352  ;;  %v1676_v52 = vmul.f32 %v6303_v29, %v1637_v33 }
 0x3c8   : > { %4724 = vmatmul.mubr.msk.bf16.gmra.mrb[72].mxu1 %vm1223_vm4, %v1732_v42  ;;  %5140 = vmatmul.mubr.msk.bf16.gmra.mrb[68].mxu0 %vm1223_vm4, %v1732_v42  ;;  %v1638_v39 = vmul.f32 %v5353_v12, %v6373_v21 }
 0x3c9   : > { %2012 = vmatprep.mubr.bf16.mxu1 %v8108_v17  ;;  %v1715_v57 = vadd.f32 %v6316_v6, %v1676_v52 }
 0x3ca   : > { %v1677_v54 = vmul.f32 %v6303_v29, %v1638_v39 }
 0x3cc   : > { %v5355_v0 = vpop.eup %5354  ;;  %v1716_v10 = vadd.f32 %v6316_v6, %v1677_v54 }
 0x3cd   : > { %v1639_v43 = vmul.f32 %v5355_v0, %v6385_v28  ;;  %v1747_v28 = vsub.s32 0, %v6456_v53 }
 0x3ce   : > { %v1733_v27 = vpack.c.bf16 %v1716_v10, %v1715_v57 }
 0x3cf   : > { %v5357_v2 = vpop.eup %5356  ;;  %v1678_v15 = vmul.f32 %v6303_v29, %v1639_v43  ;;  %v6522_v44 = vrot.slane %v6461_v59, %v1747_v28 }
 0x3d0   : > { %4725 = vmatmul.mubr.msk.bf16.gmra.mrb[76].mxu1 %vm1223_vm4, %v1733_v27  ;;  %5143 = vmatprep.mubr.msk.bf16.mxu0 %vm1223_vm4, %v1733_v27  ;;  %v1640_v21 = vmul.f32 %v5357_v2, %v6394_v41 }
 0x3d1   : > { %2022 = vmatprep.mubr.bf16.mxu1 %v8108_v17  ;;  %v1717_v49 = vadd.f32 %v6316_v6, %v1678_v15 }
 0x3d2   : > { %v1679_v7 = vmul.f32 %v6303_v29, %v1640_v21 }
 0x3d4   : > { %v1718_v22 = vadd.f32 %v6316_v6, %v1679_v7  ;;  %v1755_v6 = vsub.s32 2, %v6456_v53 }
 0x3d6   : > { %v1734_v61 = vpack.c.bf16 %v1718_v22, %v1717_v49  ;;  %v6539_v18 = vrot.slane %v6461_v59, %v1755_v6 }
 0x3d8   : > { %4726 = vmatmul.mubr.msk.bf16.gmra.mrb[80].mxu1 %vm1223_vm4, %v1734_v61  ;;  %5144 = vmatmul.mubr.msk.bf16.gmra.mrb[72].mxu0 %vm1223_vm4, %v1734_v61 }
 0x3ea   : > { %v1874_v41 = vpop.f32.mrb[20].mxu1 }
 0x3eb   : > { %v1876_v32 = vpop.f32.mrb[21].mxu1  ;;  %v1875_v17 = vadd.f32 %v1874_v41, %v6522_v44 }
 0x3ec   : > { %v1878_v23 = vpop.f32.mrb[22].mxu1  ;;  %v6528_v9 = vadd.f32 %v1876_v32, %v6465_v37 }
 0x3ed   : > { %v1879_v29 = vadd.f32 %v1878_v23, %v6522_v44  ;;  %v1880_v1 = vpop.f32.mrb[23].mxu1 }
 0x3ee   : > { %v6531_v25 = vadd.f32 %v1880_v1, %v6465_v37 }
 0x3ef   : > { %v6533_v56 = vpack.c.bf16 %v1879_v29, %v1875_v17 }
 0x3f1   : > { %4850 = vmatprep.mubr.bf16.mxu0 %v6533_v56 }
 0x3f2   : > { %v1884_v58 = vpop.f32.mrb[24].mxu1  ;;  %v5117_v40 = vpop.f32.mrb[44].mxu0 }
 0x3f3   : > { %v1886_v55 = vpop.f32.mrb[25].mxu1  ;;  %v2067_v53 = vpop.f32.mrb[45].mxu0  ;;  %v1885_v13 = vadd.f32 %v1884_v58, %v6522_v44  ;;  %v6543_v38 = vadd.f32 %v5117_v40, %v6539_v18 }
 0x3f4   : > { %v1888_v24 = vpop.f32.mrb[26].mxu1  ;;  %v5118_v45 = vpop.f32.mrb[46].mxu0  ;;  %v6550_v59 = vadd.f32 %v1886_v55, %v6465_v37  ;;  %v6553_v12 = vadd.f32 %v2067_v53, %v6539_v18 }
 0x3f5   : > { %v1889_v8 = vadd.f32 %v1888_v24, %v6522_v44  ;;  %v6547_v60 = vadd.f32 %v5118_v45, %v6539_v18  ;;  %v1890_v33 = vpop.f32.mrb[27].mxu1  ;;  %v2070_v42 = vpop.f32.mrb[47].mxu0 }
 0x3f6   : > { %v6556_v39 = vadd.f32 %v1890_v33, %v6465_v37  ;;  %v6559_v52 = vadd.f32 %v2070_v42, %v6539_v18 }
 0x3f7   : > { %v6561_v54 = vpack.c.bf16 %v1889_v8, %v1885_v13 }
 0x3fa   : > { %v1894_v43 = vpop.f32.mrb[28].mxu1 }
 0x3fb   : > { %v1896_v27 = vpop.f32.mrb[29].mxu1  ;;  %v1895_v21 = vadd.f32 %v1894_v43, %v6522_v44 }
 0x3fc   : > { %v1898_v2 = vpop.f32.mrb[30].mxu1  ;;  %v6572_v49 = vadd.f32 %v1896_v27, %v6465_v37 }
 0x3fd   : > { %v1899_v15 = vadd.f32 %v1898_v2, %v6522_v44  ;;  %v1900_v7 = vpop.f32.mrb[31].mxu1 }
 0x3fe   : > { %v6575_v22 = vadd.f32 %v1900_v7, %v6465_v37 }
 0x3ff   : > { %v6577_v61 = vpack.c.bf16 %v1899_v15, %v1895_v21 }
 0x402   : > { %v1904_v41 = vpop.f32.mrb[32].mxu1  ;;  %v5121_v32 = vpop.f32.mrb[48].mxu0 }
 0x403   : > { %v1906_v23 = vpop.f32.mrb[33].mxu1  ;;  %v2083_v17 = vpop.f32.mrb[49].mxu0  ;;  %v1905_v6 = vadd.f32 %v1904_v41, %v6522_v44  ;;  %v6583_v58 = vadd.f32 %v5121_v32, %v6539_v18 }
 0x404   : > { %v1908_v29 = vpop.f32.mrb[34].mxu1  ;;  %v5122_v1 = vpop.f32.mrb[50].mxu0  ;;  %v6590_v45 = vadd.f32 %v1906_v23, %v6465_v37  ;;  %v6593_v13 = vadd.f32 %v2083_v17, %v6539_v18 }
 0x405   : > { %v1909_v40 = vadd.f32 %v1908_v29, %v6522_v44  ;;  %v6587_v55 = vadd.f32 %v5122_v1, %v6539_v18  ;;  %v1910_v53 = vpop.f32.mrb[35].mxu1  ;;  %v2086_v24 = vpop.f32.mrb[51].mxu0 }
 0x406   : > { %v6596_v8 = vadd.f32 %v1910_v53, %v6465_v37  ;;  %v6599_v33 = vadd.f32 %v2086_v24, %v6539_v18 }
 0x407   : > { %v6601_v42 = vpack.c.bf16 %v1909_v40, %v1905_v6 }
 0x40a   : > { %v1914_v21 = vpop.f32.mrb[36].mxu1 }
 0x40b   : > { %v1916_v15 = vpop.f32.mrb[37].mxu1  ;;  %v1915_v41 = vadd.f32 %v1914_v21, %v6522_v44 }
 0x40c   : > { %v1918_v7 = vpop.f32.mrb[38].mxu1  ;;  %v6612_v17 = vadd.f32 %v1916_v15, %v6465_v37 }
 0x40d   : > { %v1919_v32 = vadd.f32 %v1918_v7, %v6522_v44  ;;  %v1920_v23 = vpop.f32.mrb[39].mxu1 }
 0x40e   : > { %v6615_v29 = vadd.f32 %v1920_v23, %v6465_v37 }
 0x40f   : > { %v6617_v1 = vpack.c.bf16 %v1919_v32, %v1915_v41 }
 0x412   : > { %v1924_v40 = vpop.f32.mrb[40].mxu1  ;;  %v5125_v53 = vpop.f32.mrb[52].mxu0 }
 0x413   : > { %v1926_v24 = vpop.f32.mrb[41].mxu1  ;;  %v2099_v43 = vpop.f32.mrb[53].mxu0  ;;  %v1925_v7 = vadd.f32 %v1924_v40, %v6522_v44  ;;  %v6623_v27 = vadd.f32 %v5125_v53, %v6539_v18 }
 0x414   : > { %v1928_v2 = vpop.f32.mrb[42].mxu1  ;;  %v5126_v21 = vpop.f32.mrb[54].mxu0  ;;  %v6630_v6 = vadd.f32 %v1926_v24, %v6465_v37  ;;  %v6633_v28 = vadd.f32 %v2099_v43, %v6539_v18 }
 0x415   : > { %v1929_v15 = vadd.f32 %v1928_v2, %v6522_v44  ;;  %v6627_v23 = vadd.f32 %v5126_v21, %v6539_v18  ;;  %v1930_v41 = vpop.f32.mrb[43].mxu1  ;;  %v2102_v32 = vpop.f32.mrb[55].mxu0 }
 0x416   : > { %v6636_v57 = vadd.f32 %v1930_v41, %v6465_v37  ;;  %v6639_v40 = vadd.f32 %v2102_v32, %v6539_v18 }
 0x417   : > { %v6641_v53 = vpack.c.bf16 %v1929_v15, %v1925_v7 }
 0x41a   : > { %v1934_v0 = vpop.f32.mrb[44].mxu1 }
 0x41b   : > { %v1936_v43 = vpop.f32.mrb[45].mxu1  ;;  %v1935_v41 = vadd.f32 %v1934_v0, %v6522_v44 }
 0x41c   : > { %v1938_v20 = vpop.f32.mrb[46].mxu1  ;;  %v6652_v7 = vadd.f32 %v1936_v43, %v6465_v37 }
 0x41d   : > { %v1939_v10 = vadd.f32 %v1938_v20, %v6522_v44  ;;  %v1940_v32 = vpop.f32.mrb[47].mxu1 }
 0x41e   : > { %v6655_v15 = vadd.f32 %v1940_v32, %v6465_v37  ;;  %v5129_v2 = vpop.f32.mrb[56].mxu0 }
 0x41f   : > { %v6657_v48 = vpack.c.bf16 %v1939_v10, %v1935_v41  ;;  %v2115_v21 = vpop.f32.mrb[57].mxu0  ;;  %v6662_v26 = vadd.f32 %v5129_v2, %v6539_v18 }
 0x420   : > { %v5130_v5 = vpop.f32.mrb[58].mxu0  ;;  %v6668_v43 = vadd.f32 %v2115_v21, %v6539_v18 }
 0x421   : > { %v6665_v20 = vadd.f32 %v5130_v5, %v6539_v18  ;;  %v2118_v0 = vpop.f32.mrb[59].mxu0 }
 0x422   : > { %v6671_v32 = vadd.f32 %v2118_v0, %v6539_v18  ;;  %v1944_v10 = vpop.f32.mrb[48].mxu1 }
 0x423   : > { %v1946_v4 = vpop.f32.mrb[49].mxu1  ;;  %v1945_v36 = vadd.f32 %v1944_v10, %v6522_v44 }
 0x424   : > { %v1948_v2 = vpop.f32.mrb[50].mxu1  ;;  %v6680_v21 = vadd.f32 %v1946_v4, %v6465_v37 }
 0x425   : > { %v1949_v5 = vadd.f32 %v1948_v2, %v6522_v44  ;;  %v1950_v62 = vpop.f32.mrb[51].mxu1 }
 0x426   : > { %v6683_v0 = vadd.f32 %v1950_v62, %v6465_v37  ;;  %v5133_v3 = vpop.f32.mrb[60].mxu0 }
 0x427   : > { %v6685_v63 = vpack.c.bf16 %v1949_v5, %v1945_v36  ;;  %v2131_v41 = vpop.f32.mrb[61].mxu0  ;;  %v2140_v46 = vadd.f32 %v5133_v3, %v6539_v18 }
 0x428   : > { %v5134_v24 = vpop.f32.mrb[62].mxu0  ;;  %v2132_v51 = vadd.f32 %v2131_v41, %v6539_v18  ;;  %v8109_v41 = vpack.c.bf16 %v6559_v52, %v6553_v12 }
 0x429   : > { %v2143_v10 = vadd.f32 %v5134_v24, %v6539_v18  ;;  %v2134_v2 = vpop.f32.mrb[63].mxu0 }
 0x42a   : > { %v2135_v4 = vadd.f32 %v2134_v2, %v6539_v18  ;;  %v1954_v47 = vpop.f32.mrb[52].mxu1 }
 0x42b   : > { %v2235_v62 = vpack.c.bf16 %v2143_v10, %v2140_v46  ;;  %v1956_v34 = vpop.f32.mrb[53].mxu1  ;;  %v1955_v5 = vadd.f32 %v1954_v47, %v6522_v44  ;;  %v8110_v47 = vpack.c.bf16 %v6531_v25, %v6528_v9  ;;  %v8112_v9 = vpack.c.bf16 %v6556_v39, %v6550_v59 }
 0x42c   : > { %v2234_v30 = vpack.c.bf16 %v2135_v4, %v2132_v51  ;;  %v1958_v36 = vpop.f32.mrb[54].mxu1  ;;  %v1957_v31 = vadd.f32 %v1956_v34, %v6465_v37  ;;  %v8111_v34 = vpack.c.bf16 %v6547_v60, %v6543_v38 }
 0x42d   : > { %v1959_v35 = vadd.f32 %v1958_v36, %v6522_v44  ;;  %v1960_v50 = vpop.f32.mrb[55].mxu1 }
 0x42e   : > { %v1961_v3 = vadd.f32 %v1960_v50, %v6465_v37  ;;  %4882 = vmatprep.subr.bf16.mxu1 %v2234_v30 }
 0x42f   : > { %v6697_v24 = vpack.c.bf16 %v1959_v35, %v1955_v5  ;;  %4883 = vmatpush3.bf16.msra.mxu1 %v8109_v41 }
 0x430   : > { %v2218_v46 = vpack.c.bf16 %v1961_v3, %v1957_v31  ;;  %4884 = vmatprep.subr.bf16.mxu1 %v2235_v62 }
 0x432   : > { %v1964_v51 = vpop.f32.mrb[56].mxu1  ;;  %4834 = vmatprep.subr.bf16.mxu0 %v2218_v46 }
 0x433   : > { %v1966_v10 = vpop.f32.mrb[57].mxu1  ;;  %4835 = vmatpush3.bf16.xpose.msra.mxu0 %v8110_v47  ;;  %4885 = vmatpush3.bf16.msra.mxu1 %v8111_v34  ;;  %v1965_v35 = vadd.f32 %v1964_v51, %v6522_v44  ;;  %v8113_v34 = vpack.c.bf16 %v6575_v22, %v6572_v49 }
 0x434   : > { %v1968_v30 = vpop.f32.mrb[58].mxu1  ;;  %v1967_v31 = vadd.f32 %v1966_v10, %v6465_v37 }
 0x435   : > { %v1969_v50 = vadd.f32 %v1968_v30, %v6522_v44  ;;  %v1970_v12 = vpop.f32.mrb[59].mxu1 }
 0x436   : > { %v1971_v52 = vadd.f32 %v1970_v12, %v6465_v37 }
 0x437   : > { %v6712_v2 = vpack.c.bf16 %v1969_v50, %v1965_v35 }
 0x438   : > { %v2219_v4 = vpack.c.bf16 %v1971_v52, %v1967_v31 }
 0x43a   : > { %4836 = vmatprep.subr.bf16.mxu0 %v2219_v4 }
 0x43b   : > { %4837 = vmatpush3.bf16.xpose.msra.mxu0 %v8112_v9 }
 0x483   : > { %v1974_v25 = vpop.f32.mrb[60].mxu1 }
 0x484   : > { %v1976_v38 = vpop.f32.mrb[61].mxu1  ;;  %v1975_v62 = vadd.f32 %v1974_v25, %v6522_v44 }
 0x485   : > { %v1978_v60 = vpop.f32.mrb[62].mxu1  ;;  %v1977_v3 = vadd.f32 %v1976_v38, %v6465_v37 }
 0x486   : > { %v1979_v36 = vadd.f32 %v1978_v60, %v6522_v44  ;;  %v1980_v5 = vpop.f32.mrb[63].mxu1 }
 0x487   : > { %v1981_v41 = vadd.f32 %v1980_v5, %v6465_v37 }
 0x488   : > { %v6721_v46 = vpack.c.bf16 %v1979_v36, %v1975_v62 }
 0x489   : > { %v2220_v51 = vpack.c.bf16 %v1981_v41, %v1977_v3 }
 0x48b   : > { %v1984_v10 = vpop.f32.mrb[64].mxu1  ;;  %v5137_v47 = vpop.f32.mrb[64].mxu0  ;;  %4838 = vmatprep.subr.bf16.mxu0 %v2220_v51  ;;  %v8114_v51 = vpack.c.bf16 %v6596_v8, %v6590_v45  ;;  %v8116_v45 = vpack.c.bf16 %v6587_v55, %v6583_v58 }
 0x48c   : > { %v1986_v59 = vpop.f32.mrb[65].mxu1  ;;  %v2147_v39 = vpop.f32.mrb[65].mxu0  ;;  %4839 = vmatpush3.bf16.xpose.msra.mxu0 %v8113_v34  ;;  %v1985_v50 = vadd.f32 %v1984_v10, %v6522_v44  ;;  %v2156_v12 = vadd.f32 %v5137_v47, %v6539_v18  ;;  %v8115_v10 = vpack.c.bf16 %v6599_v33, %v6593_v13 }
 0x48d   : > { %v1988_v30 = vpop.f32.mrb[66].mxu1  ;;  %v5138_v35 = vpop.f32.mrb[66].mxu0  ;;  %v1987_v25 = vadd.f32 %v1986_v59, %v6465_v37  ;;  %v2148_v38 = vadd.f32 %v2147_v39, %v6539_v18 }
 0x48e   : > { %v1989_v31 = vadd.f32 %v1988_v30, %v6522_v44  ;;  %v2159_v52 = vadd.f32 %v5138_v35, %v6539_v18  ;;  %v1990_v4 = vpop.f32.mrb[67].mxu1  ;;  %v2150_v9 = vpop.f32.mrb[67].mxu0 }
 0x48f   : > { %v1991_v60 = vadd.f32 %v1990_v4, %v6465_v37  ;;  %v2151_v49 = vadd.f32 %v2150_v9, %v6539_v18 }
 0x490   : > { %v6734_v22 = vpack.c.bf16 %v1989_v31, %v1985_v50  ;;  %v2237_v62 = vpack.c.bf16 %v2159_v52, %v2156_v12  ;;  %v8117_v52 = vpack.c.bf16 %v6615_v29, %v6612_v17 }
 0x491   : > { %v2221_v36 = vpack.c.bf16 %v1991_v60, %v1987_v25  ;;  %v2236_v5 = vpack.c.bf16 %v2151_v49, %v2148_v38 }
 0x493   : > { %v1994_v3 = vpop.f32.mrb[68].mxu1  ;;  %4840 = vmatprep.subr.bf16.mxu0 %v2221_v36  ;;  %4886 = vmatprep.subr.bf16.mxu1 %v2236_v5 }
 0x494   : > { %v1996_v41 = vpop.f32.mrb[69].mxu1  ;;  %4841 = vmatpush3.bf16.xpose.msra.mxu0 %v8114_v51  ;;  %4887 = vmatpush3.bf16.msra.mxu1 %v8115_v10  ;;  %v1995_v59 = vadd.f32 %v1994_v3, %v6522_v44 }
 0x495   : > { %v1998_v47 = vpop.f32.mrb[70].mxu1  ;;  %4888 = vmatprep.subr.bf16.mxu1 %v2237_v62  ;;  %v1997_v30 = vadd.f32 %v1996_v41, %v6465_v37 }
 0x496   : > { %v1999_v39 = vadd.f32 %v1998_v47, %v6522_v44  ;;  %v2000_v34 = vpop.f32.mrb[71].mxu1 }
 0x497   : > { %v2001_v35 = vadd.f32 %v2000_v34, %v6465_v37 }
 0x498   : > { %v6746_v50 = vpack.c.bf16 %v1999_v39, %v1995_v59  ;;  %4889 = vmatpush3.bf16.msra.mxu1 %v8116_v45  ;;  %v8118_v59 = vpack.c.bf16 %v6636_v57, %v6630_v6  ;;  %v8119_v39 = vpack.c.bf16 %v6639_v40, %v6633_v28  ;;  %v8120_v57 = vpack.c.bf16 %v6627_v23, %v6623_v27 }
 0x499   : > { %v2222_v8 = vpack.c.bf16 %v2001_v35, %v1997_v30 }
 0x49b   : > { %v2004_v13 = vpop.f32.mrb[72].mxu1  ;;  %v5141_v33 = vpop.f32.mrb[68].mxu0  ;;  %4842 = vmatprep.subr.bf16.mxu0 %v2222_v8 }
 0x49c   : > { %v2006_v12 = vpop.f32.mrb[73].mxu1  ;;  %v2163_v31 = vpop.f32.mrb[69].mxu0  ;;  %4843 = vmatpush3.bf16.xpose.msra.mxu0 %v8117_v52  ;;  %v2005_v25 = vadd.f32 %v2004_v13, %v6522_v44  ;;  %v2172_v38 = vadd.f32 %v5141_v33, %v6539_v18  ;;  %v8121_v52 = vpack.c.bf16 %v6655_v15, %v6652_v7 }
 0x49d   : > { %v2008_v4 = vpop.f32.mrb[74].mxu1  ;;  %v5142_v9 = vpop.f32.mrb[70].mxu0  ;;  %v2007_v62 = vadd.f32 %v2006_v12, %v6465_v37  ;;  %v2164_v36 = vadd.f32 %v2163_v31, %v6539_v18 }
 0x49e   : > { %v2009_v60 = vadd.f32 %v2008_v4, %v6522_v44  ;;  %v2175_v58 = vadd.f32 %v5142_v9, %v6539_v18  ;;  %v2010_v55 = vpop.f32.mrb[75].mxu1  ;;  %v2166_v49 = vpop.f32.mrb[71].mxu0 }
 0x49f   : > { %v2011_v5 = vadd.f32 %v2010_v55, %v6465_v37  ;;  %v2167_v17 = vadd.f32 %v2166_v49, %v6539_v18 }
 0x4a0   : > { %v6762_v29 = vpack.c.bf16 %v2009_v60, %v2005_v25  ;;  %v2239_v3 = vpack.c.bf16 %v2175_v58, %v2172_v38 }
 0x4a1   : > { %v2223_v41 = vpack.c.bf16 %v2011_v5, %v2007_v62  ;;  %v2238_v51 = vpack.c.bf16 %v2167_v17, %v2164_v36 }
 0x4a3   : > { %v2014_v10 = vpop.f32.mrb[76].mxu1  ;;  %4844 = vmatprep.subr.bf16.mxu0 %v2223_v41  ;;  %4890 = vmatprep.subr.bf16.mxu1 %v2238_v51 }
 0x4a4   : > { %v2016_v47 = vpop.f32.mrb[77].mxu1  ;;  %4845 = vmatpush3.bf16.xpose.msra.mxu0 %v8118_v59  ;;  %4891 = vmatpush3.bf16.msra.mxu1 %v8119_v39  ;;  %v2015_v30 = vadd.f32 %v2014_v10, %v6522_v44 }
 0x4a5   : > { %v2018_v34 = vpop.f32.mrb[78].mxu1  ;;  %4892 = vmatprep.subr.bf16.mxu1 %v2239_v3  ;;  %v2017_v8 = vadd.f32 %v2016_v47, %v6465_v37  ;;  %v8123_v3 = vpack.c.bf16 %v6671_v32, %v6668_v43 }
 0x4a6   : > { %v2019_v35 = vadd.f32 %v2018_v34, %v6522_v44  ;;  %v2020_v45 = vpop.f32.mrb[79].mxu1 }
 0x4a7   : > { %v2021_v13 = vadd.f32 %v2020_v45, %v6465_v37 }
 0x4a8   : > { %v2208_v33 = vpack.c.bf16 %v2019_v35, %v2015_v30  ;;  %4893 = vmatpush3.bf16.msra.mxu1 %v8120_v57 }
 0x4a9   : > { %v2224_v6 = vpack.c.bf16 %v2021_v13, %v2017_v8 }
 0x4ab   : > { %v2024_v12 = vpop.f32.mrb[80].mxu1  ;;  %v5145_v28 = vpop.f32.mrb[72].mxu0  ;;  %4846 = vmatprep.subr.bf16.mxu0 %v2224_v6 }
 0x4ac   : > { %v2026_v40 = vpop.f32.mrb[81].mxu1  ;;  %v2179_v31 = vpop.f32.mrb[73].mxu0  ;;  %4847 = vmatpush3.bf16.xpose.msra.mxu0 %v8121_v52  ;;  %v2025_v25 = vadd.f32 %v2024_v12, %v6522_v44  ;;  %v2188_v38 = vadd.f32 %v5145_v28, %v6539_v18 }
 0x4ad   : > { %v2028_v4 = vpop.f32.mrb[82].mxu1  ;;  %v5146_v9 = vpop.f32.mrb[74].mxu0  ;;  %v2027_v55 = vadd.f32 %v2026_v40, %v6465_v37  ;;  %v2180_v49 = vadd.f32 %v2179_v31, %v6539_v18 }
 0x4ae   : > { %v2029_v60 = vadd.f32 %v2028_v4, %v6522_v44  ;;  %v2191_v27 = vadd.f32 %v5146_v9, %v6539_v18  ;;  %v2030_v23 = vpop.f32.mrb[83].mxu1  ;;  %v2182_v58 = vpop.f32.mrb[75].mxu0  ;;  %v8122_v44 = vpack.c.bf16 %v6683_v0, %v6680_v21 }
 0x4af   : > { %v2031_v62 = vadd.f32 %v2030_v23, %v6465_v37  ;;  %v2183_v7 = vadd.f32 %v2182_v58, %v6539_v18  ;;  %v8124_v37 = vpack.c.bf16 %v6665_v20, %v6662_v26 }
 0x4b0   : > { %v2209_v15 = vpack.c.bf16 %v2029_v60, %v2025_v25  ;;  %v2241_v36 = vpack.c.bf16 %v2191_v27, %v2188_v38 }
 0x4b1   : > { %v2225_v5 = vpack.c.bf16 %v2031_v62, %v2027_v55  ;;  %v2240_v17 = vpack.c.bf16 %v2183_v7, %v2180_v49 }
 0x4b3   : > { %4848 = vmatprep.subr.bf16.mxu0 %v2225_v5  ;;  %4894 = vmatprep.subr.bf16.mxu1 %v2240_v17 }
 0x4b4   : > { %4849 = vmatpush3.bf16.xpose.msra.mxu0 %v8122_v44  ;;  %4895 = vmatpush3.bf16.msra.mxu1 %v8123_v3 }
 0x4b5   : > { %4896 = vmatprep.subr.bf16.mxu1 %v2241_v36 }
 0x4b8   : > { %4897 = vmatpush3.bf16.msra.mxu1 %v8124_v37 }
 0x4bb   : > { %4851 = vmatmul.mubr.bf16.vlgmr.msra.gmra.mrb[76].mxu0 %v6533_v56 }
 0x4bc   : > { %4852 = vmatprep.mubr.bf16.mxu0 %v6561_v54 }
 0x4c3   : > { %4853 = vmatmul.mubr.bf16.gmra.mrb[80].mxu0 %v6561_v54 }
 0x4c4   : > { %4854 = vmatprep.mubr.bf16.mxu0 %v6577_v61 }
 0x4cb   : > { %4855 = vmatmul.mubr.bf16.gmra.mrb[84].mxu0 %v6577_v61 }
 0x4cc   : > { %4856 = vmatprep.mubr.bf16.mxu0 %v6601_v42 }
 0x4d3   : > { %4857 = vmatmul.mubr.bf16.gmra.mrb[88].mxu0 %v6601_v42 }
 0x4d4   : > { %4858 = vmatprep.mubr.bf16.mxu0 %v6617_v1 }
 0x4db   : > { %4859 = vmatmul.mubr.bf16.gmra.mrb[92].mxu0 %v6617_v1 }
 0x4dc   : > { %4860 = vmatprep.mubr.bf16.mxu0 %v6641_v53 }
 0x4e3   : > { %4861 = vmatmul.mubr.bf16.gmra.mrb[96].mxu0 %v6641_v53 }
 0x4e4   : > { %4862 = vmatprep.mubr.bf16.mxu0 %v6657_v48 }
 0x4eb   : > { %4863 = vmatmul.mubr.bf16.gmra.mrb[100].mxu0 %v6657_v48 }
 0x4ec   : > { %4864 = vmatprep.mubr.bf16.mxu0 %v6685_v63 }
 0x4f3   : > { %4865 = vmatmul.mubr.bf16.gmra.mrb[104].mxu0 %v6685_v63 }
 0x4f4   : > { %4866 = vmatprep.mubr.bf16.mxu0 %v6697_v24 }
 0x4fb   : > { %4867 = vmatmul.mubr.bf16.gmra.mrb[108].mxu0 %v6697_v24 }
 0x4fc   : > { %4868 = vmatprep.mubr.bf16.mxu0 %v6712_v2 }
 0x503   : > { %4869 = vmatmul.mubr.bf16.gmra.mrb[112].mxu0 %v6712_v2 }
 0x504   : > { %4870 = vmatprep.mubr.bf16.mxu0 %v6721_v46 }
 0x50b   : > { %4871 = vmatmul.mubr.bf16.gmra.mrb[116].mxu0 %v6721_v46 }
 0x50c   : > { %4872 = vmatprep.mubr.bf16.mxu0 %v6734_v22 }
 0x513   : > { %4873 = vmatmul.mubr.bf16.gmra.mrb[120].mxu0 %v6734_v22 }
 0x514   : > { %4874 = vmatprep.mubr.bf16.mxu0 %v6746_v50 }
 0x51b   : > { %4875 = vmatmul.mubr.bf16.gmra.mrb[124].mxu0 %v6746_v50 }
 0x51c   : > { %4876 = vmatprep.mubr.bf16.mxu0 %v6762_v29 }
 0x523   : > { %4877 = vmatmul.mubr.bf16.gmra.mrb[128].mxu0 %v6762_v29 }
 0x524   : > { %4878 = vmatprep.mubr.bf16.mxu0 %v2208_v33 }
 0x52b   : > { %4879 = vmatmul.mubr.bf16.gmra.mrb[132].mxu0 %v2208_v33 }
 0x52c   : > { %4880 = vmatprep.mubr.bf16.mxu0 %v2209_v15 }
 0x533   : > { %4881 = vmatmul.mubr.bf16.gmra.mrb[136].mxu0 %v2209_v15 }
 0x58e   : > { %v6824_v63 = vpop.f32.mrb[76].mxu0 }
 0x58f   : > { %v6826_v26 = vpop.f32.mrb[77].mxu0 }
 0x590   : > { %v6828_v48 = vpop.f32.mrb[78].mxu0  ;;  %v2435_v56 = vmax.f32 %v6824_v63, %v6826_v26 }
 0x591   : > { %v6832_v18 = vpop.f32.mrb[79].mxu0 }
 0x592   : > { %2436 = vmax.xlane.f32.xlu0 %v2435_v56  ;;  %v2438_v54 = vmax.f32 %v6828_v48, %v6832_v18 }
 0x594   : > { %2439 = vmax.xlane.f32.xlu1 %v2438_v54 }
 0x596   : > { %v6836_v61 = vpop.f32.mrb[80].mxu0 }
 0x597   : > { %v6838_v42 = vpop.f32.mrb[81].mxu0 }
 0x598   : > { %v6840_v1 = vpop.f32.mrb[82].mxu0  ;;  %v2441_v53 = vmax.f32 %v6836_v61, %v6838_v42 }
 0x599   : > { %v6844_v20 = vpop.f32.mrb[83].mxu0 }
 0x59a   : > { %2442 = vmax.xlane.f32.xlu0 %v2441_v53  ;;  %v2444_v43 = vmax.f32 %v6840_v1, %v6844_v20 }
 0x59c   : > { %2445 = vmax.xlane.f32.xlu1 %v2444_v43 }
 0x59e   : > { %v6848_v32 = vpop.f32.mrb[84].mxu0 }
 0x59f   : > { %v6850_v21 = vpop.f32.mrb[85].mxu0 }
 0x5a0   : > { %v6852_v0 = vpop.f32.mrb[86].mxu0  ;;  %v2447_v24 = vmax.f32 %v6848_v32, %v6850_v21 }
 0x5a1   : > { %v6856_v2 = vpop.f32.mrb[87].mxu0 }
 0x5a2   : > { %2448 = vmax.xlane.f32.xlu0 %v2447_v24  ;;  %v2450_v46 = vmax.f32 %v6852_v0, %v6856_v2 }
 0x5a4   : > { %2451 = vmax.xlane.f32.xlu1 %v2450_v46 }
 0x5a6   : > { %v6860_v22 = vpop.f32.mrb[88].mxu0 }
 0x5a7   : > { %v6862_v50 = vpop.f32.mrb[89].mxu0 }
 0x5a8   : > { %v6864_v29 = vpop.f32.mrb[90].mxu0  ;;  %v2453_v41 = vmax.f32 %v6860_v22, %v6862_v50 }
 0x5a9   : > { %v6868_v51 = vpop.f32.mrb[91].mxu0 }
 0x5aa   : > { %2454 = vmax.xlane.f32.xlu0 %v2453_v41  ;;  %v2456_v10 = vmax.f32 %v6864_v29, %v6868_v51 }
 0x5ac   : > { %2457 = vmax.xlane.f32.xlu1 %v2456_v10 }
 0x5ae   : > { %v6872_v47 = vpop.f32.mrb[92].mxu0 }
 0x5af   : > { %v6874_v59 = vpop.f32.mrb[93].mxu0 }
 0x5b0   : > { %v6876_v39 = vpop.f32.mrb[94].mxu0  ;;  %v2459_v34 = vmax.f32 %v6872_v47, %v6874_v59 }
 0x5b1   : > { %v6880_v30 = vpop.f32.mrb[95].mxu0 }
 0x5b2   : > { %2460 = vmax.xlane.f32.xlu0 %v2459_v34  ;;  %v2462_v35 = vmax.f32 %v6876_v39, %v6880_v30 }
 0x5b4   : > { %2463 = vmax.xlane.f32.xlu1 %v2462_v35 }
 0x5b6   : > { %v6884_v45 = vpop.f32.mrb[96].mxu0 }
 0x5b7   : > { %v6886_v8 = vpop.f32.mrb[97].mxu0 }
 0x5b8   : > { %v6888_v13 = vpop.f32.mrb[98].mxu0  ;;  %v2465_v33 = vmax.f32 %v6884_v45, %v6886_v8 }
 0x5b9   : > { %v6892_v57 = vpop.f32.mrb[99].mxu0 }
 0x5ba   : > { %2466 = vmax.xlane.f32.xlu0 %v2465_v33  ;;  %v2468_v6 = vmax.f32 %v6888_v13, %v6892_v57 }
 0x5bc   : > { %2469 = vmax.xlane.f32.xlu1 %v2468_v6 }
 0x5be   : > { %v6896_v12 = vpop.f32.mrb[100].mxu0 }
 0x5bf   : > { %v6898_v28 = vpop.f32.mrb[101].mxu0 }
 0x5c0   : > { %v6900_v40 = vpop.f32.mrb[102].mxu0  ;;  %v2471_v31 = vmax.f32 %v6896_v12, %v6898_v28 }
 0x5c1   : > { %v6904_v52 = vpop.f32.mrb[103].mxu0 }
 0x5c2   : > { %2472 = vmax.xlane.f32.xlu0 %v2471_v31  ;;  %v2474_v4 = vmax.f32 %v6900_v40, %v6904_v52 }
 0x5c4   : > { %2475 = vmax.xlane.f32.xlu1 %v2474_v4 }
 0x5c6   : > { %v6908_v9 = vpop.f32.mrb[104].mxu0 }
 0x5c7   : > { %v6910_v25 = vpop.f32.mrb[105].mxu0 }
 0x5c8   : > { %v6912_v38 = vpop.f32.mrb[106].mxu0  ;;  %v2477_v60 = vmax.f32 %v6908_v9, %v6910_v25 }
 0x5c9   : > { %v6916_v27 = vpop.f32.mrb[107].mxu0 }
 0x5ca   : > { %2478 = vmax.xlane.f32.xlu0 %v2477_v60  ;;  %v2480_v23 = vmax.f32 %v6912_v38, %v6916_v27 }
 0x5cc   : > { %2481 = vmax.xlane.f32.xlu1 %v2480_v23 }
 0x5ce   : > { %v6920_v58 = vpop.f32.mrb[108].mxu0 }
 0x5cf   : > { %v6922_v55 = vpop.f32.mrb[109].mxu0 }
 0x5d0   : > { %v6924_v49 = vpop.f32.mrb[110].mxu0  ;;  %v2483_v62 = vmax.f32 %v6920_v58, %v6922_v55 }
 0x5d1   : > { %v6928_v7 = vpop.f32.mrb[111].mxu0 }
 0x5d2   : > { %2484 = vmax.xlane.f32.xlu0 %v2483_v62  ;;  %v2486_v15 = vmax.f32 %v6924_v49, %v6928_v7 }
 0x5d4   : > { %2487 = vmax.xlane.f32.xlu1 %v2486_v15 }
 0x5d6   : > { %v6932_v36 = vpop.f32.mrb[112].mxu0 }
 0x5d7   : > { %v6934_v5 = vpop.f32.mrb[113].mxu0 }
 0x5d8   : > { %v6936_v17 = vpop.f32.mrb[114].mxu0  ;;  %v2489_v44 = vmax.f32 %v6932_v36, %v6934_v5 }
 0x5d9   : > { %v6940_v3 = vpop.f32.mrb[115].mxu0 }
 0x5da   : > { %2490 = vmax.xlane.f32.xlu0 %v2489_v44  ;;  %v2492_v37 = vmax.f32 %v6936_v17, %v6940_v3 }
 0x5dc   : > { %2493 = vmax.xlane.f32.xlu1 %v2492_v37 }
 0x5de   : > { %v6944_v56 = vpop.f32.mrb[116].mxu0 }
 0x5df   : > { %v6946_v54 = vpop.f32.mrb[117].mxu0 }
 0x5e0   : > { %v6948_v53 = vpop.f32.mrb[118].mxu0  ;;  %v2495_v43 = vmax.f32 %v6944_v56, %v6946_v54 }
 0x5e1   : > { %v6952_v24 = vpop.f32.mrb[119].mxu0 }
 0x5e2   : > { %2496 = vmax.xlane.f32.xlu0 %v2495_v43  ;;  %v2498_v46 = vmax.f32 %v6948_v53, %v6952_v24 }
 0x5e4   : > { %2499 = vmax.xlane.f32.xlu1 %v2498_v46 }
 0x5e6   : > { %v6956_v41 = vpop.f32.mrb[120].mxu0 }
 0x5e7   : > { %v6958_v10 = vpop.f32.mrb[121].mxu0 }
 0x5e8   : > { %v6960_v34 = vpop.f32.mrb[122].mxu0  ;;  %v2501_v35 = vmax.f32 %v6956_v41, %v6958_v10 }
 0x5e9   : > { %v6964_v33 = vpop.f32.mrb[123].mxu0 }
 0x5ea   : > { %2502 = vmax.xlane.f32.xlu0 %v2501_v35  ;;  %v2504_v6 = vmax.f32 %v6960_v34, %v6964_v33 }
 0x5ec   : > { %2505 = vmax.xlane.f32.xlu1 %v2504_v6 }
 0x5ee   : > { %v6968_v31 = vpop.f32.mrb[124].mxu0 }
 0x5ef   : > { %v6970_v4 = vpop.f32.mrb[125].mxu0 }
 0x5f0   : > { %v6972_v60 = vpop.f32.mrb[126].mxu0  ;;  %v2507_v23 = vmax.f32 %v6968_v31, %v6970_v4 }
 0x5f1   : > { %8125 = vst [vmem:[#allocation34_spill] sm:$0xff] %v6972_v60  ;;  %v6976_v62 = vpop.f32.mrb[127].mxu0 }
 0x5f2   : > { %8126 = vst [vmem:[#allocation35_spill] sm:$0xff] %v6976_v62  ;;  %2508 = vmax.xlane.f32.xlu0 %v2507_v23  ;;  %v2510_v15 = vmax.f32 %v6972_v60, %v6976_v62 }
 0x5f4   : > { %2511 = vmax.xlane.f32.xlu1 %v2510_v15 }
 0x5f6   : > { %v6980_v44 = vpop.f32.mrb[128].mxu0 }
 0x5f7   : > { %8127 = vst [vmem:[#allocation36_spill] sm:$0xff] %v6980_v44  ;;  %v6982_v37 = vpop.f32.mrb[129].mxu0 }
 0x5f8   : > { %8128 = vst [vmem:[#allocation37_spill] sm:$0xff] %v6982_v37  ;;  %v6984_v43 = vpop.f32.mrb[130].mxu0  ;;  %v2513_v46 = vmax.f32 %v6980_v44, %v6982_v37 }
 0x5f9   : > { %8129 = vst [vmem:[#allocation38_spill] sm:$0xff] %v6984_v43  ;;  %v6988_v35 = vpop.f32.mrb[131].mxu0 }
 0x5fa   : > { %8130 = vst [vmem:[#allocation39_spill] sm:$0xff] %v6988_v35  ;;  %2514 = vmax.xlane.f32.xlu0 %v2513_v46  ;;  %v2516_v6 = vmax.f32 %v6984_v43, %v6988_v35 }
 0x5fc   : > { %2517 = vmax.xlane.f32.xlu1 %v2516_v6 }
 0x5fe   : > { %v6992_v23 = vpop.f32.mrb[132].mxu0 }
 0x5ff   : > { %8131 = vst [vmem:[#allocation40_spill] sm:$0xff] %v6992_v23  ;;  %v6994_v16 = vpop.f32.mrb[133].mxu0 }
 0x600   : > { %8132 = vst [vmem:[#allocation41_spill] sm:$0xff] %v6994_v16  ;;  %v6996_v15 = vpop.f32.mrb[134].mxu0  ;;  %v2519_v11 = vmax.f32 %v6992_v23, %v6994_v16 }
 0x601   : > { %8133 = vst [vmem:[#allocation42_spill] sm:$0xff] %v6996_v15  ;;  %v7000_v19 = vpop.f32.mrb[135].mxu0 }
 0x602   : > { %8134 = vst [vmem:[#allocation43_spill] sm:$0xff] %v7000_v19  ;;  %2520 = vmax.xlane.f32.xlu0 %v2519_v11  ;;  %v2522_v14 = vmax.f32 %v6996_v15, %v7000_v19 }
 0x604   : > { %2523 = vmax.xlane.f32.xlu1 %v2522_v14 }
 0x606   : > { %v7004_v46 = vpop.f32.mrb[136].mxu0 }
 0x607   : > { %8135 = vst [vmem:[#allocation44_spill] sm:$0xff] %v7004_v46  ;;  %v7006_v35 = vpop.f32.mrb[137].mxu0 }
 0x608   : > { %8136 = vst [vmem:[#allocation45_spill] sm:$0xff] %v7006_v35  ;;  %v7008_v6 = vpop.f32.mrb[138].mxu0  ;;  %v2525_v43 = vmax.f32 %v7004_v46, %v7006_v35 }
 0x609   : > { %v7012_v37 = vpop.f32.mrb[139].mxu0 }
 0x60a   : > { %8137 = vst [vmem:[#allocation46_spill] sm:$0xff] %v7012_v37  ;;  %2526 = vmax.xlane.f32.xlu0 %v2525_v43  ;;  %v2528_v16 = vmax.f32 %v7008_v6, %v7012_v37 }
 0x60c   : > { %2529 = vmax.xlane.f32.xlu1 %v2528_v16 }
 0x61f   : > { %v2437_v11 = vpop.xlane.xlu0 %2436 }
 0x620   : > { %v2531_v19 = vsub.f32 %v6824_v63, %v2437_v11  ;;  %v2532_v14 = vsub.f32 %v6826_v26, %v2437_v11 }
 0x621   : > { %v2440_v15 = vpop.xlane.xlu1 %2439 }
 0x622   : > { %v2595_v23 = vmul.f32 1.442695, %v2531_v19  ;;  %v2597_v44 = vmul.f32 1.442695, %v2532_v14  ;;  %v2533_v62 = vsub.f32 %v6828_v48, %v2440_v15  ;;  %v2534_v60 = vsub.f32 %v6832_v18, %v2440_v15 }
 0x624   : > { %5358 = vpow2.f32 %v2595_v23  ;;  %v2599_v35 = vmul.f32 1.442695, %v2533_v62  ;;  %v2601_v46 = vmul.f32 1.442695, %v2534_v60 }
 0x625   : > { %5360 = vpow2.f32 %v2597_v44 }
 0x626   : > { %5362 = vpow2.f32 %v2599_v35 }
 0x627   : > { %5364 = vpow2.f32 %v2601_v46  ;;  %v2443_v43 = vpop.xlane.xlu0 %2442 }
 0x628   : > { %v2535_v16 = vsub.f32 %v6836_v61, %v2443_v43  ;;  %v2536_v63 = vsub.f32 %v6838_v42, %v2443_v43 }
 0x629   : > { %v2446_v37 = vpop.xlane.xlu1 %2445 }
 0x62a   : > { %v2603_v26 = vmul.f32 1.442695, %v2535_v16  ;;  %v2605_v11 = vmul.f32 1.442695, %v2536_v63  ;;  %v2537_v19 = vsub.f32 %v6840_v1, %v2446_v37  ;;  %v2538_v48 = vsub.f32 %v6844_v20, %v2446_v37 }
 0x62c   : > { %5366 = vpow2.f32 %v2603_v26  ;;  %v2607_v18 = vmul.f32 1.442695, %v2537_v19  ;;  %v2609_v23 = vmul.f32 1.442695, %v2538_v48 }
 0x62d   : > { %5368 = vpow2.f32 %v2605_v11 }
 0x62e   : > { %v5359_v60 = vpop.eup %5358  ;;  %5370 = vpow2.f32 %v2607_v18 }
 0x62f   : > { %v5361_v62 = vpop.eup %5360  ;;  %5372 = vpow2.f32 %v2609_v23  ;;  %v2449_v44 = vpop.xlane.xlu0 %2448 }
 0x630   : > { %v5363_v35 = vpop.eup %5362  ;;  %v2539_v61 = vsub.f32 %v6848_v32, %v2449_v44  ;;  %v2540_v42 = vsub.f32 %v6850_v21, %v2449_v44  ;;  %v2723_v15 = vadd.f32 %v5361_v62, %v5359_v60 }
 0x631   : > { %v5365_v46 = vpop.eup %5364  ;;  %v2452_v14 = vpop.xlane.xlu1 %2451  ;;  %v2851_v1 = vpack.c.bf16 %v5363_v35, %v5359_v60 }
 0x632   : > { %v2611_v43 = vmul.f32 1.442695, %v2539_v61  ;;  %v2613_v20 = vmul.f32 1.442695, %v2540_v42  ;;  %v2541_v37 = vsub.f32 %v6852_v0, %v2452_v14  ;;  %v2542_v16 = vsub.f32 %v6856_v2, %v2452_v14  ;;  %2724 = vadd.xlane.f32.xlu0 %v2723_v15 }
 0x633   : > { %v2852_v63 = vpack.c.bf16 %v5365_v46, %v5361_v62  ;;  %v2726_v26 = vadd.f32 %v5365_v46, %v5363_v35 }
 0x634   : > { %5374 = vpow2.f32 %v2611_v43  ;;  %v2615_v11 = vmul.f32 1.442695, %v2541_v37  ;;  %v2617_v19 = vmul.f32 1.442695, %v2542_v16 }
 0x635   : > { %5376 = vpow2.f32 %v2613_v20  ;;  %2915 = vmatprep.mubr.bf16.mxu1 %v2852_v63  ;;  %2727 = vadd.xlane.f32.xlu1 %v2726_v26 }
 0x636   : > { %v5367_v32 = vpop.eup %5366  ;;  %5378 = vpow2.f32 %v2615_v11  ;;  %2916 = vmatmul.mubr.bf16.vlgmr.msra.gmra.mrb[84].mxu1 %v2851_v1 }
 0x637   : > { %v5369_v21 = vpop.eup %5368  ;;  %5380 = vpow2.f32 %v2617_v19  ;;  %v2455_v48 = vpop.xlane.xlu0 %2454 }
 0x638   : > { %v5371_v18 = vpop.eup %5370  ;;  %v2543_v0 = vsub.f32 %v6860_v22, %v2455_v48  ;;  %v2544_v2 = vsub.f32 %v6862_v50, %v2455_v48  ;;  %v2729_v23 = vadd.f32 %v5369_v21, %v5367_v32 }
 0x639   : > { %v5373_v60 = vpop.eup %5372  ;;  %v2458_v62 = vpop.xlane.xlu1 %2457  ;;  %v2853_v44 = vpack.c.bf16 %v5371_v18, %v5367_v32 }
 0x63a   : > { %v2619_v35 = vmul.f32 1.442695, %v2543_v0  ;;  %v2621_v61 = vmul.f32 1.442695, %v2544_v2  ;;  %v2545_v42 = vsub.f32 %v6864_v29, %v2458_v62  ;;  %v2546_v15 = vsub.f32 %v6868_v51, %v2458_v62  ;;  %2730 = vadd.xlane.f32.xlu0 %v2729_v23 }
 0x63b   : > { %v2854_v46 = vpack.c.bf16 %v5373_v60, %v5369_v21  ;;  %v2732_v14 = vadd.f32 %v5373_v60, %v5371_v18 }
 0x63c   : > { %5382 = vpow2.f32 %v2619_v35  ;;  %v2623_v1 = vmul.f32 1.442695, %v2545_v42  ;;  %v2625_v43 = vmul.f32 1.442695, %v2546_v15 }
 0x63d   : > { %5384 = vpow2.f32 %v2621_v61  ;;  %2923 = vmatprep.mubr.bf16.mxu1 %v2854_v46  ;;  %2733 = vadd.xlane.f32.xlu1 %v2732_v14 }
 0x63e   : > { %v5375_v22 = vpop.eup %5374  ;;  %5386 = vpow2.f32 %v2623_v1  ;;  %2924 = vmatmul.mubr.bf16.gmra.mrb[88].mxu1 %v2853_v44 }
 0x63f   : > { %v5377_v50 = vpop.eup %5376  ;;  %5388 = vpow2.f32 %v2625_v43  ;;  %v2461_v20 = vpop.xlane.xlu0 %2460 }
 0x640   : > { %v5379_v37 = vpop.eup %5378  ;;  %v2547_v29 = vsub.f32 %v6872_v47, %v2461_v20  ;;  %v2548_v51 = vsub.f32 %v6874_v59, %v2461_v20  ;;  %v2735_v16 = vadd.f32 %v5377_v50, %v5375_v22 }
 0x641   : > { %v5381_v63 = vpop.eup %5380  ;;  %v2464_v26 = vpop.xlane.xlu1 %2463  ;;  %v2855_v11 = vpack.c.bf16 %v5379_v37, %v5375_v22 }
 0x642   : > { %v2627_v19 = vmul.f32 1.442695, %v2547_v29  ;;  %v2629_v32 = vmul.f32 1.442695, %v2548_v51  ;;  %v2549_v21 = vsub.f32 %v6876_v39, %v2464_v26  ;;  %v2550_v48 = vsub.f32 %v6880_v30, %v2464_v26  ;;  %2736 = vadd.xlane.f32.xlu0 %v2735_v16 }
 0x643   : > { %v2856_v18 = vpack.c.bf16 %v5381_v63, %v5377_v50  ;;  %v2738_v0 = vadd.f32 %v5381_v63, %v5379_v37 }
 0x644   : > { %5390 = vpow2.f32 %v2627_v19  ;;  %v2631_v2 = vmul.f32 1.442695, %v2549_v21  ;;  %v2633_v23 = vmul.f32 1.442695, %v2550_v48 }
 0x645   : > { %5392 = vpow2.f32 %v2629_v32  ;;  %2931 = vmatprep.mubr.bf16.mxu1 %v2856_v18  ;;  %2739 = vadd.xlane.f32.xlu1 %v2738_v0 }
 0x646   : > { %v5383_v47 = vpop.eup %5382  ;;  %5394 = vpow2.f32 %v2631_v2  ;;  %2932 = vmatmul.mubr.bf16.gmra.mrb[92].mxu1 %v2855_v11 }
 0x647   : > { %v5385_v59 = vpop.eup %5384  ;;  %5396 = vpow2.f32 %v2633_v23  ;;  %v2467_v60 = vpop.xlane.xlu0 %2466 }
 0x648   : > { %v5387_v62 = vpop.eup %5386  ;;  %v2551_v39 = vsub.f32 %v6884_v45, %v2467_v60  ;;  %v2552_v30 = vsub.f32 %v6886_v8, %v2467_v60  ;;  %v2741_v44 = vadd.f32 %v5385_v59, %v5383_v47 }
 0x649   : > { %v5389_v35 = vpop.eup %5388  ;;  %v2470_v61 = vpop.xlane.xlu1 %2469  ;;  %v2857_v42 = vpack.c.bf16 %v5387_v62, %v5383_v47 }
 0x64a   : > { %v2635_v15 = vmul.f32 1.442695, %v2551_v39  ;;  %v2637_v46 = vmul.f32 1.442695, %v2552_v30  ;;  %v2553_v14 = vsub.f32 %v6888_v13, %v2470_v61  ;;  %v2554_v1 = vsub.f32 %v6892_v57, %v2470_v61  ;;  %2742 = vadd.xlane.f32.xlu0 %v2741_v44 }
 0x64b   : > { %v2858_v43 = vpack.c.bf16 %v5389_v35, %v5385_v59  ;;  %v2744_v22 = vadd.f32 %v5389_v35, %v5387_v62 }
 0x64c   : > { %5398 = vpow2.f32 %v2635_v15  ;;  %v2639_v50 = vmul.f32 1.442695, %v2553_v14  ;;  %v2641_v20 = vmul.f32 1.442695, %v2554_v1 }
 0x64d   : > { %5400 = vpow2.f32 %v2637_v46  ;;  %2939 = vmatprep.mubr.bf16.mxu1 %v2858_v43  ;;  %2745 = vadd.xlane.f32.xlu1 %v2744_v22 }
 0x64e   : > { %v5391_v45 = vpop.eup %5390  ;;  %5402 = vpow2.f32 %v2639_v50  ;;  %2940 = vmatmul.mubr.bf16.gmra.mrb[96].mxu1 %v2857_v42 }
 0x64f   : > { %v5393_v8 = vpop.eup %5392  ;;  %5404 = vpow2.f32 %v2641_v20  ;;  %v2473_v37 = vpop.xlane.xlu0 %2472 }
 0x650   : > { %v5395_v29 = vpop.eup %5394  ;;  %v2555_v13 = vsub.f32 %v6896_v12, %v2473_v37  ;;  %v2556_v57 = vsub.f32 %v6898_v28, %v2473_v37  ;;  %v2747_v51 = vadd.f32 %v5393_v8, %v5391_v45 }
 0x651   : > { %v5397_v16 = vpop.eup %5396  ;;  %v2476_v63 = vpop.xlane.xlu1 %2475  ;;  %v2859_v26 = vpack.c.bf16 %v5395_v29, %v5391_v45 }
 0x652   : > { %v2643_v11 = vmul.f32 1.442695, %v2555_v13  ;;  %v2645_v19 = vmul.f32 1.442695, %v2556_v57  ;;  %v2557_v32 = vsub.f32 %v6900_v40, %v2476_v63  ;;  %v2558_v21 = vsub.f32 %v6904_v52, %v2476_v63  ;;  %2748 = vadd.xlane.f32.xlu0 %v2747_v51 }
 0x653   : > { %v2860_v48 = vpack.c.bf16 %v5397_v16, %v5393_v8  ;;  %v2750_v18 = vadd.f32 %v5397_v16, %v5395_v29 }
 0x654   : > { %5406 = vpow2.f32 %v2643_v11  ;;  %v2647_v0 = vmul.f32 1.442695, %v2557_v32  ;;  %v2649_v2 = vmul.f32 1.442695, %v2558_v21 }
 0x655   : > { %5408 = vpow2.f32 %v2645_v19  ;;  %2947 = vmatprep.mubr.bf16.mxu1 %v2860_v48  ;;  %2751 = vadd.xlane.f32.xlu1 %v2750_v18 }
 0x656   : > { %v5399_v12 = vpop.eup %5398  ;;  %5410 = vpow2.f32 %v2647_v0  ;;  %2948 = vmatmul.mubr.bf16.gmra.mrb[100].mxu1 %v2859_v26 }
 0x657   : > { %v5401_v28 = vpop.eup %5400  ;;  %5412 = vpow2.f32 %v2649_v2  ;;  %v2479_v23 = vpop.xlane.xlu0 %2478 }
 0x658   : > { %v5403_v47 = vpop.eup %5402  ;;  %v2559_v40 = vsub.f32 %v6908_v9, %v2479_v23  ;;  %v2560_v52 = vsub.f32 %v6910_v25, %v2479_v23  ;;  %v2753_v59 = vadd.f32 %v5401_v28, %v5399_v12 }
 0x659   : > { %v5405_v60 = vpop.eup %5404  ;;  %v2482_v62 = vpop.xlane.xlu1 %2481  ;;  %v2861_v39 = vpack.c.bf16 %v5403_v47, %v5399_v12 }
 0x65a   : > { %v2651_v30 = vmul.f32 1.442695, %v2559_v40  ;;  %v2653_v44 = vmul.f32 1.442695, %v2560_v52  ;;  %v2561_v35 = vsub.f32 %v6912_v38, %v2482_v62  ;;  %v2562_v61 = vsub.f32 %v6916_v27, %v2482_v62  ;;  %2754 = vadd.xlane.f32.xlu0 %v2753_v59 }
 0x65b   : > { %v2862_v42 = vpack.c.bf16 %v5405_v60, %v5401_v28  ;;  %v2756_v15 = vadd.f32 %v5405_v60, %v5403_v47 }
 0x65c   : > { %5414 = vpow2.f32 %v2651_v30  ;;  %v2655_v46 = vmul.f32 1.442695, %v2561_v35  ;;  %v2657_v14 = vmul.f32 1.442695, %v2562_v61 }
 0x65d   : > { %5416 = vpow2.f32 %v2653_v44  ;;  %2955 = vmatprep.mubr.bf16.mxu1 %v2862_v42  ;;  %2757 = vadd.xlane.f32.xlu1 %v2756_v15 }
 0x65e   : > { %v5407_v9 = vpop.eup %5406  ;;  %5418 = vpow2.f32 %v2655_v46  ;;  %2956 = vmatmul.mubr.bf16.gmra.mrb[104].mxu1 %v2861_v39 }
 0x65f   : > { %v5409_v25 = vpop.eup %5408  ;;  %5420 = vpow2.f32 %v2657_v14  ;;  %v2485_v1 = vpop.xlane.xlu0 %2484 }
 0x660   : > { %v5411_v43 = vpop.eup %5410  ;;  %v2563_v38 = vsub.f32 %v6920_v58, %v2485_v1  ;;  %v2564_v27 = vsub.f32 %v6922_v55, %v2485_v1  ;;  %v2759_v22 = vadd.f32 %v5409_v25, %v5407_v9 }
 0x661   : > { %v5413_v50 = vpop.eup %5412  ;;  %v2488_v20 = vpop.xlane.xlu1 %2487  ;;  %v2863_v45 = vpack.c.bf16 %v5411_v43, %v5407_v9 }
 0x662   : > { %v2659_v8 = vmul.f32 1.442695, %v2563_v38  ;;  %v2661_v37 = vmul.f32 1.442695, %v2564_v27  ;;  %v2565_v29 = vsub.f32 %v6924_v49, %v2488_v20  ;;  %v2566_v13 = vsub.f32 %v6928_v7, %v2488_v20  ;;  %2760 = vadd.xlane.f32.xlu0 %v2759_v22 }
 0x663   : > { %v2864_v57 = vpack.c.bf16 %v5413_v50, %v5409_v25  ;;  %v2762_v51 = vadd.f32 %v5413_v50, %v5411_v43 }
 0x664   : > { %5422 = vpow2.f32 %v2659_v8  ;;  %v2663_v16 = vmul.f32 1.442695, %v2565_v29  ;;  %v2665_v63 = vmul.f32 1.442695, %v2566_v13 }
 0x665   : > { %5424 = vpow2.f32 %v2661_v37  ;;  %2963 = vmatprep.mubr.bf16.mxu1 %v2864_v57  ;;  %2763 = vadd.xlane.f32.xlu1 %v2762_v51 }
 0x666   : > { %v5415_v58 = vpop.eup %5414  ;;  %5426 = vpow2.f32 %v2663_v16  ;;  %2964 = vmatmul.mubr.bf16.gmra.mrb[108].mxu1 %v2863_v45 }
 0x667   : > { %v5417_v55 = vpop.eup %5416  ;;  %5428 = vpow2.f32 %v2665_v63  ;;  %v2491_v26 = vpop.xlane.xlu0 %2490 }
 0x668   : > { %v5419_v11 = vpop.eup %5418  ;;  %v2567_v49 = vsub.f32 %v6932_v36, %v2491_v26  ;;  %v2568_v7 = vsub.f32 %v6934_v5, %v2491_v26  ;;  %v2765_v19 = vadd.f32 %v5417_v55, %v5415_v58 }
 0x669   : > { %v5421_v32 = vpop.eup %5420  ;;  %v2494_v21 = vpop.xlane.xlu1 %2493  ;;  %v2865_v48 = vpack.c.bf16 %v5419_v11, %v5415_v58 }
 0x66a   : > { %v2667_v18 = vmul.f32 1.442695, %v2567_v49  ;;  %v2669_v0 = vmul.f32 1.442695, %v2568_v7  ;;  %v2569_v2 = vsub.f32 %v6936_v17, %v2494_v21  ;;  %v2570_v12 = vsub.f32 %v6940_v3, %v2494_v21  ;;  %2766 = vadd.xlane.f32.xlu0 %v2765_v19  ;;  %v8138_v7 = vld [vmem:[#allocation34_spill] sm:$0xff] }
 0x66b   : > { %v2866_v28 = vpack.c.bf16 %v5421_v32, %v5417_v55  ;;  %v2768_v23 = vadd.f32 %v5421_v32, %v5419_v11  ;;  %v8139_v32 = vld [vmem:[#allocation35_spill] sm:$0xff] }
 0x66c   : > { %5430 = vpow2.f32 %v2667_v18  ;;  %v2671_v47 = vmul.f32 1.442695, %v2569_v2  ;;  %v2673_v40 = vmul.f32 1.442695, %v2570_v12 }
 0x66d   : > { %5432 = vpow2.f32 %v2669_v0  ;;  %2971 = vmatprep.mubr.bf16.mxu1 %v2866_v28  ;;  %2769 = vadd.xlane.f32.xlu1 %v2768_v23  ;;  %v8140_v23 = vld [vmem:[#allocation36_spill] sm:$0xff] }
 0x66e   : > { %v5423_v36 = vpop.eup %5422  ;;  %5434 = vpow2.f32 %v2671_v47  ;;  %2972 = vmatmul.mubr.bf16.gmra.mrb[112].mxu1 %v2865_v48 }
 0x66f   : > { %v5425_v5 = vpop.eup %5424  ;;  %5436 = vpow2.f32 %v2673_v40  ;;  %v2497_v52 = vpop.xlane.xlu0 %2496  ;;  %v8141_v40 = vld [vmem:[#allocation37_spill] sm:$0xff] }
 0x670   : > { %v5427_v59 = vpop.eup %5426  ;;  %v2571_v17 = vsub.f32 %v6944_v56, %v2497_v52  ;;  %v2572_v3 = vsub.f32 %v6946_v54, %v2497_v52  ;;  %v2771_v60 = vadd.f32 %v5425_v5, %v5423_v36 }
 0x671   : > { %v5429_v62 = vpop.eup %5428  ;;  %v2500_v39 = vpop.xlane.xlu1 %2499  ;;  %v2867_v30 = vpack.c.bf16 %v5427_v59, %v5423_v36 }
 0x672   : > { %v2675_v44 = vmul.f32 1.442695, %v2571_v17  ;;  %v2677_v35 = vmul.f32 1.442695, %v2572_v3  ;;  %v2573_v61 = vsub.f32 %v6948_v53, %v2500_v39  ;;  %v2574_v42 = vsub.f32 %v6952_v24, %v2500_v39  ;;  %2772 = vadd.xlane.f32.xlu0 %v2771_v60 }
 0x673   : > { %v2868_v15 = vpack.c.bf16 %v5429_v62, %v5425_v5  ;;  %v2774_v46 = vadd.f32 %v5429_v62, %v5427_v59  ;;  %v8142_v62 = vld [vmem:[#allocation38_spill] sm:$0xff] }
 0x674   : > { %5438 = vpow2.f32 %v2675_v44  ;;  %v2679_v14 = vmul.f32 1.442695, %v2573_v61  ;;  %v2681_v9 = vmul.f32 1.442695, %v2574_v42 }
 0x675   : > { %5440 = vpow2.f32 %v2677_v35  ;;  %2979 = vmatprep.mubr.bf16.mxu1 %v2868_v15  ;;  %2775 = vadd.xlane.f32.xlu1 %v2774_v46 }
 0x676   : > { %v5431_v56 = vpop.eup %5430  ;;  %5442 = vpow2.f32 %v2679_v14  ;;  %2980 = vmatmul.mubr.bf16.gmra.mrb[116].mxu1 %v2867_v30  ;;  %v8143_v30 = vld [vmem:[#allocation39_spill] sm:$0xff] }
 0x677   : > { %v5433_v54 = vpop.eup %5432  ;;  %5444 = vpow2.f32 %v2681_v9  ;;  %v2503_v25 = vpop.xlane.xlu0 %2502 }
 0x678   : > { %v5435_v1 = vpop.eup %5434  ;;  %v2575_v53 = vsub.f32 %v6956_v41, %v2503_v25  ;;  %v2576_v24 = vsub.f32 %v6958_v10, %v2503_v25  ;;  %v2777_v43 = vadd.f32 %v5433_v54, %v5431_v56 }
 0x679   : > { %v5437_v38 = vpop.eup %5436  ;;  %v2506_v27 = vpop.xlane.xlu1 %2505  ;;  %v2869_v22 = vpack.c.bf16 %v5435_v1, %v5431_v56 }
 0x67a   : > { %v2683_v50 = vmul.f32 1.442695, %v2575_v53  ;;  %v2685_v20 = vmul.f32 1.442695, %v2576_v24  ;;  %v2577_v45 = vsub.f32 %v6960_v34, %v2506_v27  ;;  %v2578_v8 = vsub.f32 %v6964_v33, %v2506_v27  ;;  %2778 = vadd.xlane.f32.xlu0 %v2777_v43 }
 0x67b   : > { %v2870_v37 = vpack.c.bf16 %v5437_v38, %v5433_v54  ;;  %v2780_v29 = vadd.f32 %v5437_v38, %v5435_v1  ;;  %v8144_v54 = vld [vmem:[#allocation40_spill] sm:$0xff]  ;;  %v8145_v1 = vld [vmem:[#allocation41_spill] sm:$0xff] }
 0x67c   : > { %5446 = vpow2.f32 %v2683_v50  ;;  %v2687_v13 = vmul.f32 1.442695, %v2577_v45  ;;  %v2689_v57 = vmul.f32 1.442695, %v2578_v8  ;;  %v8147_v8 = vld [vmem:[#allocation43_spill] sm:$0xff] }
 0x67d   : > { %5448 = vpow2.f32 %v2685_v20  ;;  %2987 = vmatprep.mubr.bf16.mxu1 %v2870_v37  ;;  %2781 = vadd.xlane.f32.xlu1 %v2780_v29  ;;  %v8146_v20 = vld [vmem:[#allocation42_spill] sm:$0xff] }
 0x67e   : > { %v5439_v41 = vpop.eup %5438  ;;  %5450 = vpow2.f32 %v2687_v13  ;;  %2988 = vmatmul.mubr.bf16.gmra.mrb[120].mxu1 %v2869_v22 }
 0x67f   : > { %v5441_v10 = vpop.eup %5440  ;;  %5452 = vpow2.f32 %v2689_v57  ;;  %v2509_v51 = vpop.xlane.xlu0 %2508 }
 0x680   : > { %v5443_v16 = vpop.eup %5442  ;;  %v2579_v34 = vsub.f32 %v6968_v31, %v2509_v51  ;;  %v2580_v33 = vsub.f32 %v6970_v4, %v2509_v51  ;;  %v2783_v63 = vadd.f32 %v5441_v10, %v5439_v41 }
 0x681   : > { %v5445_v58 = vpop.eup %5444  ;;  %v2512_v55 = vpop.xlane.xlu1 %2511  ;;  %v2871_v26 = vpack.c.bf16 %v5443_v16, %v5439_v41 }
 0x682   : > { %v2691_v11 = vmul.f32 1.442695, %v2579_v34  ;;  %v2693_v49 = vmul.f32 1.442695, %v2580_v33  ;;  %v2581_v19 = vsub.f32 %v8138_v7, %v2512_v55  ;;  %v2582_v21 = vsub.f32 %v8139_v32, %v2512_v55  ;;  %2784 = vadd.xlane.f32.xlu0 %v2783_v63  ;;  %v8148_v33 = vld [vmem:[#allocation44_spill] sm:$0xff] }
 0x683   : > { %v2872_v48 = vpack.c.bf16 %v5445_v58, %v5441_v10  ;;  %v2786_v18 = vadd.f32 %v5445_v58, %v5443_v16  ;;  %v8149_v58 = vld [vmem:[#allocation45_spill] sm:$0xff] }
 0x684   : > { %5454 = vpow2.f32 %v2691_v11  ;;  %v2695_v0 = vmul.f32 1.442695, %v2581_v19  ;;  %v2697_v2 = vmul.f32 1.442695, %v2582_v21 }
 0x685   : > { %5456 = vpow2.f32 %v2693_v49  ;;  %2995 = vmatprep.mubr.bf16.mxu1 %v2872_v48  ;;  %2787 = vadd.xlane.f32.xlu1 %v2786_v18  ;;  %v8150_v48 = vld [vmem:[#allocation46_spill] sm:$0xff] }
 0x686   : > { %v5447_v31 = vpop.eup %5446  ;;  %5458 = vpow2.f32 %v2695_v0  ;;  %2996 = vmatmul.mubr.bf16.gmra.mrb[124].mxu1 %v2871_v26 }
 0x687   : > { %v5449_v4 = vpop.eup %5448  ;;  %5460 = vpow2.f32 %v2697_v2  ;;  %v2515_v12 = vpop.xlane.xlu0 %2514 }
 0x688   : > { %v5451_v28 = vpop.eup %5450  ;;  %v2583_v47 = vsub.f32 %v8140_v23, %v2515_v12  ;;  %v2584_v36 = vsub.f32 %v8141_v40, %v2515_v12  ;;  %v2789_v5 = vadd.f32 %v5449_v4, %v5447_v31 }
 0x689   : > { %v5453_v52 = vpop.eup %5452  ;;  %v2518_v59 = vpop.xlane.xlu1 %2517  ;;  %v2873_v17 = vpack.c.bf16 %v5451_v28, %v5447_v31 }
 0x68a   : > { %v2699_v3 = vmul.f32 1.442695, %v2583_v47  ;;  %v2701_v60 = vmul.f32 1.442695, %v2584_v36  ;;  %v2585_v39 = vsub.f32 %v8142_v62, %v2518_v59  ;;  %v2586_v44 = vsub.f32 %v8143_v30, %v2518_v59  ;;  %2790 = vadd.xlane.f32.xlu0 %v2789_v5 }
 0x68b   : > { %v2874_v35 = vpack.c.bf16 %v5453_v52, %v5449_v4  ;;  %v2792_v61 = vadd.f32 %v5453_v52, %v5451_v28 }
 0x68c   : > { %5462 = vpow2.f32 %v2699_v3  ;;  %v2703_v42 = vmul.f32 1.442695, %v2585_v39  ;;  %v2705_v15 = vmul.f32 1.442695, %v2586_v44 }
 0x68d   : > { %5464 = vpow2.f32 %v2701_v60  ;;  %3003 = vmatprep.mubr.bf16.mxu1 %v2874_v35  ;;  %2793 = vadd.xlane.f32.xlu1 %v2792_v61 }
 0x68e   : > { %v5455_v46 = vpop.eup %5454  ;;  %5466 = vpow2.f32 %v2703_v42  ;;  %3004 = vmatmul.mubr.bf16.gmra.mrb[128].mxu1 %v2873_v17 }
 0x68f   : > { %v5457_v14 = vpop.eup %5456  ;;  %5468 = vpow2.f32 %v2705_v15  ;;  %v2521_v9 = vpop.xlane.xlu0 %2520 }
 0x690   : > { %v5459_v56 = vpop.eup %5458  ;;  %v2587_v25 = vsub.f32 %v8144_v54, %v2521_v9  ;;  %v2588_v53 = vsub.f32 %v8145_v1, %v2521_v9  ;;  %v2795_v24 = vadd.f32 %v5457_v14, %v5455_v46 }
 0x691   : > { %v5461_v43 = vpop.eup %5460  ;;  %v2524_v38 = vpop.xlane.xlu1 %2523  ;;  %v2875_v27 = vpack.c.bf16 %v5459_v56, %v5455_v46 }
 0x692   : > { %v2707_v22 = vmul.f32 1.442695, %v2587_v25  ;;  %v2709_v50 = vmul.f32 1.442695, %v2588_v53  ;;  %v2589_v45 = vsub.f32 %v8146_v20, %v2524_v38  ;;  %v2590_v37 = vsub.f32 %v8147_v8, %v2524_v38  ;;  %2796 = vadd.xlane.f32.xlu0 %v2795_v24  ;;  %v7083_v24 = vld [vmem:[%s7995_s9] ss:$0 sm:$0xff] }
 0x693   : > { %v2876_v29 = vpack.c.bf16 %v5461_v43, %v5457_v14  ;;  %v2798_v13 = vadd.f32 %v5461_v43, %v5459_v56  ;;  %v8151_v38 = vld [vmem:[#allocation3_spill] sm:$0xff]  ;;  %v8152_v20 = vld [vmem:[#allocation5_spill] sm:$0xff] }
 0x694   : > { %5470 = vpow2.f32 %v2707_v22  ;;  %v2711_v57 = vmul.f32 1.442695, %v2589_v45  ;;  %v2713_v41 = vmul.f32 1.442695, %v2590_v37 }
 0x695   : > { %5472 = vpow2.f32 %v2709_v50  ;;  %3011 = vmatprep.mubr.bf16.mxu1 %v2876_v29  ;;  %2799 = vadd.xlane.f32.xlu1 %v2798_v13 }
 0x696   : > { %v5463_v10 = vpop.eup %5462  ;;  %5474 = vpow2.f32 %v2711_v57  ;;  %3012 = vmatmul.mubr.bf16.gmra.mrb[132].mxu1 %v2875_v27 }
 0x697   : > { %v5465_v51 = vpop.eup %5464  ;;  %5476 = vpow2.f32 %v2713_v41  ;;  %v2527_v16 = vpop.xlane.xlu0 %2526 }
 0x698   : > { %v5467_v34 = vpop.eup %5466  ;;  %v2591_v63 = vsub.f32 %v8148_v33, %v2527_v16  ;;  %v2592_v55 = vsub.f32 %v8149_v58, %v2527_v16  ;;  %v2801_v26 = vadd.f32 %v5465_v51, %v5463_v10 }
 0x699   : > { %v5469_v11 = vpop.eup %5468  ;;  %v2530_v49 = vpop.xlane.xlu1 %2529  ;;  %v2877_v7 = vpack.c.bf16 %v5467_v34, %v5463_v10 }
 0x69a   : > { %v2715_v19 = vmul.f32 1.442695, %v2591_v63  ;;  %v2717_v32 = vmul.f32 1.442695, %v2592_v55  ;;  %2802 = vadd.xlane.f32.xlu0 %v2801_v26  ;;  %v2593_v21 = vsub.f32 %v7008_v6, %v2530_v49  ;;  %v2594_v18 = vsub.f32 %v8150_v48, %v2530_v49  ;;  %v8153_v26 = vld [vmem:[#allocation2_spill] sm:$0xff] }
 0x69b   : > { %v2878_v0 = vpack.c.bf16 %v5469_v11, %v5465_v51  ;;  %v2804_v2 = vadd.f32 %v5469_v11, %v5467_v34 }
 0x69c   : > { %5478 = vpow2.f32 %v2715_v19  ;;  %v2719_v31 = vmul.f32 1.442695, %v2593_v21  ;;  %v2721_v4 = vmul.f32 1.442695, %v2594_v18  ;;  %v8154_v19 = vld [vmem:[#allocation4_spill] sm:$0xff] }
 0x69d   : > { %5480 = vpow2.f32 %v2717_v32  ;;  %3019 = vmatprep.mubr.bf16.mxu1 %v2878_v0  ;;  %2805 = vadd.xlane.f32.xlu1 %v2804_v2 }
 0x69e   : > { %v5471_v12 = vpop.eup %5470  ;;  %5482 = vpow2.f32 %v2719_v31  ;;  %3020 = vmatmul.mubr.bf16.gmra.mrb[136].mxu1 %v2877_v7 }
 0x69f   : > { %v5473_v28 = vpop.eup %5472  ;;  %5484 = vpow2.f32 %v2721_v4 }
 0x6a0   : > { %v5475_v23 = vpop.eup %5474  ;;  %v2807_v47 = vadd.f32 %v5473_v28, %v5471_v12 }
 0x6a1   : > { %v5477_v40 = vpop.eup %5476  ;;  %v2879_v36 = vpack.c.bf16 %v5475_v23, %v5471_v12 }
 0x6a2   : > { %2808 = vadd.xlane.f32.xlu0 %v2807_v47  ;;  %v2880_v6 = vpack.c.bf16 %v5477_v40, %v5473_v28  ;;  %v2810_v5 = vadd.f32 %v5477_v40, %v5475_v23 }
 0x6a4   : > { %3027 = vmatprep.mubr.bf16.mxu1 %v2880_v6  ;;  %2811 = vadd.xlane.f32.xlu1 %v2810_v5  ;;  %v8155_v5 = vld [vmem:[#allocation7_spill] sm:$0xff] }
 0x6a6   : > { %v5479_v52 = vpop.eup %5478  ;;  %3028 = vmatmul.mubr.bf16.gmra.mrb[140].mxu1 %v2879_v36 }
 0x6a7   : > { %v5481_v59 = vpop.eup %5480 }
 0x6a8   : > { %v5483_v17 = vpop.eup %5482  ;;  %v2813_v3 = vadd.f32 %v5481_v59, %v5479_v52 }
 0x6a9   : > { %v5485_v60 = vpop.eup %5484  ;;  %v2881_v62 = vpack.c.bf16 %v5483_v17, %v5479_v52 }
 0x6aa   : > { %2814 = vadd.xlane.f32.xlu0 %v2813_v3  ;;  %v2882_v39 = vpack.c.bf16 %v5485_v60, %v5481_v59  ;;  %v2816_v30 = vadd.f32 %v5485_v60, %v5483_v17  ;;  %v8156_v3 = vld [vmem:[#allocation9_spill] sm:$0xff] }
 0x6ac   : > { %3035 = vmatprep.mubr.bf16.mxu1 %v2882_v39  ;;  %2817 = vadd.xlane.f32.xlu1 %v2816_v30 }
 0x6ae   : > { %3036 = vmatmul.mubr.bf16.gmra.mrb[144].mxu1 %v2881_v62 }
 0x6bf   : > { %v2725_v44 = vpop.xlane.xlu0 %2724 }
 0x6c0   : > { %5486 = vrcp.f32 %v2725_v44 }
 0x6c2   : > { %v2728_v35 = vpop.xlane.xlu1 %2727 }
 0x6c3   : > { %5488 = vrcp.f32 %v2728_v35 }
 0x6c7   : > { %v2731_v61 = vpop.xlane.xlu0 %2730 }
 0x6c8   : > { %5490 = vrcp.f32 %v2731_v61 }
 0x6ca   : > { %v2734_v42 = vpop.xlane.xlu1 %2733  ;;  %v5487_v56 = vpop.eup %5486 }
 0x6cb   : > { %5492 = vrcp.f32 %v2734_v42 }
 0x6cd   : > { %v5489_v53 = vpop.eup %5488 }
 0x6cf   : > { %v2737_v43 = vpop.xlane.xlu0 %2736 }
 0x6d0   : > { %5494 = vrcp.f32 %v2737_v43 }
 0x6d2   : > { %v2740_v50 = vpop.xlane.xlu1 %2739  ;;  %v5491_v51 = vpop.eup %5490 }
 0x6d3   : > { %5496 = vrcp.f32 %v2740_v50 }
 0x6d5   : > { %v5493_v58 = vpop.eup %5492 }
 0x6d7   : > { %v2743_v55 = vpop.xlane.xlu0 %2742 }
 0x6d8   : > { %5498 = vrcp.f32 %v2743_v55  ;;  %v8159_v55 = vld [vmem:[#allocation11_spill] sm:$0xff] }
 0x6da   : > { %v2746_v7 = vpop.xlane.xlu1 %2745  ;;  %v5495_v12 = vpop.eup %5494 }
 0x6db   : > { %5500 = vrcp.f32 %v2746_v7  ;;  %v8160_v7 = vld [vmem:[#allocation13_spill] sm:$0xff] }
 0x6dd   : > { %v5497_v36 = vpop.eup %5496 }
 0x6df   : > { %v2749_v6 = vpop.xlane.xlu0 %2748 }
 0x6e0   : > { %5502 = vrcp.f32 %v2749_v6 }
 0x6e2   : > { %v2752_v17 = vpop.xlane.xlu1 %2751 }
 0x6e3   : > { %5504 = vrcp.f32 %v2752_v17 }
 0x709   : > { %v4898_v15 = vpop.f32.mrb[84].mxu1 }
 0x70a   : > { %v4899_v46 = vpop.f32.mrb[85].mxu1 }
 0x70b   : > { %v4900_v14 = vadd.f32 %v4899_v46, %v4898_v15  ;;  %v4901_v9 = vpop.f32.mrb[86].mxu1  ;;  %v5499_v15 = vpop.eup %5498 }
 0x70c   : > { %v4902_v54 = vpop.f32.mrb[87].mxu1 }
 0x70d   : > { %v3044_v25 = vmul.f32 %v5487_v56, %v4900_v14  ;;  %v4903_v1 = vadd.f32 %v4902_v54, %v4901_v9  ;;  %v5501_v54 = vpop.eup %5500 }
 0x70f   : > { %v3076_v27 = vadd.f32 %v3044_v25, %v8151_v38  ;;  %v3045_v22 = vmul.f32 %v5489_v53, %v4903_v1  ;;  %v2755_v25 = vpop.xlane.xlu0 %2754  ;;  %v8157_v1 = vld [vmem:[#allocation6_spill] sm:$0xff]  ;;  %v2758_v38 = vpop.xlane.xlu1 %2757 }
 0x710   : > { %5506 = vrcp.f32 %v2755_v25 }
 0x711   : > { %v3077_v45 = vadd.f32 %v3045_v22, %v8152_v20  ;;  %v4904_v8 = vpop.f32.mrb[88].mxu1  ;;  %v7088_v37 = vadd.f32 %v7083_v24, %v3076_v27  ;;  %v8158_v27 = vld [vmem:[#allocation8_spill] sm:$0xff]  ;;  %5508 = vrcp.f32 %v2758_v38  ;;  %v8163_v38 = vld [vmem:[#allocation15_spill] sm:$0xff] }
 0x712   : > { %v4905_v29 = vpop.f32.mrb[89].mxu1 }
 0x713   : > { %v4906_v13 = vadd.f32 %v4905_v29, %v4904_v8  ;;  %v4907_v57 = vpop.f32.mrb[90].mxu1  ;;  %v3147_v41 = vsel %vm1223_vm4, %v7088_v37, 0.0  ;;  %v7093_v10 = vadd.f32 %v7083_v24, %v3077_v45 }
 0x714   : > { %v4908_v16 = vpop.f32.mrb[91].mxu1  ;;  %3148 = vadd.xlane.f32.xlu0 %v3147_v41  ;;  %v5503_v41 = vpop.eup %5502 }
 0x715   : > { %v3046_v34 = vmul.f32 %v5491_v51, %v4906_v13  ;;  %v4909_v33 = vadd.f32 %v4908_v16, %v4907_v57  ;;  %v3150_v63 = vsel %vm1223_vm4, %v7093_v10, 0.0 }
 0x716   : > { %3151 = vadd.xlane.f32.xlu1 %v3150_v63  ;;  %v5505_v63 = vpop.eup %5504 }
 0x717   : > { %v3078_v11 = vadd.f32 %v3046_v34, %v8153_v26  ;;  %v3047_v49 = vmul.f32 %v5493_v58, %v4909_v33  ;;  %v2761_v58 = vpop.xlane.xlu0 %2760 }
 0x718   : > { %5510 = vrcp.f32 %v2761_v58 }
 0x719   : > { %v3079_v32 = vadd.f32 %v3047_v49, %v8154_v19  ;;  %v4910_v21 = vpop.f32.mrb[92].mxu1  ;;  %v7100_v48 = vadd.f32 %v7083_v24, %v3078_v11  ;;  %v2764_v49 = vpop.xlane.xlu1 %2763 }
 0x71a   : > { %v4911_v18 = vpop.f32.mrb[93].mxu1  ;;  %5512 = vrcp.f32 %v2764_v49 }
 0x71b   : > { %v4912_v0 = vadd.f32 %v4911_v18, %v4910_v21  ;;  %v4913_v2 = vpop.f32.mrb[94].mxu1  ;;  %v3153_v31 = vsel %vm1223_vm4, %v7100_v48, 0.0  ;;  %v7105_v4 = vadd.f32 %v7083_v24, %v3079_v32 }
 0x71c   : > { %v4914_v28 = vpop.f32.mrb[95].mxu1  ;;  %3154 = vadd.xlane.f32.xlu0 %v3153_v31 }
 0x71d   : > { %v3048_v23 = vmul.f32 %v5495_v12, %v4912_v0  ;;  %v4915_v47 = vadd.f32 %v4914_v28, %v4913_v2  ;;  %v3156_v40 = vsel %vm1223_vm4, %v7105_v4, 0.0  ;;  %v5507_v28 = vpop.eup %5506 }
 0x71e   : > { %3157 = vadd.xlane.f32.xlu1 %v3156_v40  ;;  %v5509_v6 = vpop.eup %5508 }
 0x71f   : > { %v3080_v52 = vadd.f32 %v3048_v23, %v8155_v5  ;;  %v3049_v59 = vmul.f32 %v5497_v36, %v4915_v47  ;;  %v2767_v5 = vpop.xlane.xlu0 %2766 }
 0x720   : > { %5514 = vrcp.f32 %v2767_v5 }
 0x721   : > { %v3081_v60 = vadd.f32 %v3049_v59, %v8156_v3  ;;  %v4916_v62 = vpop.f32.mrb[96].mxu1  ;;  %v7112_v39 = vadd.f32 %v7083_v24, %v3080_v52  ;;  %v8161_v52 = vld [vmem:[#allocation10_spill] sm:$0xff]  ;;  %v2770_v3 = vpop.xlane.xlu1 %2769 }
 0x722   : > { %v4917_v30 = vpop.f32.mrb[97].mxu1  ;;  %5516 = vrcp.f32 %v2770_v3 }
 0x723   : > { %v4918_v44 = vadd.f32 %v4917_v30, %v4916_v62  ;;  %v4919_v35 = vpop.f32.mrb[98].mxu1  ;;  %v3159_v61 = vsel %vm1223_vm4, %v7112_v39, 0.0  ;;  %v7117_v42 = vadd.f32 %v7083_v24, %v3081_v60  ;;  %v8162_v60 = vld [vmem:[#allocation12_spill] sm:$0xff] }
 0x724   : > { %v4920_v46 = vpop.f32.mrb[99].mxu1  ;;  %3160 = vadd.xlane.f32.xlu0 %v3159_v61 }
 0x725   : > { %v3050_v14 = vmul.f32 %v5499_v15, %v4918_v44  ;;  %v4921_v9 = vadd.f32 %v4920_v46, %v4919_v35  ;;  %v3162_v56 = vsel %vm1223_vm4, %v7117_v42, 0.0 }
 0x726   : > { %3163 = vadd.xlane.f32.xlu1 %v3162_v56 }
 0x727   : > { %v3082_v53 = vadd.f32 %v3050_v14, %v8157_v1  ;;  %v3051_v43 = vmul.f32 %v5501_v54, %v4921_v9  ;;  %v5511_v9 = vpop.eup %5510 }
 0x729   : > { %v3083_v22 = vadd.f32 %v3051_v43, %v8158_v27  ;;  %v4922_v50 = vpop.f32.mrb[100].mxu1  ;;  %v7124_v20 = vadd.f32 %v7083_v24, %v3082_v53  ;;  %v5513_v53 = vpop.eup %5512 }
 0x72a   : > { %v4923_v45 = vpop.f32.mrb[101].mxu1  ;;  %v2773_v43 = vpop.xlane.xlu0 %2772 }
 0x72b   : > { %v4924_v8 = vadd.f32 %v4923_v45, %v4922_v50  ;;  %v4925_v29 = vpop.f32.mrb[102].mxu1  ;;  %v3165_v13 = vsel %vm1223_vm4, %v7124_v20, 0.0  ;;  %v7129_v57 = vadd.f32 %v7083_v24, %v3083_v22  ;;  %v2776_v50 = vpop.xlane.xlu1 %2775  ;;  %v8164_v45 = vld [vmem:[#allocation17_spill] sm:$0xff]  ;;  %5518 = vrcp.f32 %v2773_v43 }
 0x72c   : > { %v4926_v51 = vpop.f32.mrb[103].mxu1  ;;  %3166 = vadd.xlane.f32.xlu0 %v3165_v13  ;;  %5520 = vrcp.f32 %v2776_v50 }
 0x72d   : > { %v3052_v16 = vmul.f32 %v5503_v41, %v4924_v8  ;;  %v4927_v34 = vadd.f32 %v4926_v51, %v4925_v29  ;;  %v3168_v33 = vsel %vm1223_vm4, %v7129_v57, 0.0 }
 0x72e   : > { %3169 = vadd.xlane.f32.xlu1 %v3168_v33 }
 0x72f   : > { %v3084_v26 = vadd.f32 %v3052_v16, %v8159_v55  ;;  %v3053_v11 = vmul.f32 %v5505_v63, %v4927_v34  ;;  %v5515_v63 = vpop.eup %5514 }
 0x730   : > { %v5517_v49 = vpop.eup %5516 }
 0x731   : > { %v3085_v19 = vadd.f32 %v3053_v11, %v8160_v7  ;;  %v4928_v32 = vpop.f32.mrb[104].mxu1  ;;  %v7136_v21 = vadd.f32 %v7083_v24, %v3084_v26  ;;  %v2779_v7 = vpop.xlane.xlu0 %2778 }
 0x732   : > { %v4929_v18 = vpop.f32.mrb[105].mxu1  ;;  %5522 = vrcp.f32 %v2779_v7 }
 0x733   : > { %v4930_v0 = vadd.f32 %v4929_v18, %v4928_v32  ;;  %v4931_v2 = vpop.f32.mrb[106].mxu1  ;;  %v3171_v31 = vsel %vm1223_vm4, %v7136_v21, 0.0  ;;  %v7141_v12 = vadd.f32 %v7083_v24, %v3085_v19  ;;  %v8165_v19 = vld [vmem:[#allocation14_spill] sm:$0xff] }
 0x734   : > { %v4932_v23 = vpop.f32.mrb[107].mxu1  ;;  %3172 = vadd.xlane.f32.xlu0 %v3171_v31 }
 0x735   : > { %v3054_v47 = vmul.f32 %v5507_v28, %v4930_v0  ;;  %v4933_v40 = vadd.f32 %v4932_v23, %v4931_v2  ;;  %v3174_v36 = vsel %vm1223_vm4, %v7141_v12, 0.0  ;;  %v2782_v0 = vpop.xlane.xlu1 %2781  ;;  %v8166_v2 = vld [vmem:[#allocation16_spill] sm:$0xff] }
 0x736   : > { %3175 = vadd.xlane.f32.xlu1 %v3174_v36  ;;  %5524 = vrcp.f32 %v2782_v0 }
 0x737   : > { %v3086_v59 = vadd.f32 %v3054_v47, %v8161_v52  ;;  %v3055_v17 = vmul.f32 %v5509_v6, %v4933_v40  ;;  %v5519_v52 = vpop.eup %5518 }
 0x739   : > { %v3087_v62 = vadd.f32 %v3055_v17, %v8162_v60  ;;  %v4934_v30 = vpop.f32.mrb[108].mxu1  ;;  %v7148_v44 = vadd.f32 %v7083_v24, %v3086_v59 }
 0x73a   : > { %v4935_v35 = vpop.f32.mrb[109].mxu1 }
 0x73b   : > { %v4936_v61 = vadd.f32 %v4935_v35, %v4934_v30  ;;  %v4937_v15 = vpop.f32.mrb[110].mxu1  ;;  %v3177_v46 = vsel %vm1223_vm4, %v7148_v44, 0.0  ;;  %v7153_v14 = vadd.f32 %v7083_v24, %v3087_v62  ;;  %v5521_v62 = vpop.eup %5520  ;;  %v8168_v35 = vld [vmem:[#allocation19_spill] sm:$0xff] }
 0x73c   : > { %v4938_v56 = vpop.f32.mrb[111].mxu1  ;;  %3178 = vadd.xlane.f32.xlu0 %v3177_v46  ;;  %v2785_v30 = vpop.xlane.xlu0 %2784 }
 0x73d   : > { %v3056_v54 = vmul.f32 %v5511_v9, %v4936_v61  ;;  %v4939_v25 = vadd.f32 %v4938_v56, %v4937_v15  ;;  %v3180_v1 = vsel %vm1223_vm4, %v7153_v14, 0.0  ;;  %v2788_v46 = vpop.xlane.xlu1 %2787  ;;  %v8169_v9 = vld [vmem:[#allocation21_spill] sm:$0xff]  ;;  %5526 = vrcp.f32 %v2785_v30 }
 0x73e   : > { %3181 = vadd.xlane.f32.xlu1 %v3180_v1  ;;  %5528 = vrcp.f32 %v2788_v46 }
 0x73f   : > { %v3088_v27 = vadd.f32 %v3056_v54, %v8163_v38  ;;  %v3057_v22 = vmul.f32 %v5513_v53, %v4939_v25 }
 0x741   : > { %v3089_v8 = vadd.f32 %v3057_v22, %v8164_v45  ;;  %v4940_v29 = vpop.f32.mrb[112].mxu1  ;;  %v7160_v13 = vadd.f32 %v7083_v24, %v3088_v27  ;;  %v5523_v22 = vpop.eup %5522 }
 0x742   : > { %v4941_v41 = vpop.f32.mrb[113].mxu1 }
 0x743   : > { %v4942_v51 = vadd.f32 %v4941_v41, %v4940_v29  ;;  %v4943_v16 = vpop.f32.mrb[114].mxu1  ;;  %v3183_v34 = vsel %vm1223_vm4, %v7160_v13, 0.0  ;;  %v7165_v33 = vadd.f32 %v7083_v24, %v3089_v8  ;;  %v5525_v41 = vpop.eup %5524 }
 0x744   : > { %v4944_v58 = vpop.f32.mrb[115].mxu1  ;;  %3184 = vadd.xlane.f32.xlu0 %v3183_v34 }
 0x745   : > { %v3058_v55 = vmul.f32 %v5515_v63, %v4942_v51  ;;  %v4945_v26 = vadd.f32 %v4944_v58, %v4943_v16  ;;  %v3186_v11 = vsel %vm1223_vm4, %v7165_v33, 0.0  ;;  %v2791_v51 = vpop.xlane.xlu0 %2790  ;;  %v8172_v16 = vld [vmem:[#allocation18_spill] sm:$0xff]  ;;  %v2794_v58 = vpop.xlane.xlu1 %2793 }
 0x746   : > { %3187 = vadd.xlane.f32.xlu1 %v3186_v11  ;;  %5530 = vrcp.f32 %v2791_v51  ;;  %v8181_v51 = vld [vmem:[#allocation25_spill] sm:$0xff] }
 0x747   : > { %v3090_v32 = vadd.f32 %v3058_v55, %v8165_v19  ;;  %v3059_v18 = vmul.f32 %v5517_v49, %v4945_v26  ;;  %v8173_v55 = vld [vmem:[#allocation20_spill] sm:$0xff]  ;;  %5532 = vrcp.f32 %v2794_v58 }
 0x749   : > { %v3091_v31 = vadd.f32 %v3059_v18, %v8166_v2  ;;  %v4946_v28 = vpop.f32.mrb[116].mxu1  ;;  %v7172_v23 = vadd.f32 %v7083_v24, %v3090_v32  ;;  %v5527_v2 = vpop.eup %5526 }
 0x74a   : > { %v4947_v47 = vpop.f32.mrb[117].mxu1 }
 0x74b   : > { %v4948_v40 = vadd.f32 %v4947_v47, %v4946_v28  ;;  %v4949_v36 = vpop.f32.mrb[118].mxu1  ;;  %v3189_v6 = vsel %vm1223_vm4, %v7172_v23, 0.0  ;;  %v7177_v5 = vadd.f32 %v7083_v24, %v3091_v31 }
 0x74c   : > { %v4950_v59 = vpop.f32.mrb[119].mxu1  ;;  %3190 = vadd.xlane.f32.xlu0 %v3189_v6  ;;  %v2797_v6 = vpop.xlane.xlu0 %2796 }
 0x74d   : > { %8167 = vst [vmem:[#allocation34_spill] sm:$0xff] %v7177_v5  ;;  %v3060_v17 = vmul.f32 %v5519_v52, %v4948_v40  ;;  %v4951_v3 = vadd.f32 %v4950_v59, %v4949_v36  ;;  %v3192_v60 = vsel %vm1223_vm4, %v7177_v5, 0.0  ;;  %v5529_v36 = vpop.eup %5528  ;;  %v8176_v52 = vld [vmem:[#allocation22_spill] sm:$0xff]  ;;  %5534 = vrcp.f32 %v2797_v6 }
 0x74e   : > { %3193 = vadd.xlane.f32.xlu1 %v3192_v60  ;;  %v8177_v60 = vld [vmem:[#allocation23_spill] sm:$0xff] }
 0x74f   : > { %v3092_v61 = vadd.f32 %v3060_v17, %v8168_v35  ;;  %v3061_v15 = vmul.f32 %v5521_v62, %v4951_v3  ;;  %v2800_v3 = vpop.xlane.xlu1 %2799 }
 0x750   : > { %5536 = vrcp.f32 %v2800_v3 }
 0x751   : > { %v3093_v56 = vadd.f32 %v3061_v15, %v8169_v9  ;;  %v4952_v54 = vpop.f32.mrb[120].mxu1  ;;  %v7184_v25 = vadd.f32 %v7083_v24, %v3092_v61 }
 0x752   : > { %v4953_v1 = vpop.f32.mrb[121].mxu1 }
 0x753   : > { %8170 = vst [vmem:[#allocation35_spill] sm:$0xff] %v7184_v25  ;;  %v4954_v53 = vadd.f32 %v4953_v1, %v4952_v54  ;;  %v4955_v43 = vpop.f32.mrb[122].mxu1  ;;  %v3195_v38 = vsel %vm1223_vm4, %v7184_v25, 0.0  ;;  %v7189_v27 = vadd.f32 %v7083_v24, %v3093_v56  ;;  %v5531_v54 = vpop.eup %5530 }
 0x754   : > { %v4956_v50 = vpop.f32.mrb[123].mxu1  ;;  %3196 = vadd.xlane.f32.xlu0 %v3195_v38 }
 0x755   : > { %8171 = vst [vmem:[#allocation36_spill] sm:$0xff] %v7189_v27  ;;  %v3062_v45 = vmul.f32 %v5523_v22, %v4954_v53  ;;  %v4957_v8 = vadd.f32 %v4956_v50, %v4955_v43  ;;  %v3198_v29 = vsel %vm1223_vm4, %v7189_v27, 0.0  ;;  %v5533_v22 = vpop.eup %5532  ;;  %v2803_v50 = vpop.xlane.xlu0 %2802 }
 0x756   : > { %3199 = vadd.xlane.f32.xlu1 %v3198_v29  ;;  %5538 = vrcp.f32 %v2803_v50  ;;  %v8188_v50 = vld [vmem:[#allocation28_spill] sm:$0xff] }
 0x757   : > { %v3094_v34 = vadd.f32 %v3062_v45, %v8172_v16  ;;  %v3063_v63 = vmul.f32 %v5525_v41, %v4957_v8  ;;  %v8180_v45 = vld [vmem:[#allocation24_spill] sm:$0xff]  ;;  %v2806_v41 = vpop.xlane.xlu1 %2805 }
 0x758   : > { %5540 = vrcp.f32 %v2806_v41  ;;  %v8189_v41 = vld [vmem:[#allocation29_spill] sm:$0xff] }
 0x759   : > { %v3095_v26 = vadd.f32 %v3063_v63, %v8173_v55  ;;  %v4958_v11 = vpop.f32.mrb[124].mxu1  ;;  %v7196_v49 = vadd.f32 %v7083_v24, %v3094_v34 }
 0x75a   : > { %v4959_v7 = vpop.f32.mrb[125].mxu1 }
 0x75b   : > { %8174 = vst [vmem:[#allocation37_spill] sm:$0xff] %v7196_v49  ;;  %v4960_v19 = vadd.f32 %v4959_v7, %v4958_v11  ;;  %v4961_v32 = vpop.f32.mrb[126].mxu1  ;;  %v3201_v18 = vsel %vm1223_vm4, %v7196_v49, 0.0  ;;  %v7201_v0 = vadd.f32 %v7083_v24, %v3095_v26 }
 0x75c   : > { %v4962_v31 = vpop.f32.mrb[127].mxu1  ;;  %3202 = vadd.xlane.f32.xlu0 %v3201_v18 }
 0x75d   : > { %8175 = vst [vmem:[#allocation38_spill] sm:$0xff] %v7201_v0  ;;  %v3064_v28 = vmul.f32 %v5527_v2, %v4960_v19  ;;  %v4963_v47 = vadd.f32 %v4962_v31, %v4961_v32  ;;  %v3204_v40 = vsel %vm1223_vm4, %v7201_v0, 0.0  ;;  %v5535_v19 = vpop.eup %5534 }
 0x75e   : > { %3205 = vadd.xlane.f32.xlu1 %v3204_v40  ;;  %v8184_v40 = vld [vmem:[#allocation26_spill] sm:$0xff] }
 0x75f   : > { %v3096_v59 = vadd.f32 %v3064_v28, %v8176_v52  ;;  %v3065_v17 = vmul.f32 %v5529_v36, %v4963_v47  ;;  %v5537_v28 = vpop.eup %5536  ;;  %v2809_v47 = vpop.xlane.xlu0 %2808 }
 0x760   : > { %v2812_v52 = vpop.xlane.xlu1 %2811  ;;  %5542 = vrcp.f32 %v2809_v47 }
 0x761   : > { %v3097_v62 = vadd.f32 %v3065_v17, %v8177_v60  ;;  %v4964_v30 = vpop.f32.mrb[128].mxu1  ;;  %v7208_v35 = vadd.f32 %v7083_v24, %v3096_v59  ;;  %v8185_v59 = vld [vmem:[#allocation27_spill] sm:$0xff]  ;;  %5544 = vrcp.f32 %v2812_v52 }
 0x762   : > { %v4965_v61 = vpop.f32.mrb[129].mxu1  ;;  %v8193_v52 = vld [vmem:[#allocation31_spill] sm:$0xff] }
 0x763   : > { %8178 = vst [vmem:[#allocation39_spill] sm:$0xff] %v7208_v35  ;;  %v4966_v15 = vadd.f32 %v4965_v61, %v4964_v30  ;;  %v4967_v46 = vpop.f32.mrb[130].mxu1  ;;  %v3207_v9 = vsel %vm1223_vm4, %v7208_v35, 0.0  ;;  %v7213_v56 = vadd.f32 %v7083_v24, %v3097_v62 }
 0x764   : > { %v4968_v1 = vpop.f32.mrb[131].mxu1  ;;  %3208 = vadd.xlane.f32.xlu0 %v3207_v9  ;;  %v5539_v9 = vpop.eup %5538 }
 0x765   : > { %8179 = vst [vmem:[#allocation40_spill] sm:$0xff] %v7213_v56  ;;  %v3066_v53 = vmul.f32 %v5531_v54, %v4966_v15  ;;  %v4969_v43 = vadd.f32 %v4968_v1, %v4967_v46  ;;  %v3210_v38 = vsel %vm1223_vm4, %v7213_v56, 0.0 }
 0x766   : > { %3211 = vadd.xlane.f32.xlu1 %v3210_v38  ;;  %v5541_v38 = vpop.eup %5540 }
 0x767   : > { %v3098_v8 = vadd.f32 %v3066_v53, %v8180_v45  ;;  %v3067_v29 = vmul.f32 %v5533_v22, %v4969_v43  ;;  %v2815_v22 = vpop.xlane.xlu0 %2814 }
 0x768   : > { %5546 = vrcp.f32 %v2815_v22 }
 0x769   : > { %v3099_v16 = vadd.f32 %v3067_v29, %v8181_v51  ;;  %v4970_v34 = vpop.f32.mrb[132].mxu1  ;;  %v7220_v63 = vadd.f32 %v7083_v24, %v3098_v8  ;;  %v2818_v29 = vpop.xlane.xlu1 %2817 }
 0x76a   : > { %v4971_v58 = vpop.f32.mrb[133].mxu1  ;;  %5548 = vrcp.f32 %v2818_v29  ;;  %v8197_v29 = vld [vmem:[#allocation33_spill] sm:$0xff] }
 0x76b   : > { %8182 = vst [vmem:[#allocation41_spill] sm:$0xff] %v7220_v63  ;;  %v4972_v55 = vadd.f32 %v4971_v58, %v4970_v34  ;;  %v4973_v26 = vpop.f32.mrb[134].mxu1  ;;  %v3213_v11 = vsel %vm1223_vm4, %v7220_v63, 0.0  ;;  %v7225_v7 = vadd.f32 %v7083_v24, %v3099_v16 }
 0x76c   : > { %v4974_v32 = vpop.f32.mrb[135].mxu1  ;;  %3214 = vadd.xlane.f32.xlu0 %v3213_v11 }
 0x76d   : > { %8183 = vst [vmem:[#allocation42_spill] sm:$0xff] %v7225_v7  ;;  %v3068_v18 = vmul.f32 %v5535_v19, %v4972_v55  ;;  %v4975_v2 = vadd.f32 %v4974_v32, %v4973_v26  ;;  %v3216_v31 = vsel %vm1223_vm4, %v7225_v7, 0.0  ;;  %v5543_v32 = vpop.eup %5542 }
 0x76e   : > { %3217 = vadd.xlane.f32.xlu1 %v3216_v31  ;;  %v5545_v47 = vpop.eup %5544 }
 0x76f   : > { %v3100_v36 = vadd.f32 %v3068_v18, %v8184_v40  ;;  %v3069_v6 = vmul.f32 %v5537_v28, %v4975_v2  ;;  %v8192_v40 = vld [vmem:[#allocation30_spill] sm:$0xff] }
 0x771   : > { %v3101_v17 = vadd.f32 %v3069_v6, %v8185_v59  ;;  %v4976_v3 = vpop.f32.mrb[136].mxu1  ;;  %v7232_v60 = vadd.f32 %v7083_v24, %v3100_v36 }
 0x772   : > { %v4977_v62 = vpop.f32.mrb[137].mxu1 }
 0x773   : > { %8186 = vst [vmem:[#allocation43_spill] sm:$0xff] %v7232_v60  ;;  %v4978_v30 = vadd.f32 %v4977_v62, %v4976_v3  ;;  %v4979_v61 = vpop.f32.mrb[138].mxu1  ;;  %v3219_v15 = vsel %vm1223_vm4, %v7232_v60, 0.0  ;;  %v7237_v46 = vadd.f32 %v7083_v24, %v3101_v17 }
 0x774   : > { %v4980_v54 = vpop.f32.mrb[139].mxu1  ;;  %3220 = vadd.xlane.f32.xlu0 %v3219_v15 }
 0x775   : > { %8187 = vst [vmem:[#allocation44_spill] sm:$0xff] %v7237_v46  ;;  %v3070_v1 = vmul.f32 %v5539_v9, %v4978_v30  ;;  %v4981_v53 = vadd.f32 %v4980_v54, %v4979_v61  ;;  %v3222_v43 = vsel %vm1223_vm4, %v7237_v46, 0.0  ;;  %v5547_v54 = vpop.eup %5546 }
 0x776   : > { %3223 = vadd.xlane.f32.xlu1 %v3222_v43  ;;  %v5549_v22 = vpop.eup %5548 }
 0x777   : > { %v3102_v45 = vadd.f32 %v3070_v1, %v8188_v50  ;;  %v3071_v8 = vmul.f32 %v5541_v38, %v4981_v53  ;;  %v8196_v50 = vld [vmem:[#allocation32_spill] sm:$0xff] }
 0x779   : > { %v3103_v51 = vadd.f32 %v3071_v8, %v8189_v41  ;;  %v4982_v16 = vpop.f32.mrb[140].mxu1  ;;  %v7244_v34 = vadd.f32 %v7083_v24, %v3102_v45 }
 0x77a   : > { %v4983_v58 = vpop.f32.mrb[141].mxu1 }
 0x77b   : > { %8190 = vst [vmem:[#allocation45_spill] sm:$0xff] %v7244_v34  ;;  %v4984_v55 = vadd.f32 %v4983_v58, %v4982_v16  ;;  %v4985_v26 = vpop.f32.mrb[142].mxu1  ;;  %v3225_v11 = vsel %vm1223_vm4, %v7244_v34, 0.0  ;;  %v7249_v19 = vadd.f32 %v7083_v24, %v3103_v51 }
 0x77c   : > { %v4986_v18 = vpop.f32.mrb[143].mxu1  ;;  %3226 = vadd.xlane.f32.xlu0 %v3225_v11 }
 0x77d   : > { %8191 = vst [vmem:[#allocation46_spill] sm:$0xff] %v7249_v19  ;;  %v3072_v2 = vmul.f32 %v5543_v32, %v4984_v55  ;;  %v4987_v31 = vadd.f32 %v4986_v18, %v4985_v26  ;;  %v3228_v28 = vsel %vm1223_vm4, %v7249_v19, 0.0  ;;  %v5282_v26 = vld [vmem:[%s7998_s12] sm:$0xff]  }
 0x77e   : > { %3229 = vadd.xlane.f32.xlu1 %v3228_v28  ;;  %5147 = vmatprep.subr.bf16.mxu0 %v5282_v26 }
 0x77f   : > { %v3104_v36 = vadd.f32 %v3072_v2, %v8192_v40  ;;  %v3073_v6 = vmul.f32 %v5545_v47, %v4987_v31  ;;  %5148 = vmatpush3.bf16.msra.mxu0 %v5282_v26 }
 0x781   : > { %v3105_v59 = vadd.f32 %v3073_v6, %v8193_v52  ;;  %v4988_v17 = vpop.f32.mrb[144].mxu1  ;;  %v7256_v3 = vadd.f32 %v7083_v24, %v3104_v36 }
 0x782   : > { %v4989_v62 = vpop.f32.mrb[145].mxu1 }
 0x783   : > { %8194 = vst [vmem:[#allocation3_spill] sm:$0xff] %v7256_v3  ;;  %v4990_v30 = vadd.f32 %v4989_v62, %v4988_v17  ;;  %v4991_v61 = vpop.f32.mrb[146].mxu1  ;;  %v3231_v15 = vsel %vm1223_vm4, %v7256_v3, 0.0  ;;  %v7261_v9 = vadd.f32 %v7083_v24, %v3105_v59 }
 0x784   : > { %3232 = vadd.xlane.f32.xlu0 %v3231_v15  ;;  %v4992_v1 = vpop.f32.mrb[147].mxu1 }
 0x785   : > { %8195 = vst [vmem:[#allocation5_spill] sm:$0xff] %v7261_v9  ;;  %v3074_v53 = vmul.f32 %v5547_v54, %v4990_v30  ;;  %v4993_v43 = vadd.f32 %v4992_v1, %v4991_v61  ;;  %v3234_v38 = vsel %vm1223_vm4, %v7261_v9, 0.0 }
 0x786   : > { %3235 = vadd.xlane.f32.xlu1 %v3234_v38 }
 0x787   : > { %v3106_v45 = vadd.f32 %v3074_v53, %v8196_v50  ;;  %v3075_v8 = vmul.f32 %v5549_v22, %v4993_v43 }
 0x789   : > { %v3107_v41 = vadd.f32 %v3075_v8, %v8197_v29  ;;  %v7268_v51 = vadd.f32 %v7083_v24, %v3106_v45 }
 0x78b   : > { %8198 = vst [vmem:[#allocation2_spill] sm:$0xff] %v7268_v51  ;;  %v3237_v16 = vsel %vm1223_vm4, %v7268_v51, 0.0  ;;  %v7273_v58 = vadd.f32 %v7083_v24, %v3107_v41 }
 0x78c   : > { %3238 = vadd.xlane.f32.xlu0 %v3237_v16 }
 0x78d   : > { %8199 = vst [vmem:[#allocation4_spill] sm:$0xff] %v7273_v58  ;;  %v3240_v55 = vsel %vm1223_vm4, %v7273_v58, 0.0 }
 0x78e   : > { %3241 = vadd.xlane.f32.xlu1 %v3240_v55 }
 0x7a1   : > { %v3149_v11 = vpop.xlane.xlu0 %3148 }
 0x7a2   : > { %v3243_v32 = vmul.f32 0.03125, %v3149_v11 }
 0x7a3   : > { %v3152_v18 = vpop.xlane.xlu1 %3151 }
 0x7a4   : > { %v7281_v2 = vsub.f32 %v7088_v37, %v3243_v32  ;;  %v3244_v31 = vmul.f32 0.03125, %v3152_v18 }
 0x7a6   : > { %v7284_v24 = vsub.f32 %v7093_v10, %v3244_v31  ;;  %v3307_v28 = vmul.f32 %v7281_v2, %v7281_v2 }
 0x7a8   : > { %v3339_v47 = vsel %vm1223_vm4, %v3307_v28, 0.0  ;;  %v3308_v40 = vmul.f32 %v7284_v24, %v7284_v24 }
 0x7a9   : > { %v3155_v36 = vpop.xlane.xlu0 %3154  ;;  %3340 = vadd.xlane.f32.xlu0 %v3339_v47 }
 0x7aa   : > { %v3245_v6 = vmul.f32 0.03125, %v3155_v36  ;;  %v3342_v52 = vsel %vm1223_vm4, %v3308_v40, 0.0 }
 0x7ab   : > { %3343 = vadd.xlane.f32.xlu1 %v3342_v52  ;;  %v3158_v59 = vpop.xlane.xlu1 %3157 }
 0x7ac   : > { %v7293_v17 = vsub.f32 %v7100_v48, %v3245_v6  ;;  %v3246_v62 = vmul.f32 0.03125, %v3158_v59 }
 0x7ae   : > { %v7296_v30 = vsub.f32 %v7105_v4, %v3246_v62  ;;  %v3309_v61 = vmul.f32 %v7293_v17, %v7293_v17 }
 0x7b0   : > { %v3345_v15 = vsel %vm1223_vm4, %v3309_v61, 0.0  ;;  %v3310_v54 = vmul.f32 %v7296_v30, %v7296_v30 }
 0x7b1   : > { %v3161_v1 = vpop.xlane.xlu0 %3160  ;;  %3346 = vadd.xlane.f32.xlu0 %v3345_v15 }
 0x7b2   : > { %v3247_v53 = vmul.f32 0.03125, %v3161_v1  ;;  %v3348_v43 = vsel %vm1223_vm4, %v3310_v54, 0.0 }
 0x7b3   : > { %3349 = vadd.xlane.f32.xlu1 %v3348_v43  ;;  %v3164_v38 = vpop.xlane.xlu1 %3163 }
 0x7b4   : > { %v7305_v22 = vsub.f32 %v7112_v39, %v3247_v53  ;;  %v3248_v50 = vmul.f32 0.03125, %v3164_v38 }
 0x7b6   : > { %v7308_v45 = vsub.f32 %v7117_v42, %v3248_v50  ;;  %v3311_v8 = vmul.f32 %v7305_v22, %v7305_v22 }
 0x7b8   : > { %v3351_v29 = vsel %vm1223_vm4, %v3311_v8, 0.0  ;;  %v3312_v41 = vmul.f32 %v7308_v45, %v7308_v45 }
 0x7b9   : > { %v3167_v16 = vpop.xlane.xlu0 %3166  ;;  %3352 = vadd.xlane.f32.xlu0 %v3351_v29 }
 0x7ba   : > { %v3249_v55 = vmul.f32 0.03125, %v3167_v16  ;;  %v3354_v26 = vsel %vm1223_vm4, %v3312_v41, 0.0 }
 0x7bb   : > { %3355 = vadd.xlane.f32.xlu1 %v3354_v26  ;;  %v3170_v11 = vpop.xlane.xlu1 %3169 }
 0x7bc   : > { %v7317_v32 = vsub.f32 %v7124_v20, %v3249_v55  ;;  %v3250_v18 = vmul.f32 0.03125, %v3170_v11 }
 0x7be   : > { %v7320_v31 = vsub.f32 %v7129_v57, %v3250_v18  ;;  %v3313_v28 = vmul.f32 %v7317_v32, %v7317_v32 }
 0x7c0   : > { %v3357_v47 = vsel %vm1223_vm4, %v3313_v28, 0.0  ;;  %v3314_v40 = vmul.f32 %v7320_v31, %v7320_v31 }
 0x7c1   : > { %v3173_v36 = vpop.xlane.xlu0 %3172  ;;  %3358 = vadd.xlane.f32.xlu0 %v3357_v47 }
 0x7c2   : > { %v3251_v6 = vmul.f32 0.03125, %v3173_v36  ;;  %v3360_v52 = vsel %vm1223_vm4, %v3314_v40, 0.0  ;;  %v5283_v40 = vld [vmem:[%s7998_s12 + $0x8] sm:$0xff]  }
 0x7c3   : > { %3361 = vadd.xlane.f32.xlu1 %v3360_v52  ;;  %v3176_v59 = vpop.xlane.xlu1 %3175  ;;  %5149 = vmatprep.subr.bf16.mxu0 %v5283_v40 }
 0x7c4   : > { %v7329_v62 = vsub.f32 %v7136_v21, %v3251_v6  ;;  %v3252_v61 = vmul.f32 0.03125, %v3176_v59  ;;  %5150 = vmatpush3.bf16.msra.mxu0 %v5283_v40 }
 0x7c6   : > { %v7332_v15 = vsub.f32 %v7141_v12, %v3252_v61  ;;  %v3315_v54 = vmul.f32 %v7329_v62, %v7329_v62 }
 0x7c8   : > { %v3363_v1 = vsel %vm1223_vm4, %v3315_v54, 0.0  ;;  %v3316_v53 = vmul.f32 %v7332_v15, %v7332_v15 }
 0x7c9   : > { %v3179_v43 = vpop.xlane.xlu0 %3178  ;;  %3364 = vadd.xlane.f32.xlu0 %v3363_v1 }
 0x7ca   : > { %v3253_v38 = vmul.f32 0.03125, %v3179_v43  ;;  %v3366_v50 = vsel %vm1223_vm4, %v3316_v53, 0.0 }
 0x7cb   : > { %3367 = vadd.xlane.f32.xlu1 %v3366_v50  ;;  %v3182_v8 = vpop.xlane.xlu1 %3181 }
 0x7cc   : > { %v7341_v29 = vsub.f32 %v7148_v44, %v3253_v38  ;;  %v3254_v41 = vmul.f32 0.03125, %v3182_v8 }
 0x7ce   : > { %v7344_v16 = vsub.f32 %v7153_v14, %v3254_v41  ;;  %v3317_v55 = vmul.f32 %v7341_v29, %v7341_v29 }
 0x7d0   : > { %v3369_v26 = vsel %vm1223_vm4, %v3317_v55, 0.0  ;;  %v3318_v11 = vmul.f32 %v7344_v16, %v7344_v16 }
 0x7d1   : > { %v3185_v18 = vpop.xlane.xlu0 %3184  ;;  %3370 = vadd.xlane.f32.xlu0 %v3369_v26 }
 0x7d2   : > { %v3255_v28 = vmul.f32 0.03125, %v3185_v18  ;;  %v3372_v47 = vsel %vm1223_vm4, %v3318_v11, 0.0 }
 0x7d3   : > { %3373 = vadd.xlane.f32.xlu1 %v3372_v47  ;;  %v3188_v36 = vpop.xlane.xlu1 %3187 }
 0x7d4   : > { %v7356_v6 = vsub.f32 %v7160_v13, %v3255_v28  ;;  %v3256_v52 = vmul.f32 0.03125, %v3188_v36 }
 0x7d6   : > { %v7359_v59 = vsub.f32 %v7165_v33, %v3256_v52  ;;  %v3319_v61 = vmul.f32 %v7356_v6, %v7356_v6 }
 0x7d8   : > { %v3375_v54 = vsel %vm1223_vm4, %v3319_v61, 0.0  ;;  %v3320_v1 = vmul.f32 %v7359_v59, %v7359_v59 }
 0x7d9   : > { %v3191_v53 = vpop.xlane.xlu0 %3190  ;;  %3376 = vadd.xlane.f32.xlu0 %v3375_v54 }
 0x7da   : > { %v3257_v43 = vmul.f32 0.03125, %v3191_v53  ;;  %v3378_v38 = vsel %vm1223_vm4, %v3320_v1, 0.0 }
 0x7db   : > { %3379 = vadd.xlane.f32.xlu1 %v3378_v38  ;;  %v3194_v50 = vpop.xlane.xlu1 %3193 }
 0x7dc   : > { %v7368_v8 = vsub.f32 %v7172_v23, %v3257_v43  ;;  %v3258_v41 = vmul.f32 0.03125, %v3194_v50 }
 0x7de   : > { %v7371_v55 = vsub.f32 %v7177_v5, %v3258_v41  ;;  %v3321_v26 = vmul.f32 %v7368_v8, %v7368_v8 }
 0x7e0   : > { %v3381_v11 = vsel %vm1223_vm4, %v3321_v26, 0.0  ;;  %v3322_v18 = vmul.f32 %v7371_v55, %v7371_v55 }
 0x7e1   : > { %v3197_v28 = vpop.xlane.xlu0 %3196  ;;  %3382 = vadd.xlane.f32.xlu0 %v3381_v11 }
 0x7e2   : > { %v3259_v47 = vmul.f32 0.03125, %v3197_v28  ;;  %v3384_v40 = vsel %vm1223_vm4, %v3322_v18, 0.0 }
 0x7e3   : > { %3385 = vadd.xlane.f32.xlu1 %v3384_v40  ;;  %v3200_v36 = vpop.xlane.xlu1 %3199 }
 0x7e4   : > { %v7380_v52 = vsub.f32 %v7184_v25, %v3259_v47  ;;  %v3260_v61 = vmul.f32 0.03125, %v3200_v36 }
 0x7e6   : > { %v7383_v54 = vsub.f32 %v7189_v27, %v3260_v61  ;;  %v3323_v1 = vmul.f32 %v7380_v52, %v7380_v52 }
 0x7e8   : > { %v3387_v53 = vsel %vm1223_vm4, %v3323_v1, 0.0  ;;  %v3324_v43 = vmul.f32 %v7383_v54, %v7383_v54 }
 0x7e9   : > { %v3203_v38 = vpop.xlane.xlu0 %3202  ;;  %3388 = vadd.xlane.f32.xlu0 %v3387_v53 }
 0x7ea   : > { %v3261_v50 = vmul.f32 0.03125, %v3203_v38  ;;  %v3390_v41 = vsel %vm1223_vm4, %v3324_v43, 0.0 }
 0x7eb   : > { %3391 = vadd.xlane.f32.xlu1 %v3390_v41  ;;  %v3206_v26 = vpop.xlane.xlu1 %3205 }
 0x7ec   : > { %v7392_v11 = vsub.f32 %v7196_v49, %v3261_v50  ;;  %v3262_v18 = vmul.f32 0.03125, %v3206_v26 }
 0x7ee   : > { %v7395_v28 = vsub.f32 %v7201_v0, %v3262_v18  ;;  %v3325_v47 = vmul.f32 %v7392_v11, %v7392_v11 }
 0x7f0   : > { %v3393_v40 = vsel %vm1223_vm4, %v3325_v47, 0.0  ;;  %v3326_v36 = vmul.f32 %v7395_v28, %v7395_v28 }
 0x7f1   : > { %v3209_v61 = vpop.xlane.xlu0 %3208  ;;  %3394 = vadd.xlane.f32.xlu0 %v3393_v40 }
 0x7f2   : > { %v3263_v1 = vmul.f32 0.03125, %v3209_v61  ;;  %v3396_v53 = vsel %vm1223_vm4, %v3326_v36, 0.0 }
 0x7f3   : > { %3397 = vadd.xlane.f32.xlu1 %v3396_v53  ;;  %v3212_v43 = vpop.xlane.xlu1 %3211 }
 0x7f4   : > { %v7404_v38 = vsub.f32 %v7208_v35, %v3263_v1  ;;  %v3264_v50 = vmul.f32 0.03125, %v3212_v43 }
 0x7f6   : > { %v7407_v41 = vsub.f32 %v7213_v56, %v3264_v50  ;;  %v3327_v26 = vmul.f32 %v7404_v38, %v7404_v38 }
 0x7f8   : > { %v3399_v18 = vsel %vm1223_vm4, %v3327_v26, 0.0  ;;  %v3328_v47 = vmul.f32 %v7407_v41, %v7407_v41 }
 0x7f9   : > { %v3215_v40 = vpop.xlane.xlu0 %3214  ;;  %3400 = vadd.xlane.f32.xlu0 %v3399_v18 }
 0x7fa   : > { %v3265_v36 = vmul.f32 0.03125, %v3215_v40  ;;  %v3402_v61 = vsel %vm1223_vm4, %v3328_v47, 0.0 }
 0x7fb   : > { %3403 = vadd.xlane.f32.xlu1 %v3402_v61  ;;  %v3218_v1 = vpop.xlane.xlu1 %3217 }
 0x7fc   : > { %v7416_v53 = vsub.f32 %v7220_v63, %v3265_v36  ;;  %v3266_v43 = vmul.f32 0.03125, %v3218_v1 }
 0x7fe   : > { %v7419_v50 = vsub.f32 %v7225_v7, %v3266_v43  ;;  %v3329_v26 = vmul.f32 %v7416_v53, %v7416_v53 }
 0x800   : > { %v3405_v56 = vsel %vm1223_vm4, %v3329_v26, 0.0  ;;  %v3330_v18 = vmul.f32 %v7419_v50, %v7419_v50 }
 0x801   : > { %v3221_v40 = vpop.xlane.xlu0 %3220  ;;  %3406 = vadd.xlane.f32.xlu0 %v3405_v56 }
 0x802   : > { %v3267_v47 = vmul.f32 0.03125, %v3221_v40  ;;  %v3408_v61 = vsel %vm1223_vm4, %v3330_v18, 0.0 }
 0x803   : > { %3409 = vadd.xlane.f32.xlu1 %v3408_v61  ;;  %v3224_v36 = vpop.xlane.xlu1 %3223 }
 0x804   : > { %v7428_v1 = vsub.f32 %v7232_v60, %v3267_v47  ;;  %v3268_v43 = vmul.f32 0.03125, %v3224_v36 }
 0x806   : > { %v7431_v7 = vsub.f32 %v7237_v46, %v3268_v43  ;;  %v3331_v26 = vmul.f32 %v7428_v1, %v7428_v1 }
 0x808   : > { %v3411_v63 = vsel %vm1223_vm4, %v3331_v26, 0.0  ;;  %v3332_v56 = vmul.f32 %v7431_v7, %v7431_v7 }
 0x809   : > { %v3227_v40 = vpop.xlane.xlu0 %3226  ;;  %3412 = vadd.xlane.f32.xlu0 %v3411_v63 }
 0x80a   : > { %v3269_v18 = vmul.f32 0.03125, %v3227_v40  ;;  %v3414_v61 = vsel %vm1223_vm4, %v3332_v56, 0.0 }
 0x80b   : > { %3415 = vadd.xlane.f32.xlu1 %v3414_v61  ;;  %v3230_v47 = vpop.xlane.xlu1 %3229 }
 0x80c   : > { %v7440_v36 = vsub.f32 %v7244_v34, %v3269_v18  ;;  %v3270_v43 = vmul.f32 0.03125, %v3230_v47 }
 0x80e   : > { %v7443_v46 = vsub.f32 %v7249_v19, %v3270_v43  ;;  %v3333_v26 = vmul.f32 %v7440_v36, %v7440_v36 }
 0x810   : > { %v3417_v60 = vsel %vm1223_vm4, %v3333_v26, 0.0  ;;  %v3334_v63 = vmul.f32 %v7443_v46, %v7443_v46 }
 0x811   : > { %v3233_v40 = vpop.xlane.xlu0 %3232  ;;  %3418 = vadd.xlane.f32.xlu0 %v3417_v60 }
 0x812   : > { %v3271_v56 = vmul.f32 0.03125, %v3233_v40  ;;  %v3420_v61 = vsel %vm1223_vm4, %v3334_v63, 0.0 }
 0x813   : > { %3421 = vadd.xlane.f32.xlu1 %v3420_v61  ;;  %v3236_v18 = vpop.xlane.xlu1 %3235 }
 0x814   : > { %v7452_v47 = vsub.f32 %v7256_v3, %v3271_v56  ;;  %v3272_v43 = vmul.f32 0.03125, %v3236_v18 }
 0x816   : > { %v7455_v19 = vsub.f32 %v7261_v9, %v3272_v43  ;;  %v3335_v26 = vmul.f32 %v7452_v47, %v7452_v47 }
 0x818   : > { %v3423_v34 = vsel %vm1223_vm4, %v3335_v26, 0.0  ;;  %v3336_v60 = vmul.f32 %v7455_v19, %v7455_v19 }
 0x819   : > { %3424 = vadd.xlane.f32.xlu0 %v3423_v34  ;;  %v3239_v40 = vpop.xlane.xlu0 %3238 }
 0x81a   : > { %v3273_v63 = vmul.f32 0.03125, %v3239_v40  ;;  %v3426_v61 = vsel %vm1223_vm4, %v3336_v60, 0.0 }
 0x81b   : > { %3427 = vadd.xlane.f32.xlu1 %v3426_v61  ;;  %v3242_v56 = vpop.xlane.xlu1 %3241 }
 0x81c   : > { %v7464_v18 = vsub.f32 %v7268_v51, %v3273_v63  ;;  %v3274_v43 = vmul.f32 0.03125, %v3242_v56 }
 0x81e   : > { %v7467_v9 = vsub.f32 %v7273_v58, %v3274_v43  ;;  %v3337_v26 = vmul.f32 %v7464_v18, %v7464_v18 }
 0x820   : > { %v3429_v3 = vsel %vm1223_vm4, %v3337_v26, 0.0  ;;  %v3338_v34 = vmul.f32 %v7467_v9, %v7467_v9 }
 0x821   : > { %3430 = vadd.xlane.f32.xlu0 %v3429_v3  ;;  %v7478_v3 = vld [vmem:[%s7996_s10] ss:$0 sm:$0xff] }
 0x822   : > { %v3432_v60 = vsel %vm1223_vm4, %v3338_v34, 0.0 }
 0x823   : > { %3433 = vadd.xlane.f32.xlu1 %v3432_v60 }
 0x836   : > { %v3341_v40 = vpop.xlane.xlu0 %3340 }
 0x837   : > { %v3435_v61 = vmul.f32 0.03125, %v3341_v40 }
 0x838   : > { %v3344_v63 = vpop.xlane.xlu1 %3343 }
 0x839   : > { %v3467_v51 = vadd.f32 1e-05, %v3435_v61  ;;  %v3436_v56 = vmul.f32 0.03125, %v3344_v63 }
 0x83b   : > { %5550 = vrsqrt.f32 %v3467_v51  ;;  %v3468_v43 = vadd.f32 1e-05, %v3436_v56 }
 0x83d   : > { %5552 = vrsqrt.f32 %v3468_v43 }
 0x83e   : > { %v3347_v58 = vpop.xlane.xlu0 %3346 }
 0x83f   : > { %v3437_v35 = vmul.f32 0.03125, %v3347_v58 }
 0x840   : > { %v3350_v0 = vpop.xlane.xlu1 %3349 }
 0x841   : > { %v3469_v27 = vadd.f32 1e-05, %v3437_v35  ;;  %v3438_v26 = vmul.f32 0.03125, %v3350_v0  ;;  %v5285_v0 = vld [vmem:[%s8000_s14 + $0x8] sm:$0xff]  }
 0x843   : > { %5554 = vrsqrt.f32 %v3469_v27  ;;  %v3470_v49 = vadd.f32 1e-05, %v3438_v26  ;;  %v5284_v27 = vld [vmem:[%s8000_s14] sm:$0xff]   ;;  %v5286_v26 = vld [vmem:[%s8000_s14 + $0x10] sm:$0xff]  }
 0x844   : > { %5183 = vmatprep.subr.bf16.mxu1 %v5284_v27 }
 0x845   : > { %v5551_v25 = vpop.eup %5550  ;;  %5556 = vrsqrt.f32 %v3470_v49  ;;  %5184 = vmatpush3.bf16.msra.mxu1 %v5284_v27 }
 0x846   : > { %v3531_v34 = vmul.f32 %v5551_v25, %v7281_v2  ;;  %v3353_v60 = vpop.xlane.xlu0 %3352  ;;  %v7492_v25 = vld [vmem:[%s7997_s11] ss:$0 sm:$0xff]  ;;  %5185 = vmatprep.subr.bf16.mxu1 %v5285_v0 }
 0x847   : > { %v5553_v51 = vpop.eup %5552  ;;  %v3439_v40 = vmul.f32 0.03125, %v3353_v60 }
 0x848   : > { %v3532_v61 = vmul.f32 %v5553_v51, %v7284_v24  ;;  %v3356_v58 = vpop.xlane.xlu1 %3355  ;;  %v3570_v35 = vmul.f32 %v7478_v3, %v3531_v34 }
 0x849   : > { %v3471_v49 = vadd.f32 1e-05, %v3439_v40  ;;  %v3440_v2 = vmul.f32 0.03125, %v3356_v58  ;;  %5186 = vmatpush3.bf16.msra.mxu1 %v5285_v0 }
 0x84a   : > { %v3571_v24 = vmul.f32 %v7478_v3, %v3532_v61  ;;  %v3609_v56 = vadd.f32 %v7492_v25, %v3570_v35  ;;  %5187 = vmatprep.subr.bf16.mxu1 %v5286_v26 }
 0x84b   : > { %5558 = vrsqrt.f32 %v3471_v49  ;;  %v3472_v63 = vadd.f32 1e-05, %v3440_v2 }
 0x84c   : > { %v3610_v43 = vadd.f32 %v7492_v25, %v3571_v24 }
 0x84d   : > { %v5555_v34 = vpop.eup %5554  ;;  %5560 = vrsqrt.f32 %v3472_v63  ;;  %5188 = vmatpush3.bf16.msra.mxu1 %v5286_v26 }
 0x84e   : > { %v3533_v60 = vmul.f32 %v5555_v34, %v7293_v17  ;;  %v3359_v51 = vpop.xlane.xlu0 %3358  ;;  %v3641_v40 = vpack.c.bf16 %v3610_v43, %v3609_v56 }
 0x84f   : > { %v5557_v61 = vpop.eup %5556  ;;  %v3441_v58 = vmul.f32 0.03125, %v3359_v51 }
 0x850   : > { %v3572_v27 = vmul.f32 %v7478_v3, %v3533_v60  ;;  %v3534_v35 = vmul.f32 %v5557_v61, %v7296_v30  ;;  %5151 = vmatprep.mubr.msk.bf16.mxu0 %vm1223_vm4, %v3641_v40  ;;  %v3362_v49 = vpop.xlane.xlu1 %3361 }
 0x851   : > { %v3473_v2 = vadd.f32 1e-05, %v3441_v58  ;;  %v3442_v24 = vmul.f32 0.03125, %v3362_v49 }
 0x852   : > { %v3573_v5 = vmul.f32 %v7478_v3, %v3534_v35  ;;  %v3611_v17 = vadd.f32 %v7492_v25, %v3572_v27 }
 0x853   : > { %5562 = vrsqrt.f32 %v3473_v2  ;;  %v3474_v63 = vadd.f32 1e-05, %v3442_v24 }
 0x854   : > { %v3612_v56 = vadd.f32 %v7492_v25, %v3573_v5 }
 0x855   : > { %v5559_v0 = vpop.eup %5558  ;;  %5564 = vrsqrt.f32 %v3474_v63 }
 0x856   : > { %v3535_v43 = vmul.f32 %v5559_v0, %v7305_v22  ;;  %v3365_v30 = vpop.xlane.xlu0 %3364  ;;  %v3642_v34 = vpack.c.bf16 %v3612_v56, %v3611_v17 }
 0x857   : > { %v5561_v60 = vpop.eup %5560  ;;  %v3443_v51 = vmul.f32 0.03125, %v3365_v30 }
 0x858   : > { %v3536_v40 = vmul.f32 %v5561_v60, %v7308_v45  ;;  %5152 = vmatmul.mubr.msk.bf16.vlgmr.msra.gmra.mrb[140].mxu0 %vm1223_vm4, %v3642_v34  ;;  %v3368_v61 = vpop.xlane.xlu1 %3367  ;;  %v3574_v58 = vmul.f32 %v7478_v3, %v3535_v43 }
 0x859   : > { %v3475_v26 = vadd.f32 1e-05, %v3443_v51  ;;  %v3444_v35 = vmul.f32 0.03125, %v3368_v61 }
 0x85a   : > { %v3575_v27 = vmul.f32 %v7478_v3, %v3536_v40  ;;  %v3613_v49 = vadd.f32 %v7492_v25, %v3574_v58 }
 0x85b   : > { %5566 = vrsqrt.f32 %v3475_v26  ;;  %v3476_v5 = vadd.f32 1e-05, %v3444_v35 }
 0x85c   : > { %v3614_v22 = vadd.f32 %v7492_v25, %v3575_v27 }
 0x85d   : > { %v5563_v2 = vpop.eup %5562  ;;  %5568 = vrsqrt.f32 %v3476_v5 }
 0x85e   : > { %v3537_v24 = vmul.f32 %v5563_v2, %v7317_v32  ;;  %v3371_v45 = vpop.xlane.xlu0 %3370  ;;  %v3643_v63 = vpack.c.bf16 %v3614_v22, %v3613_v49 }
 0x85f   : > { %v5565_v17 = vpop.eup %5564  ;;  %v3445_v56 = vmul.f32 0.03125, %v3371_v45 }
 0x860   : > { %v3538_v0 = vmul.f32 %v5565_v17, %v7320_v31  ;;  %5155 = vmatprep.mubr.msk.bf16.mxu0 %vm1223_vm4, %v3643_v63  ;;  %v3374_v43 = vpop.xlane.xlu1 %3373  ;;  %v3576_v30 = vmul.f32 %v7478_v3, %v3537_v24 }
 0x861   : > { %v3477_v34 = vadd.f32 1e-05, %v3445_v56  ;;  %v3446_v60 = vmul.f32 0.03125, %v3374_v43 }
 0x862   : > { %v3577_v51 = vmul.f32 %v7478_v3, %v3538_v0  ;;  %v3615_v61 = vadd.f32 %v7492_v25, %v3576_v30 }
 0x863   : > { %5570 = vrsqrt.f32 %v3477_v34  ;;  %v3478_v40 = vadd.f32 1e-05, %v3446_v60 }
 0x864   : > { %v3616_v32 = vadd.f32 %v7492_v25, %v3577_v51 }
 0x865   : > { %v5567_v58 = vpop.eup %5566  ;;  %5572 = vrsqrt.f32 %v3478_v40 }
 0x866   : > { %v3539_v26 = vmul.f32 %v5567_v58, %v7329_v62  ;;  %v3377_v31 = vpop.xlane.xlu0 %3376  ;;  %v3644_v35 = vpack.c.bf16 %v3616_v32, %v3615_v61 }
 0x867   : > { %v5569_v27 = vpop.eup %5568  ;;  %v3447_v5 = vmul.f32 0.03125, %v3377_v31 }
 0x868   : > { %v3540_v49 = vmul.f32 %v5569_v27, %v7332_v15  ;;  %5156 = vmatmul.mubr.msk.bf16.gmra.mrb[144].mxu0 %vm1223_vm4, %v3644_v35  ;;  %v3380_v22 = vpop.xlane.xlu1 %3379  ;;  %v3578_v2 = vmul.f32 %v7478_v3, %v3539_v26 }
 0x869   : > { %v3479_v24 = vadd.f32 1e-05, %v3447_v5  ;;  %v3448_v45 = vmul.f32 0.03125, %v3380_v22 }
 0x86a   : > { %v3579_v63 = vmul.f32 %v7478_v3, %v3540_v49  ;;  %v3617_v56 = vadd.f32 %v7492_v25, %v3578_v2 }
 0x86b   : > { %5574 = vrsqrt.f32 %v3479_v24  ;;  %v3480_v17 = vadd.f32 1e-05, %v3448_v45 }
 0x86c   : > { %v3618_v62 = vadd.f32 %v7492_v25, %v3579_v63 }
 0x86d   : > { %v5571_v0 = vpop.eup %5570  ;;  %5576 = vrsqrt.f32 %v3480_v17 }
 0x86e   : > { %v3541_v43 = vmul.f32 %v5571_v0, %v7341_v29  ;;  %v3383_v15 = vpop.xlane.xlu0 %3382  ;;  %v3645_v30 = vpack.c.bf16 %v3618_v62, %v3617_v56 }
 0x86f   : > { %v5573_v34 = vpop.eup %5572  ;;  %v3449_v60 = vmul.f32 0.03125, %v3383_v15 }
 0x870   : > { %v3542_v51 = vmul.f32 %v5573_v34, %v7344_v16  ;;  %5159 = vmatprep.mubr.msk.bf16.mxu0 %vm1223_vm4, %v3645_v30  ;;  %v3386_v40 = vpop.xlane.xlu1 %3385  ;;  %v3580_v61 = vmul.f32 %v7478_v3, %v3541_v43 }
 0x871   : > { %v3481_v32 = vadd.f32 1e-05, %v3449_v60  ;;  %v3450_v58 = vmul.f32 0.03125, %v3386_v40 }
 0x872   : > { %v3581_v26 = vmul.f32 %v7478_v3, %v3542_v51  ;;  %v3619_v35 = vadd.f32 %v7492_v25, %v3580_v61 }
 0x873   : > { %5578 = vrsqrt.f32 %v3481_v32  ;;  %v3482_v31 = vadd.f32 1e-05, %v3450_v58 }
 0x874   : > { %v3620_v29 = vadd.f32 %v7492_v25, %v3581_v26 }
 0x875   : > { %v5575_v27 = vpop.eup %5574  ;;  %5580 = vrsqrt.f32 %v3482_v31 }
 0x876   : > { %v3543_v5 = vmul.f32 %v5575_v27, %v7356_v6  ;;  %v3389_v16 = vpop.xlane.xlu0 %3388  ;;  %v3646_v49 = vpack.c.bf16 %v3620_v29, %v3619_v35 }
 0x877   : > { %v5577_v22 = vpop.eup %5576  ;;  %v3451_v2 = vmul.f32 0.03125, %v3389_v16 }
 0x878   : > { %v3544_v24 = vmul.f32 %v5577_v22, %v7359_v59  ;;  %5160 = vmatmul.mubr.msk.bf16.gmra.mrb[148].mxu0 %vm1223_vm4, %v3646_v49  ;;  %v3392_v45 = vpop.xlane.xlu1 %3391  ;;  %v3582_v63 = vmul.f32 %v7478_v3, %v3543_v5 }
 0x879   : > { %v3483_v17 = vadd.f32 1e-05, %v3451_v2  ;;  %v3452_v56 = vmul.f32 0.03125, %v3392_v45 }
 0x87a   : > { %v3583_v62 = vmul.f32 %v7478_v3, %v3544_v24  ;;  %v3621_v43 = vadd.f32 %v7492_v25, %v3582_v63 }
 0x87b   : > { %5582 = vrsqrt.f32 %v3483_v17  ;;  %v3484_v0 = vadd.f32 1e-05, %v3452_v56 }
 0x87c   : > { %v3622_v6 = vadd.f32 %v7492_v25, %v3583_v62 }
 0x87d   : > { %v5579_v15 = vpop.eup %5578  ;;  %5584 = vrsqrt.f32 %v3484_v0 }
 0x87e   : > { %v3545_v30 = vmul.f32 %v5579_v15, %v7368_v8  ;;  %v3395_v59 = vpop.xlane.xlu0 %3394  ;;  %v3647_v34 = vpack.c.bf16 %v3622_v6, %v3621_v43 }
 0x87f   : > { %v5581_v60 = vpop.eup %5580  ;;  %v3453_v51 = vmul.f32 0.03125, %v3395_v59 }
 0x880   : > { %v3546_v40 = vmul.f32 %v5581_v60, %v7371_v55  ;;  %5163 = vmatprep.mubr.msk.bf16.mxu0 %vm1223_vm4, %v3647_v34  ;;  %v3398_v61 = vpop.xlane.xlu1 %3397  ;;  %v3584_v32 = vmul.f32 %v7478_v3, %v3545_v30 }
 0x881   : > { %v3485_v58 = vadd.f32 1e-05, %v3453_v51  ;;  %v3454_v26 = vmul.f32 0.03125, %v3398_v61 }
 0x882   : > { %v3585_v31 = vmul.f32 %v7478_v3, %v3546_v40  ;;  %v3623_v29 = vadd.f32 %v7492_v25, %v3584_v32 }
 0x883   : > { %5586 = vrsqrt.f32 %v3485_v58  ;;  %v3486_v35 = vadd.f32 1e-05, %v3454_v26 }
 0x884   : > { %v3624_v8 = vadd.f32 %v7492_v25, %v3585_v31 }
 0x885   : > { %v5583_v27 = vpop.eup %5582  ;;  %5588 = vrsqrt.f32 %v3486_v35 }
 0x886   : > { %v3547_v5 = vmul.f32 %v5583_v27, %v7380_v52  ;;  %v3401_v55 = vpop.xlane.xlu0 %3400  ;;  %v3648_v16 = vpack.c.bf16 %v3624_v8, %v3623_v29 }
 0x887   : > { %v5585_v49 = vpop.eup %5584  ;;  %v3455_v22 = vmul.f32 0.03125, %v3401_v55 }
 0x888   : > { %v3548_v2 = vmul.f32 %v5585_v49, %v7383_v54  ;;  %5164 = vmatmul.mubr.msk.bf16.gmra.mrb[152].mxu0 %vm1223_vm4, %v3648_v16  ;;  %v3404_v24 = vpop.xlane.xlu1 %3403  ;;  %v3586_v45 = vmul.f32 %v7478_v3, %v3547_v5 }
 0x889   : > { %v3487_v63 = vadd.f32 1e-05, %v3455_v22  ;;  %v3456_v17 = vmul.f32 0.03125, %v3404_v24 }
 0x88a   : > { %v3587_v56 = vmul.f32 %v7478_v3, %v3548_v2  ;;  %v3625_v0 = vadd.f32 %v7492_v25, %v3586_v45 }
 0x88b   : > { %5590 = vrsqrt.f32 %v3487_v63  ;;  %v3488_v62 = vadd.f32 1e-05, %v3456_v17 }
 0x88c   : > { %v3626_v52 = vadd.f32 %v7492_v25, %v3587_v56 }
 0x88d   : > { %v5587_v43 = vpop.eup %5586  ;;  %5592 = vrsqrt.f32 %v3488_v62 }
 0x88e   : > { %v3549_v6 = vmul.f32 %v5587_v43, %v7392_v11  ;;  %v3407_v54 = vpop.xlane.xlu0 %3406  ;;  %v3649_v15 = vpack.c.bf16 %v3626_v52, %v3625_v0 }
 0x88f   : > { %v5589_v30 = vpop.eup %5588  ;;  %v3457_v59 = vmul.f32 0.03125, %v3407_v54 }
 0x890   : > { %v3550_v34 = vmul.f32 %v5589_v30, %v7395_v28  ;;  %5167 = vmatprep.mubr.msk.bf16.mxu0 %vm1223_vm4, %v3649_v15  ;;  %v3410_v60 = vpop.xlane.xlu1 %3409  ;;  %v3588_v51 = vmul.f32 %v7478_v3, %v3549_v6 }
 0x891   : > { %v3489_v40 = vadd.f32 1e-05, %v3457_v59  ;;  %v3458_v61 = vmul.f32 0.03125, %v3410_v60 }
 0x892   : > { %v3589_v32 = vmul.f32 %v7478_v3, %v3550_v34  ;;  %v3627_v26 = vadd.f32 %v7492_v25, %v3588_v51 }
 0x893   : > { %5594 = vrsqrt.f32 %v3489_v40  ;;  %v3490_v58 = vadd.f32 1e-05, %v3458_v61 }
 0x894   : > { %v3628_v11 = vadd.f32 %v7492_v25, %v3589_v32 }
 0x895   : > { %v5591_v31 = vpop.eup %5590  ;;  %5596 = vrsqrt.f32 %v3490_v58 }
 0x896   : > { %v3551_v35 = vmul.f32 %v5591_v31, %v7404_v38  ;;  %v3413_v28 = vpop.xlane.xlu0 %3412  ;;  %v3650_v29 = vpack.c.bf16 %v3628_v11, %v3627_v26 }
 0x897   : > { %v5593_v8 = vpop.eup %5592  ;;  %v3459_v27 = vmul.f32 0.03125, %v3413_v28 }
 0x898   : > { %v3552_v5 = vmul.f32 %v5593_v8, %v7407_v41  ;;  %5168 = vmatmul.mubr.msk.bf16.gmra.mrb[156].mxu0 %vm1223_vm4, %v3650_v29  ;;  %v3416_v55 = vpop.xlane.xlu1 %3415  ;;  %v3590_v16 = vmul.f32 %v7478_v3, %v3551_v35 }
 0x899   : > { %v3491_v49 = vadd.f32 1e-05, %v3459_v27  ;;  %v3460_v22 = vmul.f32 0.03125, %v3416_v55 }
 0x89a   : > { %v3591_v2 = vmul.f32 %v7478_v3, %v3552_v5  ;;  %v3629_v45 = vadd.f32 %v7492_v25, %v3590_v16 }
 0x89b   : > { %5598 = vrsqrt.f32 %v3491_v49  ;;  %v3492_v24 = vadd.f32 1e-05, %v3460_v22 }
 0x89c   : > { %v3630_v38 = vadd.f32 %v7492_v25, %v3591_v2 }
 0x89d   : > { %v5595_v63 = vpop.eup %5594  ;;  %5600 = vrsqrt.f32 %v3492_v24 }
 0x89e   : > { %v3553_v17 = vmul.f32 %v5595_v63, %v7416_v53  ;;  %v3419_v41 = vpop.xlane.xlu0 %3418  ;;  %v3651_v56 = vpack.c.bf16 %v3630_v38, %v3629_v45 }
 0x89f   : > { %v5597_v62 = vpop.eup %5596  ;;  %v3461_v0 = vmul.f32 0.03125, %v3419_v41 }
 0x8a0   : > { %v3554_v52 = vmul.f32 %v5597_v62, %v7419_v50  ;;  %5171 = vmatprep.mubr.msk.bf16.mxu0 %vm1223_vm4, %v3651_v56  ;;  %v3422_v43 = vpop.xlane.xlu1 %3421  ;;  %v3592_v6 = vmul.f32 %v7478_v3, %v3553_v17 }
 0x8a1   : > { %v3493_v54 = vadd.f32 1e-05, %v3461_v0  ;;  %v3462_v15 = vmul.f32 0.03125, %v3422_v43 }
 0x8a2   : > { %v3593_v30 = vmul.f32 %v7478_v3, %v3554_v52  ;;  %v3631_v34 = vadd.f32 %v7492_v25, %v3592_v6  ;;  %v5287_v6 = vld [vmem:[%s8000_s14 + $0x18] sm:$0xff]  }
 0x8a3   : > { %5602 = vrsqrt.f32 %v3493_v54  ;;  %v3494_v59 = vadd.f32 1e-05, %v3462_v15  ;;  %5189 = vmatprep.subr.bf16.mxu1 %v5287_v6 }
 0x8a4   : > { %v3632_v53 = vadd.f32 %v7492_v25, %v3593_v30  ;;  %5190 = vmatpush3.bf16.msra.mxu1 %v5287_v6 }
 0x8a5   : > { %v5599_v60 = vpop.eup %5598  ;;  %5604 = vrsqrt.f32 %v3494_v59 }
 0x8a6   : > { %v3555_v51 = vmul.f32 %v5599_v60, %v7428_v1  ;;  %v3425_v50 = vpop.xlane.xlu0 %3424  ;;  %v3652_v40 = vpack.c.bf16 %v3632_v53, %v3631_v34 }
 0x8a7   : > { %v5601_v61 = vpop.eup %5600  ;;  %v3463_v32 = vmul.f32 0.03125, %v3425_v50  ;;  %v5289_v50 = vld [vmem:[%s8000_s14 + $0x28] sm:$0xff]  }
 0x8a8   : > { %v3556_v58 = vmul.f32 %v5601_v61, %v7431_v7  ;;  %5172 = vmatmul.mubr.msk.bf16.gmra.mrb[160].mxu0 %vm1223_vm4, %v3652_v40  ;;  %v3428_v26 = vpop.xlane.xlu1 %3427  ;;  %v3594_v11 = vmul.f32 %v7478_v3, %v3555_v51 }
 0x8a9   : > { %v3495_v31 = vadd.f32 1e-05, %v3463_v32  ;;  %v3464_v35 = vmul.f32 0.03125, %v3428_v26 }
 0x8aa   : > { %v3595_v28 = vmul.f32 %v7478_v3, %v3556_v58  ;;  %v3633_v8 = vadd.f32 %v7492_v25, %v3594_v11  ;;  %v5291_v58 = vld [vmem:[%s8000_s14 + $0x38] sm:$0xff]  }
 0x8ab   : > { %5606 = vrsqrt.f32 %v3495_v31  ;;  %v3496_v29 = vadd.f32 1e-05, %v3464_v35 }
 0x8ac   : > { %v3634_v1 = vadd.f32 %v7492_v25, %v3595_v28 }
 0x8ad   : > { %v5603_v27 = vpop.eup %5602  ;;  %5608 = vrsqrt.f32 %v3496_v29 }
 0x8ae   : > { %v3557_v5 = vmul.f32 %v5603_v27, %v7440_v36  ;;  %v3431_v7 = vpop.xlane.xlu0 %3430  ;;  %v3653_v55 = vpack.c.bf16 %v3634_v1, %v3633_v8 }
 0x8af   : > { %v5605_v16 = vpop.eup %5604  ;;  %v3465_v49 = vmul.f32 0.03125, %v3431_v7 }
 0x8b0   : > { %v3558_v22 = vmul.f32 %v5605_v16, %v7443_v46  ;;  %5175 = vmatprep.mubr.msk.bf16.mxu0 %vm1223_vm4, %v3653_v55  ;;  %v3434_v2 = vpop.xlane.xlu1 %3433  ;;  %v3596_v24 = vmul.f32 %v7478_v3, %v3557_v5 }
 0x8b1   : > { %v3497_v45 = vadd.f32 1e-05, %v3465_v49  ;;  %v3466_v38 = vmul.f32 0.03125, %v3434_v2 }
 0x8b2   : > { %v3597_v63 = vmul.f32 %v7478_v3, %v3558_v22  ;;  %v3635_v41 = vadd.f32 %v7492_v25, %v3596_v24 }
 0x8b3   : > { %5610 = vrsqrt.f32 %v3497_v45  ;;  %v3498_v17 = vadd.f32 1e-05, %v3466_v38 }
 0x8b4   : > { %v3636_v36 = vadd.f32 %v7492_v25, %v3597_v63 }
 0x8b5   : > { %v5607_v56 = vpop.eup %5606  ;;  %5612 = vrsqrt.f32 %v3498_v17 }
 0x8b6   : > { %v3559_v62 = vmul.f32 %v5607_v56, %v7452_v47  ;;  %v3654_v46 = vpack.c.bf16 %v3636_v36, %v3635_v41 }
 0x8b7   : > { %v5609_v0 = vpop.eup %5608 }
 0x8b8   : > { %v3560_v52 = vmul.f32 %v5609_v0, %v7455_v19  ;;  %5176 = vmatmul.mubr.msk.bf16.gmra.mrb[164].mxu0 %vm1223_vm4, %v3654_v46  ;;  %v3598_v43 = vmul.f32 %v7478_v3, %v3559_v62  ;;  %v5288_v19 = vld [vmem:[%s8000_s14 + $0x20] sm:$0xff]  }
 0x8b9   : > { %5191 = vmatprep.subr.bf16.mxu1 %v5288_v19 }
 0x8ba   : > { %v3599_v54 = vmul.f32 %v7478_v3, %v3560_v52  ;;  %v3637_v15 = vadd.f32 %v7492_v25, %v3598_v43  ;;  %5192 = vmatpush3.bf16.msra.mxu1 %v5288_v19 }
 0x8bb   : > { %5193 = vmatprep.subr.bf16.mxu1 %v5289_v50 }
 0x8bc   : > { %v3638_v30 = vadd.f32 %v7492_v25, %v3599_v54 }
 0x8bd   : > { %v5611_v47 = vpop.eup %5610 }
 0x8be   : > { %v3561_v59 = vmul.f32 %v5611_v47, %v7464_v18  ;;  %v3655_v34 = vpack.c.bf16 %v3638_v30, %v3637_v15  ;;  %5194 = vmatpush3.bf16.msra.mxu1 %v5289_v50 }
 0x8bf   : > { %v5613_v53 = vpop.eup %5612 }
 0x8c0   : > { %v3562_v60 = vmul.f32 %v5613_v53, %v7467_v9  ;;  %5179 = vmatprep.mubr.msk.bf16.mxu0 %vm1223_vm4, %v3655_v34  ;;  %v3600_v51 = vmul.f32 %v7478_v3, %v3561_v59  ;;  %v5290_v9 = vld [vmem:[%s8000_s14 + $0x30] sm:$0xff]  }
 0x8c1   : > { %5195 = vmatprep.subr.bf16.mxu1 %v5290_v9 }
 0x8c2   : > { %v3601_v40 = vmul.f32 %v7478_v3, %v3562_v60  ;;  %v3639_v61 = vadd.f32 %v7492_v25, %v3600_v51  ;;  %5196 = vmatpush3.bf16.msra.mxu1 %v5290_v9  ;;  %v7624_v3 = vld [vmem:[%s7999_s13] ss:$0 sm:$0xff] }
 0x8c3   : > { %5197 = vmatprep.subr.bf16.mxu1 %v5291_v58 }
 0x8c4   : > { %v3640_v18 = vadd.f32 %v7492_v25, %v3601_v40 }
 0x8c6   : > { %v3656_v32 = vpack.c.bf16 %v3640_v18, %v3639_v61  ;;  %5198 = vmatpush3.bf16.msra.mxu1 %v5291_v58 }
 0x8c8   : > { %5180 = vmatmul.mubr.msk.bf16.gmra.mrb[168].mxu0 %vm1223_vm4, %v3656_v32 }
 0x92b   : > { %v5153_v25 = vpop.f32.mrb[140].mxu0 }
 0x92c   : > { %v7627_v26 = vadd.f32 %v5153_v25, %v7624_v3  ;;  %v3762_v11 = vpop.f32.mrb[141].mxu0 }
 0x92d   : > { %v7630_v31 = vadd.f32 %v7624_v3, %v3762_v11  ;;  %v5154_v35 = vpop.f32.mrb[142].mxu0 }
 0x92e   : > { %v3891_v28 = vmul.f32 %v7627_v26, %v7627_v26  ;;  %v7635_v29 = vadd.f32 %v5154_v35, %v7624_v3  ;;  %v3765_v8 = vpop.f32.mrb[143].mxu0 }
 0x92f   : > { %v3889_v1 = vmul.f32 %v7630_v31, %v7630_v31  ;;  %v7640_v27 = vadd.f32 %v7624_v3, %v3765_v8 }
 0x930   : > { %v3923_v5 = vmul.f32 %v3891_v28, %v7627_v26  ;;  %v3892_v7 = vmul.f32 %v7635_v29, %v7635_v29 }
 0x931   : > { %v3921_v55 = vmul.f32 %v3889_v1, %v7630_v31  ;;  %v3890_v16 = vmul.f32 %v7640_v27, %v7640_v27 }
 0x932   : > { %v3955_v49 = vmul.f32 0.044715, %v3923_v5  ;;  %v3924_v22 = vmul.f32 %v3892_v7, %v7635_v29 }
 0x933   : > { %v3953_v2 = vmul.f32 0.044715, %v3921_v55  ;;  %v3922_v24 = vmul.f32 %v3890_v16, %v7640_v27 }
 0x934   : > { %v3987_v45 = vadd.f32 %v3955_v49, %v7627_v26  ;;  %v3956_v38 = vmul.f32 0.044715, %v3924_v22 }
 0x935   : > { %v3985_v63 = vadd.f32 %v3953_v2, %v7630_v31  ;;  %v3954_v17 = vmul.f32 0.044715, %v3922_v24 }
 0x936   : > { %v4019_v41 = vmul.f32 0.7978846, %v3987_v45  ;;  %v3988_v36 = vadd.f32 %v3956_v38, %v7635_v29 }
 0x937   : > { %v4017_v56 = vmul.f32 0.7978846, %v3985_v63  ;;  %v3986_v62 = vadd.f32 %v3954_v17, %v7640_v27 }
 0x938   : > { %5614 = vtanh.f32 %v4019_v41  ;;  %v4020_v46 = vmul.f32 0.7978846, %v3988_v36 }
 0x939   : > { %5616 = vtanh.f32 %v4017_v56  ;;  %v4018_v0 = vmul.f32 0.7978846, %v3986_v62 }
 0x93a   : > { %5618 = vtanh.f32 %v4020_v46 }
 0x93b   : > { %5620 = vtanh.f32 %v4018_v0  ;;  %v5157_v52 = vpop.f32.mrb[144].mxu0 }
 0x93c   : > { %v7655_v43 = vadd.f32 %v5157_v52, %v7624_v3  ;;  %v3778_v6 = vpop.f32.mrb[145].mxu0 }
 0x93d   : > { %v7658_v54 = vadd.f32 %v7624_v3, %v3778_v6  ;;  %v5158_v15 = vpop.f32.mrb[146].mxu0 }
 0x93e   : > { %v3895_v30 = vmul.f32 %v7655_v43, %v7655_v43  ;;  %v7663_v47 = vadd.f32 %v5158_v15, %v7624_v3  ;;  %v3781_v19 = vpop.f32.mrb[147].mxu0 }
 0x93f   : > { %v3893_v59 = vmul.f32 %v7658_v54, %v7658_v54  ;;  %v7668_v34 = vadd.f32 %v7624_v3, %v3781_v19 }
 0x940   : > { %v3927_v53 = vmul.f32 %v3895_v30, %v7655_v43  ;;  %v3896_v60 = vmul.f32 %v7663_v47, %v7663_v47 }
 0x941   : > { %v3925_v51 = vmul.f32 %v3893_v59, %v7658_v54  ;;  %v3894_v50 = vmul.f32 %v7668_v34, %v7668_v34 }
 0x942   : > { %v5615_v40 = vpop.eup %5614  ;;  %v3959_v61 = vmul.f32 0.044715, %v3927_v53  ;;  %v3928_v18 = vmul.f32 %v3896_v60, %v7663_v47 }
 0x943   : > { %v5617_v9 = vpop.eup %5616  ;;  %v4083_v32 = vadd.f32 1.0, %v5615_v40  ;;  %v3957_v58 = vmul.f32 0.044715, %v3925_v51  ;;  %v3926_v25 = vmul.f32 %v3894_v50, %v7668_v34 }
 0x944   : > { %v5619_v11 = vpop.eup %5618  ;;  %v3991_v35 = vadd.f32 %v3959_v61, %v7655_v43  ;;  %v3960_v28 = vmul.f32 0.044715, %v3928_v18  ;;  %v4081_v8 = vadd.f32 1.0, %v5617_v9 }
 0x945   : > { %v5621_v1 = vpop.eup %5620  ;;  %v4115_v5 = vmul.f32 0.5, %v4083_v32  ;;  %v4084_v7 = vadd.f32 1.0, %v5619_v11  ;;  %v3989_v55 = vadd.f32 %v3957_v58, %v7658_v54  ;;  %v3958_v16 = vmul.f32 0.044715, %v3926_v25 }
 0x946   : > { %v4023_v49 = vmul.f32 0.7978846, %v3991_v35  ;;  %v3992_v22 = vadd.f32 %v3960_v28, %v7663_v47  ;;  %v4082_v2 = vadd.f32 1.0, %v5621_v1  ;;  %v4113_v24 = vmul.f32 0.5, %v4081_v8 }
 0x947   : > { %v4116_v45 = vmul.f32 0.5, %v4084_v7  ;;  %v4021_v38 = vmul.f32 0.7978846, %v3989_v55  ;;  %v3990_v63 = vadd.f32 %v3958_v16, %v7668_v34  ;;  %v4147_v36 = vmul.f32 %v4115_v5, %v7627_v26 }
 0x948   : > { %5622 = vtanh.f32 %v4023_v49  ;;  %v4024_v17 = vmul.f32 0.7978846, %v3992_v22  ;;  %v4114_v41 = vmul.f32 0.5, %v4082_v2  ;;  %v4145_v46 = vmul.f32 %v4113_v24, %v7630_v31 }
 0x949   : > { %v4148_v56 = vmul.f32 %v4116_v45, %v7635_v29  ;;  %5624 = vtanh.f32 %v4021_v38  ;;  %v4022_v62 = vmul.f32 0.7978846, %v3990_v63 }
 0x94a   : > { %5626 = vtanh.f32 %v4024_v17  ;;  %v4146_v0 = vmul.f32 %v4114_v41, %v7640_v27 }
 0x94b   : > { %v4178_v52 = vpack.c.bf16 %v4148_v56, %v4147_v36  ;;  %5628 = vtanh.f32 %v4022_v62  ;;  %v5161_v6 = vpop.f32.mrb[148].mxu0 }
 0x94c   : > { %v7687_v15 = vadd.f32 %v5161_v6, %v7624_v3  ;;  %v3794_v30 = vpop.f32.mrb[149].mxu0  ;;  %v4177_v19 = vpack.c.bf16 %v4146_v0, %v4145_v46 }
 0x94d   : > { %v7690_v59 = vadd.f32 %v7624_v3, %v3794_v30  ;;  %v5162_v26 = vpop.f32.mrb[150].mxu0 }
 0x94e   : > { %v3899_v29 = vmul.f32 %v7687_v15, %v7687_v15  ;;  %v7695_v53 = vadd.f32 %v5162_v26, %v7624_v3  ;;  %v3797_v31 = vpop.f32.mrb[151].mxu0  ;;  %5199 = vmatprep.mubr.bf16.mxu1 %v4177_v19 }
 0x94f   : > { %v3897_v27 = vmul.f32 %v7690_v59, %v7690_v59  ;;  %v7700_v60 = vadd.f32 %v7624_v3, %v3797_v31  ;;  %5200 = vmatmul.mubr.bf16.vlgmr.msra.gmra.mrb[148].mxu1 %v4178_v52 }
 0x950   : > { %v3931_v51 = vmul.f32 %v3899_v29, %v7687_v15  ;;  %v3900_v50 = vmul.f32 %v7695_v53, %v7695_v53 }
 0x951   : > { %v3929_v40 = vmul.f32 %v3897_v27, %v7690_v59  ;;  %v3898_v61 = vmul.f32 %v7700_v60, %v7700_v60 }
 0x952   : > { %v5623_v18 = vpop.eup %5622  ;;  %v3963_v9 = vmul.f32 0.044715, %v3931_v51  ;;  %v3932_v32 = vmul.f32 %v3900_v50, %v7695_v53 }
 0x953   : > { %v5625_v58 = vpop.eup %5624  ;;  %v3961_v25 = vmul.f32 0.044715, %v3929_v40  ;;  %v3930_v11 = vmul.f32 %v3898_v61, %v7700_v60  ;;  %v4087_v35 = vadd.f32 1.0, %v5623_v18 }
 0x954   : > { %v5627_v28 = vpop.eup %5626  ;;  %v3995_v8 = vadd.f32 %v3963_v9, %v7687_v15  ;;  %v3964_v1 = vmul.f32 0.044715, %v3932_v32  ;;  %v4085_v5 = vadd.f32 1.0, %v5625_v58 }
 0x955   : > { %v5629_v7 = vpop.eup %5628  ;;  %v3993_v55 = vadd.f32 %v3961_v25, %v7690_v59  ;;  %v3962_v16 = vmul.f32 0.044715, %v3930_v11  ;;  %v4088_v49 = vadd.f32 1.0, %v5627_v28  ;;  %v4119_v22 = vmul.f32 0.5, %v4087_v35 }
 0x956   : > { %v4027_v2 = vmul.f32 0.7978846, %v3995_v8  ;;  %v3996_v24 = vadd.f32 %v3964_v1, %v7695_v53  ;;  %v4086_v45 = vadd.f32 1.0, %v5629_v7  ;;  %v4117_v38 = vmul.f32 0.5, %v4085_v5 }
 0x957   : > { %v4025_v63 = vmul.f32 0.7978846, %v3993_v55  ;;  %v3994_v17 = vadd.f32 %v3962_v16, %v7700_v60  ;;  %v4120_v41 = vmul.f32 0.5, %v4088_v49  ;;  %v4151_v46 = vmul.f32 %v4119_v22, %v7655_v43 }
 0x958   : > { %5630 = vtanh.f32 %v4027_v2  ;;  %v4028_v36 = vmul.f32 0.7978846, %v3996_v24  ;;  %v4118_v56 = vmul.f32 0.5, %v4086_v45  ;;  %v4149_v52 = vmul.f32 %v4117_v38, %v7658_v54 }
 0x959   : > { %5632 = vtanh.f32 %v4025_v63  ;;  %v4026_v62 = vmul.f32 0.7978846, %v3994_v17  ;;  %v4152_v0 = vmul.f32 %v4120_v41, %v7663_v47 }
 0x95a   : > { %5634 = vtanh.f32 %v4028_v36  ;;  %v4150_v6 = vmul.f32 %v4118_v56, %v7668_v34 }
 0x95b   : > { %5636 = vtanh.f32 %v4026_v62  ;;  %v5165_v30 = vpop.f32.mrb[152].mxu0  ;;  %v4180_v19 = vpack.c.bf16 %v4152_v0, %v4151_v46 }
 0x95c   : > { %v7719_v26 = vadd.f32 %v5165_v30, %v7624_v3  ;;  %v3810_v29 = vpop.f32.mrb[153].mxu0  ;;  %v4179_v31 = vpack.c.bf16 %v4150_v6, %v4149_v52 }
 0x95d   : > { %v7722_v27 = vadd.f32 %v7624_v3, %v3810_v29  ;;  %v5166_v51 = vpop.f32.mrb[154].mxu0 }
 0x95e   : > { %v3903_v43 = vmul.f32 %v7719_v26, %v7719_v26  ;;  %v7727_v47 = vadd.f32 %v5166_v51, %v7624_v3  ;;  %v3813_v54 = vpop.f32.mrb[155].mxu0  ;;  %5203 = vmatprep.mubr.bf16.mxu1 %v4179_v31 }
 0x95f   : > { %v3901_v34 = vmul.f32 %v7722_v27, %v7722_v27  ;;  %v7732_v50 = vadd.f32 %v7624_v3, %v3813_v54  ;;  %5204 = vmatmul.mubr.bf16.gmra.mrb[152].mxu1 %v4180_v19 }
 0x960   : > { %v3935_v40 = vmul.f32 %v3903_v43, %v7719_v26  ;;  %v3904_v61 = vmul.f32 %v7727_v47, %v7727_v47 }
 0x961   : > { %v3933_v18 = vmul.f32 %v3901_v34, %v7722_v27  ;;  %v3902_v9 = vmul.f32 %v7732_v50, %v7732_v50 }
 0x962   : > { %v5631_v32 = vpop.eup %5630  ;;  %v3967_v58 = vmul.f32 0.044715, %v3935_v40  ;;  %v3936_v25 = vmul.f32 %v3904_v61, %v7727_v47 }
 0x963   : > { %v5633_v11 = vpop.eup %5632  ;;  %v3965_v35 = vmul.f32 0.044715, %v3933_v18  ;;  %v3934_v28 = vmul.f32 %v3902_v9, %v7732_v50  ;;  %v4091_v8 = vadd.f32 1.0, %v5631_v32 }
 0x964   : > { %v5635_v1 = vpop.eup %5634  ;;  %v3999_v5 = vadd.f32 %v3967_v58, %v7719_v26  ;;  %v3968_v7 = vmul.f32 0.044715, %v3936_v25  ;;  %v4089_v55 = vadd.f32 1.0, %v5633_v11 }
 0x965   : > { %v5637_v16 = vpop.eup %5636  ;;  %v3997_v49 = vadd.f32 %v3965_v35, %v7722_v27  ;;  %v3966_v22 = vmul.f32 0.044715, %v3934_v28  ;;  %v4092_v2 = vadd.f32 1.0, %v5635_v1  ;;  %v4123_v24 = vmul.f32 0.5, %v4091_v8 }
 0x966   : > { %v4031_v45 = vmul.f32 0.7978846, %v3999_v5  ;;  %v4000_v38 = vadd.f32 %v3968_v7, %v7727_v47  ;;  %v4090_v63 = vadd.f32 1.0, %v5637_v16  ;;  %v4121_v17 = vmul.f32 0.5, %v4089_v55 }
 0x967   : > { %v4029_v41 = vmul.f32 0.7978846, %v3997_v49  ;;  %v3998_v36 = vadd.f32 %v3966_v22, %v7732_v50  ;;  %v4124_v56 = vmul.f32 0.5, %v4092_v2  ;;  %v4155_v52 = vmul.f32 %v4123_v24, %v7687_v15 }
 0x968   : > { %5638 = vtanh.f32 %v4031_v45  ;;  %v4032_v62 = vmul.f32 0.7978846, %v4000_v38  ;;  %v4122_v46 = vmul.f32 0.5, %v4090_v63  ;;  %v4153_v30 = vmul.f32 %v4121_v17, %v7690_v59 }
 0x969   : > { %5640 = vtanh.f32 %v4029_v41  ;;  %v4030_v0 = vmul.f32 0.7978846, %v3998_v36  ;;  %v4156_v6 = vmul.f32 %v4124_v56, %v7695_v53 }
 0x96a   : > { %5642 = vtanh.f32 %v4032_v62  ;;  %v4154_v19 = vmul.f32 %v4122_v46, %v7700_v60 }
 0x96b   : > { %5644 = vtanh.f32 %v4030_v0  ;;  %v5169_v29 = vpop.f32.mrb[156].mxu0  ;;  %v4182_v31 = vpack.c.bf16 %v4156_v6, %v4155_v52 }
 0x96c   : > { %v7751_v51 = vadd.f32 %v5169_v29, %v7624_v3  ;;  %v3826_v43 = vpop.f32.mrb[157].mxu0  ;;  %v4181_v54 = vpack.c.bf16 %v4154_v19, %v4153_v30 }
 0x96d   : > { %v7754_v34 = vadd.f32 %v7624_v3, %v3826_v43  ;;  %v5170_v40 = vpop.f32.mrb[158].mxu0 }
 0x96e   : > { %v3907_v15 = vmul.f32 %v7751_v51, %v7751_v51  ;;  %v7759_v53 = vadd.f32 %v5170_v40, %v7624_v3  ;;  %v3829_v59 = vpop.f32.mrb[159].mxu0  ;;  %5207 = vmatprep.mubr.bf16.mxu1 %v4181_v54 }
 0x96f   : > { %v3905_v60 = vmul.f32 %v7754_v34, %v7754_v34  ;;  %v7764_v61 = vadd.f32 %v7624_v3, %v3829_v59  ;;  %5208 = vmatmul.mubr.bf16.gmra.mrb[156].mxu1 %v4182_v31 }
 0x970   : > { %v3939_v18 = vmul.f32 %v3907_v15, %v7751_v51  ;;  %v3908_v9 = vmul.f32 %v7759_v53, %v7759_v53 }
 0x971   : > { %v3937_v32 = vmul.f32 %v3905_v60, %v7754_v34  ;;  %v3906_v58 = vmul.f32 %v7764_v61, %v7764_v61 }
 0x972   : > { %v5639_v25 = vpop.eup %5638  ;;  %v3971_v11 = vmul.f32 0.044715, %v3939_v18  ;;  %v3940_v35 = vmul.f32 %v3908_v9, %v7759_v53 }
 0x973   : > { %v5641_v28 = vpop.eup %5640  ;;  %v3969_v8 = vmul.f32 0.044715, %v3937_v32  ;;  %v3938_v1 = vmul.f32 %v3906_v58, %v7764_v61  ;;  %v4095_v5 = vadd.f32 1.0, %v5639_v25 }
 0x974   : > { %v5643_v7 = vpop.eup %5642  ;;  %v4003_v55 = vadd.f32 %v3971_v11, %v7751_v51  ;;  %v3972_v16 = vmul.f32 0.044715, %v3940_v35  ;;  %v4093_v49 = vadd.f32 1.0, %v5641_v28 }
 0x975   : > { %v5645_v22 = vpop.eup %5644  ;;  %v4001_v2 = vadd.f32 %v3969_v8, %v7754_v34  ;;  %v3970_v24 = vmul.f32 0.044715, %v3938_v1  ;;  %v4096_v45 = vadd.f32 1.0, %v5643_v7  ;;  %v4127_v38 = vmul.f32 0.5, %v4095_v5 }
 0x976   : > { %v4035_v63 = vmul.f32 0.7978846, %v4003_v55  ;;  %v4004_v17 = vadd.f32 %v3972_v16, %v7759_v53  ;;  %v4094_v41 = vadd.f32 1.0, %v5645_v22  ;;  %v4125_v36 = vmul.f32 0.5, %v4093_v49 }
 0x977   : > { %v4033_v56 = vmul.f32 0.7978846, %v4001_v2  ;;  %v4002_v62 = vadd.f32 %v3970_v24, %v7764_v61  ;;  %v4128_v46 = vmul.f32 0.5, %v4096_v45  ;;  %v4159_v30 = vmul.f32 %v4127_v38, %v7719_v26 }
 0x978   : > { %5646 = vtanh.f32 %v4035_v63  ;;  %v4036_v0 = vmul.f32 0.7978846, %v4004_v17  ;;  %v4126_v52 = vmul.f32 0.5, %v4094_v41  ;;  %v4157_v29 = vmul.f32 %v4125_v36, %v7722_v27 }
 0x979   : > { %5648 = vtanh.f32 %v4033_v56  ;;  %v4034_v6 = vmul.f32 0.7978846, %v4002_v62  ;;  %v4160_v19 = vmul.f32 %v4128_v46, %v7727_v47 }
 0x97a   : > { %5650 = vtanh.f32 %v4036_v0  ;;  %v4158_v31 = vmul.f32 %v4126_v52, %v7732_v50 }
 0x97b   : > { %5652 = vtanh.f32 %v4034_v6  ;;  %v5173_v43 = vpop.f32.mrb[160].mxu0  ;;  %v4184_v54 = vpack.c.bf16 %v4160_v19, %v4159_v30 }
 0x97c   : > { %v7783_v40 = vadd.f32 %v5173_v43, %v7624_v3  ;;  %v3842_v15 = vpop.f32.mrb[161].mxu0  ;;  %v4183_v59 = vpack.c.bf16 %v4158_v31, %v4157_v29 }
 0x97d   : > { %v7786_v60 = vadd.f32 %v7624_v3, %v3842_v15  ;;  %v5174_v18 = vpop.f32.mrb[162].mxu0 }
 0x97e   : > { %v3911_v26 = vmul.f32 %v7783_v40, %v7783_v40  ;;  %v7791_v47 = vadd.f32 %v5174_v18, %v7624_v3  ;;  %v3845_v27 = vpop.f32.mrb[163].mxu0  ;;  %5211 = vmatprep.mubr.bf16.mxu1 %v4183_v59 }
 0x97f   : > { %v3909_v50 = vmul.f32 %v7786_v60, %v7786_v60  ;;  %v7796_v9 = vadd.f32 %v7624_v3, %v3845_v27  ;;  %5212 = vmatmul.mubr.bf16.gmra.mrb[160].mxu1 %v4184_v54 }
 0x980   : > { %v3943_v32 = vmul.f32 %v3911_v26, %v7783_v40  ;;  %v3912_v58 = vmul.f32 %v7791_v47, %v7791_v47 }
 0x981   : > { %v3941_v25 = vmul.f32 %v3909_v50, %v7786_v60  ;;  %v3910_v11 = vmul.f32 %v7796_v9, %v7796_v9 }
 0x982   : > { %v5647_v35 = vpop.eup %5646  ;;  %v3975_v28 = vmul.f32 0.044715, %v3943_v32  ;;  %v3944_v8 = vmul.f32 %v3912_v58, %v7791_v47 }
 0x983   : > { %v5649_v1 = vpop.eup %5648  ;;  %v3973_v5 = vmul.f32 0.044715, %v3941_v25  ;;  %v3942_v7 = vmul.f32 %v3910_v11, %v7796_v9  ;;  %v4099_v55 = vadd.f32 1.0, %v5647_v35 }
 0x984   : > { %v5651_v16 = vpop.eup %5650  ;;  %v4007_v49 = vadd.f32 %v3975_v28, %v7783_v40  ;;  %v3976_v22 = vmul.f32 0.044715, %v3944_v8  ;;  %v4097_v2 = vadd.f32 1.0, %v5649_v1 }
 0x985   : > { %v5653_v24 = vpop.eup %5652  ;;  %v4005_v45 = vadd.f32 %v3973_v5, %v7786_v60  ;;  %v3974_v38 = vmul.f32 0.044715, %v3942_v7  ;;  %v4100_v63 = vadd.f32 1.0, %v5651_v16  ;;  %v4131_v17 = vmul.f32 0.5, %v4099_v55 }
 0x986   : > { %v4039_v41 = vmul.f32 0.7978846, %v4007_v49  ;;  %v4008_v36 = vadd.f32 %v3976_v22, %v7791_v47  ;;  %v4098_v56 = vadd.f32 1.0, %v5653_v24  ;;  %v4129_v62 = vmul.f32 0.5, %v4097_v2 }
 0x987   : > { %v4037_v46 = vmul.f32 0.7978846, %v4005_v45  ;;  %v4006_v0 = vadd.f32 %v3974_v38, %v7796_v9  ;;  %v4132_v52 = vmul.f32 0.5, %v4100_v63  ;;  %v4163_v29 = vmul.f32 %v4131_v17, %v7751_v51 }
 0x988   : > { %5654 = vtanh.f32 %v4039_v41  ;;  %v4040_v6 = vmul.f32 0.7978846, %v4008_v36  ;;  %v4130_v30 = vmul.f32 0.5, %v4098_v56  ;;  %v4161_v43 = vmul.f32 %v4129_v62, %v7754_v34 }
 0x989   : > { %5656 = vtanh.f32 %v4037_v46  ;;  %v4038_v19 = vmul.f32 0.7978846, %v4006_v0  ;;  %v4164_v31 = vmul.f32 %v4132_v52, %v7759_v53 }
 0x98a   : > { %5658 = vtanh.f32 %v4040_v6  ;;  %v4162_v54 = vmul.f32 %v4130_v30, %v7764_v61 }
 0x98b   : > { %5660 = vtanh.f32 %v4038_v19  ;;  %v5177_v15 = vpop.f32.mrb[164].mxu0  ;;  %v4186_v59 = vpack.c.bf16 %v4164_v31, %v4163_v29 }
 0x98c   : > { %v7815_v18 = vadd.f32 %v5177_v15, %v7624_v3  ;;  %v3858_v26 = vpop.f32.mrb[165].mxu0  ;;  %v4185_v27 = vpack.c.bf16 %v4162_v54, %v4161_v43 }
 0x98d   : > { %v7818_v50 = vadd.f32 %v7624_v3, %v3858_v26  ;;  %v5178_v32 = vpop.f32.mrb[166].mxu0 }
 0x98e   : > { %v3915_v51 = vmul.f32 %v7815_v18, %v7815_v18  ;;  %v7823_v53 = vadd.f32 %v5178_v32, %v7624_v3  ;;  %v3861_v34 = vpop.f32.mrb[167].mxu0  ;;  %5215 = vmatprep.mubr.bf16.mxu1 %v4185_v27 }
 0x98f   : > { %v3913_v61 = vmul.f32 %v7818_v50, %v7818_v50  ;;  %v7828_v58 = vadd.f32 %v7624_v3, %v3861_v34  ;;  %5216 = vmatmul.mubr.bf16.gmra.mrb[164].mxu1 %v4186_v59 }
 0x990   : > { %v3947_v25 = vmul.f32 %v3915_v51, %v7815_v18  ;;  %v3916_v11 = vmul.f32 %v7823_v53, %v7823_v53 }
 0x991   : > { %v3945_v35 = vmul.f32 %v3913_v61, %v7818_v50  ;;  %v3914_v28 = vmul.f32 %v7828_v58, %v7828_v58 }
 0x992   : > { %v5655_v8 = vpop.eup %5654  ;;  %v3979_v1 = vmul.f32 0.044715, %v3947_v25  ;;  %v3948_v5 = vmul.f32 %v3916_v11, %v7823_v53 }
 0x993   : > { %v5657_v7 = vpop.eup %5656  ;;  %v3977_v55 = vmul.f32 0.044715, %v3945_v35  ;;  %v3946_v16 = vmul.f32 %v3914_v28, %v7828_v58  ;;  %v4103_v49 = vadd.f32 1.0, %v5655_v8 }
 0x994   : > { %v5659_v22 = vpop.eup %5658  ;;  %v4011_v2 = vadd.f32 %v3979_v1, %v7815_v18  ;;  %v3980_v24 = vmul.f32 0.044715, %v3948_v5  ;;  %v4101_v45 = vadd.f32 1.0, %v5657_v7 }
 0x995   : > { %v5661_v38 = vpop.eup %5660  ;;  %v4009_v63 = vadd.f32 %v3977_v55, %v7818_v50  ;;  %v3978_v17 = vmul.f32 0.044715, %v3946_v16  ;;  %v4104_v41 = vadd.f32 1.0, %v5659_v22  ;;  %v4135_v36 = vmul.f32 0.5, %v4103_v49 }
 0x996   : > { %v4043_v56 = vmul.f32 0.7978846, %v4011_v2  ;;  %v4012_v62 = vadd.f32 %v3980_v24, %v7823_v53  ;;  %v4102_v46 = vadd.f32 1.0, %v5661_v38  ;;  %v4133_v0 = vmul.f32 0.5, %v4101_v45 }
 0x997   : > { %v4041_v52 = vmul.f32 0.7978846, %v4009_v63  ;;  %v4010_v6 = vadd.f32 %v3978_v17, %v7828_v58  ;;  %v4136_v30 = vmul.f32 0.5, %v4104_v41  ;;  %v4167_v43 = vmul.f32 %v4135_v36, %v7783_v40 }
 0x998   : > { %5662 = vtanh.f32 %v4043_v56  ;;  %v4044_v19 = vmul.f32 0.7978846, %v4012_v62  ;;  %v4134_v29 = vmul.f32 0.5, %v4102_v46  ;;  %v4165_v15 = vmul.f32 %v4133_v0, %v7786_v60 }
 0x999   : > { %5664 = vtanh.f32 %v4041_v52  ;;  %v4042_v31 = vmul.f32 0.7978846, %v4010_v6  ;;  %v4168_v54 = vmul.f32 %v4136_v30, %v7791_v47 }
 0x99a   : > { %5666 = vtanh.f32 %v4044_v19  ;;  %v4166_v59 = vmul.f32 %v4134_v29, %v7796_v9 }
 0x99b   : > { %5668 = vtanh.f32 %v4042_v31  ;;  %v5181_v26 = vpop.f32.mrb[168].mxu0  ;;  %v4188_v27 = vpack.c.bf16 %v4168_v54, %v4167_v43 }
 0x99c   : > { %v7847_v32 = vadd.f32 %v5181_v26, %v7624_v3  ;;  %v3874_v51 = vpop.f32.mrb[169].mxu0  ;;  %v4187_v34 = vpack.c.bf16 %v4166_v59, %v4165_v15 }
 0x99d   : > { %v7850_v61 = vadd.f32 %v7624_v3, %v3874_v51  ;;  %v5182_v25 = vpop.f32.mrb[170].mxu0 }
 0x99e   : > { %v3919_v40 = vmul.f32 %v7847_v32, %v7847_v32  ;;  %v3886_v47 = vadd.f32 %v5182_v25, %v7624_v3  ;;  %v3877_v60 = vpop.f32.mrb[171].mxu0  ;;  %5219 = vmatprep.mubr.bf16.mxu1 %v4187_v34 }
 0x99f   : > { %v3917_v9 = vmul.f32 %v7850_v61, %v7850_v61  ;;  %v3878_v11 = vadd.f32 %v7624_v3, %v3877_v60  ;;  %5220 = vmatmul.mubr.bf16.gmra.mrb[168].mxu1 %v4188_v27 }
 0x9a0   : > { %v3951_v35 = vmul.f32 %v3919_v40, %v7847_v32  ;;  %v3920_v28 = vmul.f32 %v3886_v47, %v3886_v47 }
 0x9a1   : > { %v3949_v8 = vmul.f32 %v3917_v9, %v7850_v61  ;;  %v3918_v1 = vmul.f32 %v3878_v11, %v3878_v11 }
 0x9a2   : > { %v5663_v5 = vpop.eup %5662  ;;  %v3983_v7 = vmul.f32 0.044715, %v3951_v35  ;;  %v3952_v55 = vmul.f32 %v3920_v28, %v3886_v47 }
 0x9a3   : > { %v5665_v16 = vpop.eup %5664  ;;  %v3981_v49 = vmul.f32 0.044715, %v3949_v8  ;;  %v3950_v22 = vmul.f32 %v3918_v1, %v3878_v11  ;;  %v4107_v2 = vadd.f32 1.0, %v5663_v5 }
 0x9a4   : > { %v5667_v24 = vpop.eup %5666  ;;  %v4015_v45 = vadd.f32 %v3983_v7, %v7847_v32  ;;  %v3984_v38 = vmul.f32 0.044715, %v3952_v55  ;;  %v4105_v63 = vadd.f32 1.0, %v5665_v16 }
 0x9a5   : > { %v5669_v3 = vpop.eup %5668  ;;  %v4013_v17 = vadd.f32 %v3981_v49, %v7850_v61  ;;  %v3982_v41 = vmul.f32 0.044715, %v3950_v22  ;;  %v4108_v36 = vadd.f32 1.0, %v5667_v24  ;;  %v4139_v56 = vmul.f32 0.5, %v4107_v2  ;;  %v5292_v2 = vld [vmem:[%s8002_s16] sm:$0xff]  }
 0x9a6   : > { %v4047_v62 = vmul.f32 0.7978846, %v4015_v45  ;;  %v4016_v46 = vadd.f32 %v3984_v38, %v3886_v47  ;;  %v4106_v0 = vadd.f32 1.0, %v5669_v3  ;;  %v4137_v52 = vmul.f32 0.5, %v4105_v63 }
 0x9a7   : > { %v4045_v6 = vmul.f32 0.7978846, %v4013_v17  ;;  %v4014_v30 = vadd.f32 %v3982_v41, %v3878_v11  ;;  %v4140_v19 = vmul.f32 0.5, %v4108_v36  ;;  %v4171_v54 = vmul.f32 %v4139_v56, %v7815_v18 }
 0x9a8   : > { %5670 = vtanh.f32 %v4047_v62  ;;  %v4048_v29 = vmul.f32 0.7978846, %v4016_v46  ;;  %v4138_v31 = vmul.f32 0.5, %v4106_v0  ;;  %v4169_v59 = vmul.f32 %v4137_v52, %v7818_v50 }
 0x9a9   : > { %5672 = vtanh.f32 %v4045_v6  ;;  %v4046_v43 = vmul.f32 0.7978846, %v4014_v30  ;;  %v4172_v15 = vmul.f32 %v4140_v19, %v7823_v53  ;;  %v5687_v22 = vmov 0.0  }
 0x9aa   : > { %5674 = vtanh.f32 %v4048_v29  ;;  %v4170_v26 = vmul.f32 %v4138_v31, %v7828_v58  ;;  %5231 = vmatprep.subr.bf16.mxu0 %v5687_v22  ;;  %5235 = vmatprep.mubr.msk.bf16.mxu0 %vm5688_vm5, %v5687_v22 }
 0x9ab   : > { %5676 = vtanh.f32 %v4046_v43  ;;  %v4190_v27 = vpack.c.bf16 %v4172_v15, %v4171_v54  ;;  %5232 = vmatpush3.bf16.msra.mxu0 %v5292_v2 }
 0x9ac   : > { %v4189_v51 = vpack.c.bf16 %v4170_v26, %v4169_v59  ;;  %5233 = vmatprep.subr.bf16.mxu0 %v5687_v22 }
 0x9ae   : > { %5223 = vmatprep.mubr.bf16.mxu1 %v4189_v51 }
 0x9af   : > { %5224 = vmatmul.mubr.bf16.gmra.mrb[172].mxu1 %v4190_v27 }
 0x9b2   : > { %v5671_v34 = vpop.eup %5670 }
 0x9b3   : > { %v5673_v25 = vpop.eup %5672  ;;  %v4111_v40 = vadd.f32 1.0, %v5671_v34 }
 0x9b4   : > { %v5675_v60 = vpop.eup %5674  ;;  %v4109_v9 = vadd.f32 1.0, %v5673_v25 }
 0x9b5   : > { %v5677_v35 = vpop.eup %5676  ;;  %v4112_v28 = vadd.f32 1.0, %v5675_v60  ;;  %v4143_v18 = vmul.f32 0.5, %v4111_v40 }
 0x9b6   : > { %v4110_v8 = vadd.f32 1.0, %v5677_v35  ;;  %v4141_v53 = vmul.f32 0.5, %v4109_v9 }
 0x9b7   : > { %v4144_v1 = vmul.f32 0.5, %v4112_v28  ;;  %v4175_v50 = vmul.f32 %v4143_v18, %v7847_v32  ;;  %v5293_v32 = vld [vmem:[%s8002_s16 + $0x8] sm:$0xff]  }
 0x9b8   : > { %v4142_v5 = vmul.f32 0.5, %v4110_v8  ;;  %v4173_v7 = vmul.f32 %v4141_v53, %v7850_v61  ;;  %5234 = vmatpush3.bf16.msra.mxu0 %v5293_v32  ;;  %v7877_v61 = vld [vmem:[%s8001_s15] ss:$0 sm:$0xff] }
 0x9b9   : > { %v4176_v58 = vmul.f32 %v4144_v1, %v3886_v47 }
 0x9ba   : > { %v4174_v55 = vmul.f32 %v4142_v5, %v3878_v11 }
 0x9bb   : > { %v4192_v16 = vpack.c.bf16 %v4176_v58, %v4175_v50 }
 0x9bc   : > { %v4191_v49 = vpack.c.bf16 %v4174_v55, %v4173_v7 }
 0x9be   : > { %5227 = vmatprep.mubr.bf16.mxu1 %v4191_v49 }
 0x9bf   : > { %5228 = vmatmul.mubr.bf16.gmra.mrb[176].mxu1 %v4192_v16 }
 0xa22   : > { %v5201_v47 = vpop.f32.mrb[148].mxu1 }
 0xa23   : > { %v4298_v11 = vpop.f32.mrb[149].mxu1  ;;  %v4307_v24 = vadd.f32 %v5201_v47, %v7877_v61 }
 0xa24   : > { %v4299_v45 = vadd.f32 %v7877_v61, %v4298_v11  ;;  %v5202_v38 = vpop.f32.mrb[150].mxu1 }
 0xa25   : > { %v4301_v63 = vpop.f32.mrb[151].mxu1  ;;  %v4310_v17 = vadd.f32 %v5202_v38, %v7877_v61  ;;  %v4427_v36 = vadd.f32 %v4307_v24, %v7100_v48 }
 0xa26   : > { %v4425_v3 = vadd.f32 %v4299_v45, %v7088_v37  ;;  %v4302_v41 = vadd.f32 %v7877_v61, %v4301_v63 }
 0xa27   : > { %v4428_v46 = vadd.f32 %v4310_v17, %v7105_v4  ;;  %v4460_v6 = vsel %vm1223_vm4, %v4427_v36, 0.0 }
 0xa28   : > { %v4426_v56 = vadd.f32 %v4302_v41, %v7093_v10  ;;  %v4457_v62 = vsel %vm1223_vm4, %v4425_v3, 0.0 }
 0xa29   : > { %v4462_v37 = vsel %vm1223_vm4, %v4428_v46, 0.0  ;;  %v8200_v46 = vld [vmem:[#allocation34_spill] sm:$0xff] }
 0xa2a   : > { %v4458_v0 = vsel %vm1223_vm4, %v4426_v56, 0.0 }
 0xa2b   : > { %v4459_v52 = vadd.f32 %v4458_v0, %v4457_v62 }
 0xa2d   : > { %v4461_v30 = vadd.f32 %v4460_v6, %v4459_v52 }
 0xa2f   : > { %v4463_v19 = vadd.f32 %v4462_v37, %v4461_v30 }
 0xa32   : > { %v5205_v29 = vpop.f32.mrb[152].mxu1 }
 0xa33   : > { %v4314_v31 = vpop.f32.mrb[153].mxu1  ;;  %v4323_v48 = vadd.f32 %v5205_v29, %v7877_v61 }
 0xa34   : > { %v4315_v10 = vadd.f32 %v7877_v61, %v4314_v31  ;;  %v5206_v43 = vpop.f32.mrb[154].mxu1 }
 0xa35   : > { %v4317_v54 = vpop.f32.mrb[155].mxu1  ;;  %v4326_v15 = vadd.f32 %v5206_v43, %v7877_v61  ;;  %v4431_v26 = vadd.f32 %v4323_v48, %v7124_v20  ;;  %v8201_v43 = vld [vmem:[#allocation35_spill] sm:$0xff] }
 0xa36   : > { %v4429_v4 = vadd.f32 %v4315_v10, %v7112_v39  ;;  %v4318_v59 = vadd.f32 %v7877_v61, %v4317_v54 }
 0xa37   : > { %v4432_v25 = vadd.f32 %v4326_v15, %v7129_v57  ;;  %v4468_v9 = vsel %vm1223_vm4, %v4431_v26, 0.0 }
 0xa38   : > { %v4464_v27 = vsel %vm1223_vm4, %v4429_v4, 0.0  ;;  %v4430_v51 = vadd.f32 %v4318_v59, %v7117_v42  ;;  %v8202_v59 = vld [vmem:[#allocation37_spill] sm:$0xff] }
 0xa39   : > { %v4465_v34 = vadd.f32 %v4464_v27, %v4463_v19  ;;  %v4470_v39 = vsel %vm1223_vm4, %v4432_v25, 0.0 }
 0xa3a   : > { %v4466_v40 = vsel %vm1223_vm4, %v4430_v51, 0.0  ;;  %v8203_v51 = vld [vmem:[#allocation36_spill] sm:$0xff] }
 0xa3b   : > { %v4467_v60 = vadd.f32 %v4466_v40, %v4465_v34  ;;  %v8204_v40 = vld [vmem:[#allocation38_spill] sm:$0xff] }
 0xa3d   : > { %v4469_v35 = vadd.f32 %v4468_v9, %v4467_v60 }
 0xa3f   : > { %v4471_v28 = vadd.f32 %v4470_v39, %v4469_v35 }
 0xa42   : > { %v5209_v18 = vpop.f32.mrb[156].mxu1 }
 0xa43   : > { %v4330_v8 = vpop.f32.mrb[157].mxu1  ;;  %v4339_v20 = vadd.f32 %v5209_v18, %v7877_v61 }
 0xa44   : > { %v4331_v53 = vadd.f32 %v7877_v61, %v4330_v8  ;;  %v5210_v1 = vpop.f32.mrb[158].mxu1 }
 0xa45   : > { %v4333_v42 = vpop.f32.mrb[159].mxu1  ;;  %v4342_v57 = vadd.f32 %v5210_v1, %v7877_v61  ;;  %v4435_v58 = vadd.f32 %v4339_v20, %v7148_v44 }
 0xa46   : > { %v4433_v5 = vadd.f32 %v4331_v53, %v7136_v21  ;;  %v4334_v50 = vadd.f32 %v7877_v61, %v4333_v42 }
 0xa47   : > { %v4436_v49 = vadd.f32 %v4342_v57, %v7153_v14  ;;  %v4476_v32 = vsel %vm1223_vm4, %v4435_v58, 0.0 }
 0xa48   : > { %v4472_v7 = vsel %vm1223_vm4, %v4433_v5, 0.0  ;;  %v4434_v55 = vadd.f32 %v4334_v50, %v7141_v12  ;;  %v8205_v50 = vld [vmem:[#allocation39_spill] sm:$0xff] }
 0xa49   : > { %v4473_v16 = vadd.f32 %v4472_v7, %v4471_v28  ;;  %v4478_v21 = vsel %vm1223_vm4, %v4436_v49, 0.0 }
 0xa4a   : > { %v4474_v22 = vsel %vm1223_vm4, %v4434_v55, 0.0 }
 0xa4b   : > { %v4475_v2 = vadd.f32 %v4474_v22, %v4473_v16  ;;  %v8206_v16 = vld [vmem:[#allocation41_spill] sm:$0xff] }
 0xa4d   : > { %v4477_v47 = vadd.f32 %v4476_v32, %v4475_v2  ;;  %v8207_v2 = vld [vmem:[#allocation40_spill] sm:$0xff] }
 0xa4f   : > { %v4479_v11 = vadd.f32 %v4478_v21, %v4477_v47  ;;  %v8208_v21 = vld [vmem:[#allocation42_spill] sm:$0xff] }
 0xa52   : > { %v5213_v24 = vpop.f32.mrb[160].mxu1 }
 0xa53   : > { %v4346_v45 = vpop.f32.mrb[161].mxu1  ;;  %v4355_v44 = vadd.f32 %v5213_v24, %v7877_v61 }
 0xa54   : > { %v4347_v38 = vadd.f32 %v7877_v61, %v4346_v45  ;;  %v5214_v63 = vpop.f32.mrb[162].mxu1 }
 0xa55   : > { %v4349_v12 = vpop.f32.mrb[163].mxu1  ;;  %v4358_v14 = vadd.f32 %v5214_v63, %v7877_v61  ;;  %v4439_v41 = vadd.f32 %v4355_v44, %v7172_v23 }
 0xa56   : > { %v4437_v3 = vadd.f32 %v4347_v38, %v7160_v13  ;;  %v4350_v17 = vadd.f32 %v7877_v61, %v4349_v12 }
 0xa57   : > { %v4440_v0 = vadd.f32 %v4358_v14, %v8200_v46  ;;  %v4484_v30 = vsel %vm1223_vm4, %v4439_v41, 0.0 }
 0xa58   : > { %v4480_v36 = vsel %vm1223_vm4, %v4437_v3, 0.0  ;;  %v4438_v56 = vadd.f32 %v4350_v17, %v7165_v33 }
 0xa59   : > { %v4481_v62 = vadd.f32 %v4480_v36, %v4479_v11  ;;  %v4486_v13 = vsel %vm1223_vm4, %v4440_v0, 0.0 }
 0xa5a   : > { %v4482_v52 = vsel %vm1223_vm4, %v4438_v56, 0.0 }
 0xa5b   : > { %v4483_v6 = vadd.f32 %v4482_v52, %v4481_v62  ;;  %v8209_v62 = vld [vmem:[#allocation43_spill] sm:$0xff] }
 0xa5d   : > { %v4485_v37 = vadd.f32 %v4484_v30, %v4483_v6  ;;  %v8210_v6 = vld [vmem:[#allocation45_spill] sm:$0xff] }
 0xa5f   : > { %v4487_v19 = vadd.f32 %v4486_v13, %v4485_v37  ;;  %v8211_v13 = vld [vmem:[#allocation44_spill] sm:$0xff] }
 0xa62   : > { %v5217_v29 = vpop.f32.mrb[164].mxu1 }
 0xa63   : > { %v4362_v31 = vpop.f32.mrb[165].mxu1  ;;  %v4371_v23 = vadd.f32 %v5217_v29, %v7877_v61 }
 0xa64   : > { %v4363_v48 = vadd.f32 %v7877_v61, %v4362_v31  ;;  %v5218_v10 = vpop.f32.mrb[166].mxu1  ;;  %v8212_v31 = vld [vmem:[#allocation46_spill] sm:$0xff] }
 0xa65   : > { %v4365_v33 = vpop.f32.mrb[167].mxu1  ;;  %v4374_v4 = vadd.f32 %v5218_v10, %v7877_v61  ;;  %v4443_v26 = vadd.f32 %v4371_v23, %v8202_v59 }
 0xa66   : > { %v4441_v54 = vadd.f32 %v4363_v48, %v8201_v43  ;;  %v4366_v15 = vadd.f32 %v7877_v61, %v4365_v33 }
 0xa67   : > { %v4444_v60 = vadd.f32 %v4374_v4, %v8204_v40  ;;  %v4492_v39 = vsel %vm1223_vm4, %v4443_v26, 0.0 }
 0xa68   : > { %v4488_v27 = vsel %vm1223_vm4, %v4441_v54, 0.0  ;;  %v4442_v34 = vadd.f32 %v4366_v15, %v8203_v51 }
 0xa69   : > { %v4489_v25 = vadd.f32 %v4488_v27, %v4487_v19  ;;  %v4494_v18 = vsel %vm1223_vm4, %v4444_v60, 0.0 }
 0xa6a   : > { %v4490_v9 = vsel %vm1223_vm4, %v4442_v34, 0.0 }
 0xa6b   : > { %v4491_v35 = vadd.f32 %v4490_v9, %v4489_v25  ;;  %v8213_v25 = vld [vmem:[#allocation3_spill] sm:$0xff] }
 0xa6d   : > { %v4493_v28 = vadd.f32 %v4492_v39, %v4491_v35  ;;  %v8214_v35 = vld [vmem:[#allocation2_spill] sm:$0xff] }
 0xa6f   : > { %v4495_v8 = vadd.f32 %v4494_v18, %v4493_v28  ;;  %v8215_v18 = vld [vmem:[#allocation5_spill] sm:$0xff] }
 0xa72   : > { %v5221_v20 = vpop.f32.mrb[168].mxu1 }
 0xa73   : > { %v4378_v53 = vpop.f32.mrb[169].mxu1  ;;  %v4387_v1 = vadd.f32 %v5221_v20, %v7877_v61 }
 0xa74   : > { %v4379_v42 = vadd.f32 %v7877_v61, %v4378_v53  ;;  %v5222_v5 = vpop.f32.mrb[170].mxu1  ;;  %v8216_v53 = vld [vmem:[#allocation4_spill] sm:$0xff] }
 0xa75   : > { %v4381_v57 = vpop.f32.mrb[171].mxu1  ;;  %v4390_v7 = vadd.f32 %v5222_v5, %v7877_v61  ;;  %v4447_v49 = vadd.f32 %v4387_v1, %v8206_v16 }
 0xa76   : > { %v4445_v58 = vadd.f32 %v4379_v42, %v8205_v50  ;;  %v4382_v55 = vadd.f32 %v7877_v61, %v4381_v57 }
 0xa77   : > { %v4448_v11 = vadd.f32 %v4390_v7, %v8208_v21  ;;  %v4500_v44 = vsel %vm1223_vm4, %v4447_v49, 0.0  ;;  %v4533_v21 = vld [vmem:[%s8003_s17] sm:$0x1] }
 0xa78   : > { %v4496_v22 = vsel %vm1223_vm4, %v4445_v58, 0.0  ;;  %v4446_v32 = vadd.f32 %v4382_v55, %v8207_v2 }
 0xa79   : > { %v4497_v47 = vadd.f32 %v4496_v22, %v4495_v8  ;;  %v4502_v63 = vsel %vm1223_vm4, %v4448_v11, 0.0 }
 0xa7a   : > { %v4498_v24 = vsel %vm1223_vm4, %v4446_v32, 0.0 }
 0xa7b   : > { %v4499_v45 = vadd.f32 %v4498_v24, %v4497_v47 }
 0xa7d   : > { %v4501_v38 = vadd.f32 %v4500_v44, %v4499_v45 }
 0xa7f   : > { %v4503_v12 = vadd.f32 %v4502_v63, %v4501_v38 }
 0xa82   : > { %v5225_v3 = vpop.f32.mrb[172].mxu1 }
 0xa83   : > { %v4394_v14 = vpop.f32.mrb[173].mxu1  ;;  %v4403_v17 = vadd.f32 %v5225_v3, %v7877_v61 }
 0xa84   : > { %v4395_v41 = vadd.f32 %v7877_v61, %v4394_v14  ;;  %v5226_v36 = vpop.f32.mrb[174].mxu1 }
 0xa85   : > { %v4397_v56 = vpop.f32.mrb[175].mxu1  ;;  %v4406_v0 = vadd.f32 %v5226_v36, %v7877_v61  ;;  %v4451_v30 = vadd.f32 %v4403_v17, %v8210_v6 }
 0xa86   : > { %v4449_v46 = vadd.f32 %v4395_v41, %v8209_v62  ;;  %v4398_v52 = vadd.f32 %v7877_v61, %v4397_v56 }
 0xa87   : > { %v4452_v23 = vadd.f32 %v4406_v0, %v8212_v31  ;;  %v4508_v33 = vsel %vm1223_vm4, %v4451_v30, 0.0 }
 0xa88   : > { %v4504_v37 = vsel %vm1223_vm4, %v4449_v46, 0.0  ;;  %v4450_v19 = vadd.f32 %v4398_v52, %v8211_v13 }
 0xa89   : > { %v4505_v29 = vadd.f32 %v4504_v37, %v4503_v12  ;;  %v4510_v54 = vsel %vm1223_vm4, %v4452_v23, 0.0 }
 0xa8a   : > { %v4506_v48 = vsel %vm1223_vm4, %v4450_v19, 0.0 }
 0xa8b   : > { %v4507_v10 = vadd.f32 %v4506_v48, %v4505_v29 }
 0xa8d   : > { %v4509_v43 = vadd.f32 %v4508_v33, %v4507_v10 }
 0xa8f   : > { %v4511_v4 = vadd.f32 %v4510_v54, %v4509_v43 }
 0xa92   : > { %v5229_v15 = vpop.f32.mrb[176].mxu1 }
 0xa93   : > { %v4410_v59 = vpop.f32.mrb[177].mxu1  ;;  %v4419_v26 = vadd.f32 %v5229_v15, %v7877_v61 }
 0xa94   : > { %v4411_v27 = vadd.f32 %v7877_v61, %v4410_v59  ;;  %v5230_v51 = vpop.f32.mrb[178].mxu1 }
 0xa95   : > { %v4413_v34 = vpop.f32.mrb[179].mxu1  ;;  %v4422_v60 = vadd.f32 %v5230_v51, %v7877_v61  ;;  %v4455_v39 = vadd.f32 %v4419_v26, %v8214_v35 }
 0xa96   : > { %v4453_v40 = vadd.f32 %v4411_v27, %v8213_v25  ;;  %v4414_v9 = vadd.f32 %v7877_v61, %v4413_v34 }
 0xa97   : > { %v4456_v1 = vadd.f32 %v4422_v60, %v8216_v53  ;;  %v4516_v57 = vsel %vm1223_vm4, %v4455_v39, 0.0 }
 0xa98   : > { %v4512_v28 = vsel %vm1223_vm4, %v4453_v40, 0.0  ;;  %v4454_v8 = vadd.f32 %v4414_v9, %v8215_v18 }
 0xa99   : > { %v4513_v20 = vadd.f32 %v4512_v28, %v4511_v4  ;;  %v4518_v58 = vsel %vm1223_vm4, %v4456_v1, 0.0 }
 0xa9a   : > { %v4514_v42 = vsel %vm1223_vm4, %v4454_v8, 0.0 }
 0xa9b   : > { %v4515_v5 = vadd.f32 %v4514_v42, %v4513_v20 }
 0xa9d   : > { %v4517_v50 = vadd.f32 %v4516_v57, %v4515_v5 }
 0xa9f   : > { %v4519_v7 = vadd.f32 %v4518_v58, %v4517_v50 }
 0xaa1   : > { %v4520_v61 = vrot.slane %v4519_v7, 4 }
 0xaa3   : > { %v4521_v55 = vadd.f32 %v4520_v61, %v4519_v7 }
 0xaa5   : > { %v4522_v16 = vrot.slane %v4521_v55, 2 }
 0xaa7   : > { %v4523_v49 = vadd.f32 %v4522_v16, %v4521_v55 }
 0xaa9   : > { %v4524_v22 = vrot.slane %v4523_v49, 1 }
 0xaab   : > { %v4525_v2 = vadd.f32 %v4524_v22, %v4523_v49 }
 0xaad   : > { %v4527_v32 = vmul.f32 0.00390625, %v4525_v2 }
 0xaaf   : > { %v4528_v47 = vpack.c.bf16 %v4527_v32, %v4527_v32 }
 0xab1   : > { %5236 = vmatmul.mubr.msk.bf16.vlgmr.msra.gmra.mrb[172].mxu0 %vm1223_vm4, %v4528_v47 }
 0xb84   : > { %v4583_v11 = vpop.f32.mrb[172].mxu0 }
 0xb85   : > { %v4584_v24 = vadd.f32 %v4583_v11, %v4533_v21  ;;  %v5237_v45 = vpop.f32.mrb[173].mxu0 }
 0xb86   : > { %v4586_v44 = vpop.f32.mrb[174].mxu0 }
 0xb87   : > { %4589 = vst [vmem:[%s573_s21] sm:$0x1] %v4584_v24  ;;  %v5238_v38 = vpop.f32.mrb[175].mxu0 }
 0xb88 PF: > { %s28_s27 = sadd.s32 1, %s5684_s27  }
 0xb89   : > { %p25_p4 = scmp.ge.s32.totalorder %s28_s27, 4  }
 0xb8b   :  { %27 = sbr.rel (!%p25_p4) target bundleno = 4 (0x4), region = 122 }

</bundles_post_ra>
